<compile_context>
chip_gen: v5e
topology: v5e:2x2
jax: 0.10.0
libtpu: 0.0.40
codegen_flags: <defaults>
</compile_context>

<pallas_src>
import functools

import jax
import jax.numpy as jnp
from jax import lax
from jax.experimental import pallas as pl
from jax.experimental.pallas import tpu as pltpu


def _round_up(n, m):
    return (n + m - 1) // m * m


def _sigmoid(x):
    # One EUP op (tanh) instead of exp + reciprocal.
    return 0.5 * jnp.tanh(0.5 * x) + 0.5


# ------------------------------ fused kernel ---------------------------------
def _make_kernel(L, S, Hp, Dinp):
    """Kernel closure over static #layers, seq len, padded hidden / input dims."""

    def kernel(x_ref, wih_ref, whh_ref, b_ref, fcw_ref, fcb_ref, out_ref,
               gates_scr, h_scr, c_scr, *maybe_hseq):
        hseq_scr = maybe_hseq[0] if L > 1 else None
        l = pl.program_id(0)

        def project(inp3d):
            # One big MXU matmul (bf16 x bf16 -> f32 acc) for the whole
            # sequence's input projection of this layer.
            gx = jnp.dot(inp3d.reshape(S * inp3d.shape[1], Dinp), wih_ref[0],
                         preferred_element_type=jnp.float32) + b_ref[0]
            gates_scr[...] = gx.reshape(gates_scr.shape).astype(gates_scr.dtype)

        if L > 1:
            @pl.when(l == 0)
            def _():
                if Dinp > Hp:
                    # Zero padded hseq columns once so zero weight rows never
                    # meet uninitialized VMEM (NaN*0 hazard).
                    hseq_scr[...] = jnp.zeros_like(hseq_scr)
                project(x_ref[...])

            @pl.when(l > 0)
            def _():
                project(hseq_scr[...])
        else:
            project(x_ref[...])

        h_scr[...] = jnp.zeros_like(h_scr)
        c_scr[...] = jnp.zeros_like(c_scr)

        def step(t, carry):
            # h @ W_hh: weight streamed from its VMEM ref inside the dot
            # (never held as a live 64-vreg value across the loop).
            gates = gates_scr[t].astype(jnp.float32) + jnp.dot(
                h_scr[...].astype(jnp.bfloat16), whh_ref[0],
                preferred_element_type=jnp.float32)
            i = _sigmoid(gates[:, 0 * Hp:1 * Hp])
            f = _sigmoid(gates[:, 1 * Hp:2 * Hp])
            g = jnp.tanh(gates[:, 2 * Hp:3 * Hp])
            o = _sigmoid(gates[:, 3 * Hp:4 * Hp])
            c = f * c_scr[...] + i * g
            h = o * jnp.tanh(c)
            c_scr[...] = c
            h_scr[...] = h
            if L > 1:
                if Dinp == Hp:
                    hseq_scr[t] = h.astype(hseq_scr.dtype)
                else:
                    hseq_scr[t, :, 0:Hp] = h.astype(hseq_scr.dtype)
            return carry

        # Partial unroll: keeps LLO scheduling visibility without one giant
        # basic block / vreg-spill storm when S grows.
        lax.fori_loop(0, S, step, 0, unroll=min(8, S))

        # Final FC on the last timestep's hidden state of the last layer.
        @pl.when(l == L - 1)
        def _():
            out_ref[...] = (jnp.dot(h_scr[...].astype(jnp.bfloat16),
                                    fcw_ref[...],
                                    preferred_element_type=jnp.float32)
                            + fcb_ref[...]).astype(out_ref.dtype)

    return kernel


# ------------------------- param init / preparation --------------------------
def init_params(key, input_dim, hidden_dim, output_dim, layers):
    """PyTorch-layout params (uniform(-1/sqrt(H), 1/sqrt(H)))."""
    k = 1.0 / jnp.sqrt(jnp.float32(hidden_dim))
    params = {"lstm": []}
    for layer in range(layers):
        d_in = input_dim if layer == 0 else hidden_dim
        key, k1, k2, k3, k4 = jax.random.split(key, 5)
        w_ih = jax.random.uniform(k1, (4 * hidden_dim, d_in), jnp.float32, -k, k)
        w_hh = jax.random.uniform(k2, (4 * hidden_dim, hidden_dim), jnp.float32, -k, k)
        b_ih = jax.random.uniform(k3, (4 * hidden_dim,), jnp.float32, -k, k)
        b_hh = jax.random.uniform(k4, (4 * hidden_dim,), jnp.float32, -k, k)
        params["lstm"].append((w_ih, w_hh, b_ih, b_hh))
    key, k5, k6 = jax.random.split(key, 3)
    params["fc_w"] = jax.random.uniform(k5, (output_dim, hidden_dim), jnp.float32, -k, k)
    params["fc_b"] = jax.random.uniform(k6, (output_dim,), jnp.float32, -k, k)
    return params


def prepare_kernel_params(params, hidden_dim, output_dim):
    """One-time: transpose to MXU layout, pre-sum biases, zero-pad each gate to
    Hp=128 lanes, stack layers along a leading axis, cast weights to bf16.
    Zero padding keeps padded hidden columns exactly 0 through the recurrence
    (sigmoid(0)=0.5 but g=tanh(0)=0 and c,h start at 0), so no masking is
    needed."""
    H = hidden_dim
    Hp = _round_up(H, 128)
    Op = _round_up(output_dim, 128)
    L = len(params["lstm"])
    Dinp = max(_round_up(w_ih.shape[1], 128) for (w_ih, _, _, _) in params["lstm"])

    wih_all = jnp.zeros((L, Dinp, 4 * Hp), jnp.float32)
    whh_all = jnp.zeros((L, Hp, 4 * Hp), jnp.float32)
    b_all = jnp.zeros((L, 1, 4 * Hp), jnp.float32)
    for layer, (w_ih, w_hh, b_ih, b_hh) in enumerate(params["lstm"]):
        din = w_ih.shape[1]
        for g in range(4):  # gate order [i, f, g, o]
            wih_all = wih_all.at[layer, :din, g * Hp:g * Hp + H].set(
                w_ih[g * H:(g + 1) * H, :].T)
            whh_all = whh_all.at[layer, :H, g * Hp:g * Hp + H].set(
                w_hh[g * H:(g + 1) * H, :].T)
            b_all = b_all.at[layer, 0, g * Hp:g * Hp + H].set(
                b_ih[g * H:(g + 1) * H] + b_hh[g * H:(g + 1) * H])

    fc_w = jnp.zeros((Hp, Op), jnp.float32).at[:H, :output_dim].set(
        params["fc_w"].T)
    fc_b = jnp.zeros((1, Op), jnp.float32).at[0, :output_dim].set(params["fc_b"])
    return {
        "wih": wih_all.astype(jnp.bfloat16),   # bf16 MXU operands
        "whh": whh_all.astype(jnp.bfloat16),
        "b": b_all,                            # bias stays f32 (post-MXU add)
        "fc_w": fc_w.astype(jnp.bfloat16),
        "fc_b": fc_b,
    }


# -------------------------------- forward ------------------------------------
@functools.partial(jax.jit, static_argnames=("hidden_dim", "output_dim"))
def lstm_model_forward(prepped, x, hidden_dim, output_dim):
    """x: (B, S, D) batch_first like the PyTorch module. Returns (B, output_dim)."""
    B, S, D = x.shape
    Bp = _round_up(B, 16)                 # bf16 sublane tile is (16, 128)
    Hp = _round_up(hidden_dim, 128)
    Op = _round_up(output_dim, 128)
    wih_all = prepped["wih"]
    L, Dinp, _ = wih_all.shape

    # time-major, zero-padded, bf16 (S, Bp, Dinp)
    x_tm = jnp.transpose(x, (1, 0, 2)).astype(jnp.bfloat16)
    x_p = jnp.zeros((S, Bp, Dinp), jnp.bfloat16).at[:, :B, :D].set(x_tm)

    scratch_shapes = [
        pltpu.VMEM((S, Bp, 4 * Hp), jnp.bfloat16),   # precomputed x-gates
        pltpu.VMEM((Bp, Hp), jnp.float32),           # h carry (f32 state)
        pltpu.VMEM((Bp, Hp), jnp.float32),           # c carry (f32 state)
    ]
    if L > 1:
        scratch_shapes.append(pltpu.VMEM((S, Bp, Dinp), jnp.bfloat16))  # hseq

    out_p = pl.pallas_call(
        _make_kernel(L, S, Hp, Dinp),
        out_shape=jax.ShapeDtypeStruct((Bp, Op), jnp.float32),
        grid=(L,),
        in_specs=[
            pl.BlockSpec((S, Bp, Dinp), lambda l: (0, 0, 0)),      # x (resident)
            pl.BlockSpec((1, Dinp, 4 * Hp), lambda l: (l, 0, 0)),  # W_ih[l]
            pl.BlockSpec((1, Hp, 4 * Hp), lambda l: (l, 0, 0)),    # W_hh[l]
            pl.BlockSpec((1, 1, 4 * Hp), lambda l: (l, 0, 0)),     # bias[l]
            pl.BlockSpec((Hp, Op), lambda l: (0, 0)),              # fc_w
            pl.BlockSpec((1, Op), lambda l: (0, 0)),               # fc_b
        ],
        out_specs=pl.BlockSpec((Bp, Op), lambda l: (0, 0)),
        scratch_shapes=scratch_shapes,
        compiler_params=pltpu.CompilerParams(
            dimension_semantics=("arbitrary",),
            vmem_limit_bytes=48 * 1024 * 1024),
    )(x_p, wih_all, prepped["whh"], prepped["b"],
      prepped["fc_w"], prepped["fc_b"])
    return out_p[:B, :output_dim]


# -------------------------- pure-JAX reference (check) ------------------------
def _ref_forward(params, x):
    B, S, D = x.shape
    h_seq = x
    for (w_ih, w_hh, b_ih, b_hh) in params["lstm"]:
        H = w_hh.shape[1]
        h = jnp.zeros((B, H), jnp.float32)
        c = jnp.zeros((B, H), jnp.float32)
        outs = []
        for t in range(S):
            gates = h_seq[:, t] @ w_ih.T + h @ w_hh.T + b_ih + b_hh
            i = jax.nn.sigmoid(gates[:, 0 * H:1 * H])
            f = jax.nn.sigmoid(gates[:, 1 * H:2 * H])
            g = jnp.tanh(gates[:, 2 * H:3 * H])
            o = jax.nn.sigmoid(gates[:, 3 * H:4 * H])
            c = f * c + i * g
            h = o * jnp.tanh(c)
            outs.append(h)
        h_seq = jnp.stack(outs, axis=1)
    return h_seq[:, -1] @ params["fc_w"].T + params["fc_b"]


if __name__ == "__main__":
    # Shapes consistent with the module: batch=2, seq=8, input_dim=4,
    # hidden_dim=10, output_dim=7, layers=2.
    B, S, D, H, O, L = 2, 8, 4, 10, 7, 2

    key = jax.random.PRNGKey(0)
    key, xk = jax.random.split(key)
    x = jax.random.normal(xk, (B, S, D), jnp.float32)

    params = init_params(key, D, H, O, L)
    prepped = prepare_kernel_params(params, H, O)

    out = jax.block_until_ready(
        lstm_model_forward(prepped, x, hidden_dim=H, output_dim=O))
    ref = jax.block_until_ready(_ref_forward(params, x))

    assert out.shape == (B, O), out.shape
    # bf16 MXU operands -> tolerance relaxed vs. bit-tight f32.
    assert jnp.allclose(out, ref, atol=5e-2, rtol=5e-2), (
        float(jnp.max(jnp.abs(out - ref))), out, ref)
    print("KERNEL_OK")
</pallas_src>

<mosaic_0001>
module attributes {stable_mosaic.version = 11 : i64} {
  func.func @kernel(%arg0: i32, %arg1: memref<8x16x128xbf16, #tpu.memory_space<vmem>>, %arg2: memref<1x128x512xbf16, #tpu.memory_space<vmem>>, %arg3: memref<1x128x512xbf16, #tpu.memory_space<vmem>>, %arg4: memref<1x1x512xf32, #tpu.memory_space<vmem>>, %arg5: memref<128x128xbf16, #tpu.memory_space<vmem>>, %arg6: memref<1x128xf32, #tpu.memory_space<vmem>>, %arg7: memref<16x128xf32, #tpu.memory_space<vmem>>, %arg8: memref<8x16x512xbf16, #tpu.memory_space<vmem>>, %arg9: memref<16x128xf32, #tpu.memory_space<vmem>>, %arg10: memref<16x128xf32, #tpu.memory_space<vmem>>, %arg11: memref<8x16x128xbf16, #tpu.memory_space<vmem>>) attributes {dimension_semantics = [#tpu.dimension_semantics<arbitrary>], iteration_bounds = array<i64: 2>, scalar_prefetch = 0 : i64, scratch_operands = 4 : i64, tpu.core_type = #tpu.core_type<tc>, window_params = [{pipeline_mode = #tpu.pipeline_mode<synchronous>, transform_indices = @transform_0, window_bounds = array<i64: 8, 16, 128>}, {transform_indices = @transform_1, window_bounds = array<i64: 1, 128, 512>}, {transform_indices = @transform_2, window_bounds = array<i64: 1, 128, 512>}, {transform_indices = @transform_3, window_bounds = array<i64: 1, 1, 512>}, {pipeline_mode = #tpu.pipeline_mode<synchronous>, transform_indices = @transform_4, window_bounds = array<i64: 128, 128>}, {pipeline_mode = #tpu.pipeline_mode<synchronous>, transform_indices = @transform_5, window_bounds = array<i64: 1, 128>}, {pipeline_mode = #tpu.pipeline_mode<synchronous>, transform_indices = @transform_6, window_bounds = array<i64: 16, 128>}]} {
    %c0_i32 = arith.constant 0 : i32
    %0 = arith.cmpi eq, %arg0, %c0_i32 : i32
    %1 = arith.extui %0 : i1 to i32
    %c0_i32_0 = arith.constant 0 : i32
    %2 = arith.cmpi ne, %1, %c0_i32_0 : i32
    scf.if %2 {
      %c0_210 = arith.constant 0 : index
      %c0_211 = arith.constant 0 : index
      %c0_212 = arith.constant 0 : index
      %405 = vector.load %arg1[%c0_210, %c0_211, %c0_212] : memref<8x16x128xbf16, #tpu.memory_space<vmem>>, vector<8x16x128xbf16>
      %406 = vector.shape_cast %405 : vector<8x16x128xbf16> to vector<128x128xbf16>
      %c0_213 = arith.constant 0 : index
      %c0_214 = arith.constant 0 : index
      %c0_215 = arith.constant 0 : index
      %407 = vector.load %arg2[%c0_213, %c0_214, %c0_215] : memref<1x128x512xbf16, #tpu.memory_space<vmem>>, vector<1x128x512xbf16>
      %408 = vector.shape_cast %407 : vector<1x128x512xbf16> to vector<128x512xbf16>
      %cst_216 = arith.constant dense<0.000000e+00> : vector<128x512xf32>
      %409 = tpu.matmul %406, %408, %cst_216 {dimension_numbers = #tpu.dot_dimension_numbers<[1], [0], [0], [1], [0, 0, 1, 1], [], []>} : vector<128x128xbf16>, vector<128x512xbf16>, vector<128x512xf32> -> vector<128x512xf32>
      %c0_217 = arith.constant 0 : index
      %c0_218 = arith.constant 0 : index
      %c0_219 = arith.constant 0 : index
      %410 = vector.load %arg4[%c0_217, %c0_218, %c0_219] : memref<1x1x512xf32, #tpu.memory_space<vmem>>, vector<1x1x512xf32>
      %411 = vector.shape_cast %410 : vector<1x1x512xf32> to vector<1x512xf32>
      %412 = vector.broadcast %411 : vector<1x512xf32> to vector<128x512xf32>
      %413 = arith.addf %409, %412 : vector<128x512xf32>
      %414 = vector.shape_cast %413 : vector<128x512xf32> to vector<8x16x512xf32>
      %415 = arith.truncf %414 : vector<8x16x512xf32> to vector<8x16x512xbf16>
      %c0_220 = arith.constant 0 : index
      %c0_221 = arith.constant 0 : index
      %c0_222 = arith.constant 0 : index
      %416 = vector.load %arg8[%c0_220, %c0_221, %c0_222] : memref<8x16x512xbf16, #tpu.memory_space<vmem>>, vector<8x16x512xbf16>
      tpu.vector_store %arg8[%c0_220, %c0_221, %c0_222], %415 {strides = array<i32>} : memref<8x16x512xbf16, #tpu.memory_space<vmem>>, vector<8x16x512xbf16>,
    } else {
    }
    %c0_i32_1 = arith.constant 0 : i32
    %3 = arith.cmpi sgt, %arg0, %c0_i32_1 : i32
    %4 = arith.extui %3 : i1 to i32
    %c0_i32_2 = arith.constant 0 : i32
    %5 = arith.cmpi ne, %4, %c0_i32_2 : i32
    scf.if %5 {
      %c0_210 = arith.constant 0 : index
      %c0_211 = arith.constant 0 : index
      %c0_212 = arith.constant 0 : index
      %405 = vector.load %arg11[%c0_210, %c0_211, %c0_212] : memref<8x16x128xbf16, #tpu.memory_space<vmem>>, vector<8x16x128xbf16>
      %406 = vector.shape_cast %405 : vector<8x16x128xbf16> to vector<128x128xbf16>
      %c0_213 = arith.constant 0 : index
      %c0_214 = arith.constant 0 : index
      %c0_215 = arith.constant 0 : index
      %407 = vector.load %arg2[%c0_213, %c0_214, %c0_215] : memref<1x128x512xbf16, #tpu.memory_space<vmem>>, vector<1x128x512xbf16>
      %408 = vector.shape_cast %407 : vector<1x128x512xbf16> to vector<128x512xbf16>
      %cst_216 = arith.constant dense<0.000000e+00> : vector<128x512xf32>
      %409 = tpu.matmul %406, %408, %cst_216 {dimension_numbers = #tpu.dot_dimension_numbers<[1], [0], [0], [1], [0, 0, 1, 1], [], []>} : vector<128x128xbf16>, vector<128x512xbf16>, vector<128x512xf32> -> vector<128x512xf32>
      %c0_217 = arith.constant 0 : index
      %c0_218 = arith.constant 0 : index
      %c0_219 = arith.constant 0 : index
      %410 = vector.load %arg4[%c0_217, %c0_218, %c0_219] : memref<1x1x512xf32, #tpu.memory_space<vmem>>, vector<1x1x512xf32>
      %411 = vector.shape_cast %410 : vector<1x1x512xf32> to vector<1x512xf32>
      %412 = vector.broadcast %411 : vector<1x512xf32> to vector<128x512xf32>
      %413 = arith.addf %409, %412 : vector<128x512xf32>
      %414 = vector.shape_cast %413 : vector<128x512xf32> to vector<8x16x512xf32>
      %415 = arith.truncf %414 : vector<8x16x512xf32> to vector<8x16x512xbf16>
      %c0_220 = arith.constant 0 : index
      %c0_221 = arith.constant 0 : index
      %c0_222 = arith.constant 0 : index
      %416 = vector.load %arg8[%c0_220, %c0_221, %c0_222] : memref<8x16x512xbf16, #tpu.memory_space<vmem>>, vector<8x16x512xbf16>
      tpu.vector_store %arg8[%c0_220, %c0_221, %c0_222], %415 {strides = array<i32>} : memref<8x16x512xbf16, #tpu.memory_space<vmem>>, vector<8x16x512xbf16>,
    } else {
    }
    %cst = arith.constant 0.000000e+00 : f32
    %6 = vector.broadcast %cst : f32 to vector<16x128xf32>
    %c0 = arith.constant 0 : index
    %c0_3 = arith.constant 0 : index
    %7 = vector.load %arg9[%c0, %c0_3] : memref<16x128xf32, #tpu.memory_space<vmem>>, vector<16x128xf32>
    tpu.vector_store %arg9[%c0, %c0_3], %6 {strides = array<i32>} : memref<16x128xf32, #tpu.memory_space<vmem>>, vector<16x128xf32>,
    %cst_4 = arith.constant 0.000000e+00 : f32
    %8 = vector.broadcast %cst_4 : f32 to vector<16x128xf32>
    %c0_5 = arith.constant 0 : index
    %c0_6 = arith.constant 0 : index
    %9 = vector.load %arg10[%c0_5, %c0_6] : memref<16x128xf32, #tpu.memory_space<vmem>>, vector<16x128xf32>
    tpu.vector_store %arg10[%c0_5, %c0_6], %8 {strides = array<i32>} : memref<16x128xf32, #tpu.memory_space<vmem>>, vector<16x128xf32>,
    %c0_i32_7 = arith.constant 0 : i32
    %10 = arith.index_cast %c0_i32_7 : i32 to index
    %c0_8 = arith.constant 0 : index
    %c0_9 = arith.constant 0 : index
    %11 = vector.load %arg8[%10, %c0_8, %c0_9] : memref<8x16x512xbf16, #tpu.memory_space<vmem>>, vector<1x16x512xbf16>
    %12 = vector.shape_cast %11 : vector<1x16x512xbf16> to vector<16x512xbf16>
    %13 = arith.extf %12 : vector<16x512xbf16> to vector<16x512xf32>
    %c0_10 = arith.constant 0 : index
    %c0_11 = arith.constant 0 : index
    %14 = vector.load %arg9[%c0_10, %c0_11] : memref<16x128xf32, #tpu.memory_space<vmem>>, vector<16x128xf32>
    %15 = arith.truncf %14 : vector<16x128xf32> to vector<16x128xbf16>
    %c0_12 = arith.constant 0 : index
    %c0_13 = arith.constant 0 : index
    %c0_14 = arith.constant 0 : index
    %16 = vector.load %arg3[%c0_12, %c0_13, %c0_14] : memref<1x128x512xbf16, #tpu.memory_space<vmem>>, vector<1x128x512xbf16>
    %17 = vector.shape_cast %16 : vector<1x128x512xbf16> to vector<128x512xbf16>
    %cst_15 = arith.constant dense<0.000000e+00> : vector<16x512xf32>
    %18 = tpu.matmul %15, %17, %cst_15 {dimension_numbers = #tpu.dot_dimension_numbers<[1], [0], [0], [1], [0, 0, 1, 1], [], []>} : vector<16x128xbf16>, vector<128x512xbf16>, vector<16x512xf32> -> vector<16x512xf32>
    %19 = arith.addf %13, %18 : vector<16x512xf32>
    %20 = vector.extract_strided_slice %19 {offsets = [0, 0], sizes = [16, 128], strides = [1, 1]} : vector<16x512xf32> to vector<16x128xf32>
    %cst_16 = arith.constant 5.000000e-01 : f32
    %21 = vector.broadcast %cst_16 : f32 to vector<16x128xf32>
    %22 = arith.mulf %21, %20 : vector<16x128xf32>
    %23 = math.tanh %22 : vector<16x128xf32>
    %cst_17 = arith.constant 5.000000e-01 : f32
    %24 = vector.broadcast %cst_17 : f32 to vector<16x128xf32>
    %25 = arith.mulf %24, %23 : vector<16x128xf32>
    %cst_18 = arith.constant 5.000000e-01 : f32
    %26 = vector.broadcast %cst_18 : f32 to vector<16x128xf32>
    %27 = arith.addf %25, %26 : vector<16x128xf32>
    %28 = vector.extract_strided_slice %19 {offsets = [0, 128], sizes = [16, 128], strides = [1, 1]} : vector<16x512xf32> to vector<16x128xf32>
    %cst_19 = arith.constant 5.000000e-01 : f32
    %29 = vector.broadcast %cst_19 : f32 to vector<16x128xf32>
    %30 = arith.mulf %29, %28 : vector<16x128xf32>
    %31 = math.tanh %30 : vector<16x128xf32>
    %cst_20 = arith.constant 5.000000e-01 : f32
    %32 = vector.broadcast %cst_20 : f32 to vector<16x128xf32>
    %33 = arith.mulf %32, %31 : vector<16x128xf32>
    %cst_21 = arith.constant 5.000000e-01 : f32
    %34 = vector.broadcast %cst_21 : f32 to vector<16x128xf32>
    %35 = arith.addf %33, %34 : vector<16x128xf32>
    %36 = vector.extract_strided_slice %19 {offsets = [0, 256], sizes = [16, 128], strides = [1, 1]} : vector<16x512xf32> to vector<16x128xf32>
    %37 = math.tanh %36 : vector<16x128xf32>
    %38 = vector.extract_strided_slice %19 {offsets = [0, 384], sizes = [16, 128], strides = [1, 1]} : vector<16x512xf32> to vector<16x128xf32>
    %cst_22 = arith.constant 5.000000e-01 : f32
    %39 = vector.broadcast %cst_22 : f32 to vector<16x128xf32>
    %40 = arith.mulf %39, %38 : vector<16x128xf32>
    %41 = math.tanh %40 : vector<16x128xf32>
    %cst_23 = arith.constant 5.000000e-01 : f32
    %42 = vector.broadcast %cst_23 : f32 to vector<16x128xf32>
    %43 = arith.mulf %42, %41 : vector<16x128xf32>
    %cst_24 = arith.constant 5.000000e-01 : f32
    %44 = vector.broadcast %cst_24 : f32 to vector<16x128xf32>
    %45 = arith.addf %43, %44 : vector<16x128xf32>
    %c0_25 = arith.constant 0 : index
    %c0_26 = arith.constant 0 : index
    %46 = vector.load %arg10[%c0_25, %c0_26] : memref<16x128xf32, #tpu.memory_space<vmem>>, vector<16x128xf32>
    %47 = arith.mulf %35, %46 : vector<16x128xf32>
    %48 = arith.mulf %27, %37 : vector<16x128xf32>
    %49 = arith.addf %47, %48 : vector<16x128xf32>
    %50 = math.tanh %49 : vector<16x128xf32>
    %51 = arith.mulf %45, %50 : vector<16x128xf32>
    %c0_27 = arith.constant 0 : index
    %c0_28 = arith.constant 0 : index
    %52 = vector.load %arg10[%c0_27, %c0_28] : memref<16x128xf32, #tpu.memory_space<vmem>>, vector<16x128xf32>
    tpu.vector_store %arg10[%c0_27, %c0_28], %49 {strides = array<i32>} : memref<16x128xf32, #tpu.memory_space<vmem>>, vector<16x128xf32>,
    %c0_29 = arith.constant 0 : index
    %c0_30 = arith.constant 0 : index
    %53 = vector.load %arg9[%c0_29, %c0_30] : memref<16x128xf32, #tpu.memory_space<vmem>>, vector<16x128xf32>
    tpu.vector_store %arg9[%c0_29, %c0_30], %51 {strides = array<i32>} : memref<16x128xf32, #tpu.memory_space<vmem>>, vector<16x128xf32>,
    %54 = arith.truncf %51 : vector<16x128xf32> to vector<16x128xbf16>
    %55 = arith.index_cast %c0_i32_7 : i32 to index
    %c0_31 = arith.constant 0 : index
    %c0_32 = arith.constant 0 : index
    %56 = vector.load %arg11[%55, %c0_31, %c0_32] : memref<8x16x128xbf16, #tpu.memory_space<vmem>>, vector<1x16x128xbf16>
    %57 = vector.shape_cast %56 : vector<1x16x128xbf16> to vector<16x128xbf16>
    %58 = vector.shape_cast %54 : vector<16x128xbf16> to vector<1x16x128xbf16>
    tpu.vector_store %arg11[%55, %c0_31, %c0_32], %58 {strides = array<i32>} : memref<8x16x128xbf16, #tpu.memory_space<vmem>>, vector<1x16x128xbf16>,
    %c1_i32 = arith.constant 1 : i32
    %59 = arith.index_cast %c1_i32 : i32 to index
    %c0_33 = arith.constant 0 : index
    %c0_34 = arith.constant 0 : index
    %60 = vector.load %arg8[%59, %c0_33, %c0_34] : memref<8x16x512xbf16, #tpu.memory_space<vmem>>, vector<1x16x512xbf16>
    %61 = vector.shape_cast %60 : vector<1x16x512xbf16> to vector<16x512xbf16>
    %62 = arith.extf %61 : vector<16x512xbf16> to vector<16x512xf32>
    %c0_35 = arith.constant 0 : index
    %c0_36 = arith.constant 0 : index
    %63 = vector.load %arg9[%c0_35, %c0_36] : memref<16x128xf32, #tpu.memory_space<vmem>>, vector<16x128xf32>
    %64 = arith.truncf %63 : vector<16x128xf32> to vector<16x128xbf16>
    %c0_37 = arith.constant 0 : index
    %c0_38 = arith.constant 0 : index
    %c0_39 = arith.constant 0 : index
    %65 = vector.load %arg3[%c0_37, %c0_38, %c0_39] : memref<1x128x512xbf16, #tpu.memory_space<vmem>>, vector<1x128x512xbf16>
    %66 = vector.shape_cast %65 : vector<1x128x512xbf16> to vector<128x512xbf16>
    %cst_40 = arith.constant dense<0.000000e+00> : vector<16x512xf32>
    %67 = tpu.matmul %64, %66, %cst_40 {dimension_numbers = #tpu.dot_dimension_numbers<[1], [0], [0], [1], [0, 0, 1, 1], [], []>} : vector<16x128xbf16>, vector<128x512xbf16>, vector<16x512xf32> -> vector<16x512xf32>
    %68 = arith.addf %62, %67 : vector<16x512xf32>
    %69 = vector.extract_strided_slice %68 {offsets = [0, 0], sizes = [16, 128], strides = [1, 1]} : vector<16x512xf32> to vector<16x128xf32>
    %cst_41 = arith.constant 5.000000e-01 : f32
    %70 = vector.broadcast %cst_41 : f32 to vector<16x128xf32>
    %71 = arith.mulf %70, %69 : vector<16x128xf32>
    %72 = math.tanh %71 : vector<16x128xf32>
    %cst_42 = arith.constant 5.000000e-01 : f32
    %73 = vector.broadcast %cst_42 : f32 to vector<16x128xf32>
    %74 = arith.mulf %73, %72 : vector<16x128xf32>
    %cst_43 = arith.constant 5.000000e-01 : f32
    %75 = vector.broadcast %cst_43 : f32 to vector<16x128xf32>
    %76 = arith.addf %74, %75 : vector<16x128xf32>
    %77 = vector.extract_strided_slice %68 {offsets = [0, 128], sizes = [16, 128], strides = [1, 1]} : vector<16x512xf32> to vector<16x128xf32>
    %cst_44 = arith.constant 5.000000e-01 : f32
    %78 = vector.broadcast %cst_44 : f32 to vector<16x128xf32>
    %79 = arith.mulf %78, %77 : vector<16x128xf32>
    %80 = math.tanh %79 : vector<16x128xf32>
    %cst_45 = arith.constant 5.000000e-01 : f32
    %81 = vector.broadcast %cst_45 : f32 to vector<16x128xf32>
    %82 = arith.mulf %81, %80 : vector<16x128xf32>
    %cst_46 = arith.constant 5.000000e-01 : f32
    %83 = vector.broadcast %cst_46 : f32 to vector<16x128xf32>
    %84 = arith.addf %82, %83 : vector<16x128xf32>
    %85 = vector.extract_strided_slice %68 {offsets = [0, 256], sizes = [16, 128], strides = [1, 1]} : vector<16x512xf32> to vector<16x128xf32>
    %86 = math.tanh %85 : vector<16x128xf32>
    %87 = vector.extract_strided_slice %68 {offsets = [0, 384], sizes = [16, 128], strides = [1, 1]} : vector<16x512xf32> to vector<16x128xf32>
    %cst_47 = arith.constant 5.000000e-01 : f32
    %88 = vector.broadcast %cst_47 : f32 to vector<16x128xf32>
    %89 = arith.mulf %88, %87 : vector<16x128xf32>
    %90 = math.tanh %89 : vector<16x128xf32>
    %cst_48 = arith.constant 5.000000e-01 : f32
    %91 = vector.broadcast %cst_48 : f32 to vector<16x128xf32>
    %92 = arith.mulf %91, %90 : vector<16x128xf32>
    %cst_49 = arith.constant 5.000000e-01 : f32
    %93 = vector.broadcast %cst_49 : f32 to vector<16x128xf32>
    %94 = arith.addf %92, %93 : vector<16x128xf32>
    %c0_50 = arith.constant 0 : index
    %c0_51 = arith.constant 0 : index
    %95 = vector.load %arg10[%c0_50, %c0_51] : memref<16x128xf32, #tpu.memory_space<vmem>>, vector<16x128xf32>
    %96 = arith.mulf %84, %95 : vector<16x128xf32>
    %97 = arith.mulf %76, %86 : vector<16x128xf32>
    %98 = arith.addf %96, %97 : vector<16x128xf32>
    %99 = math.tanh %98 : vector<16x128xf32>
    %100 = arith.mulf %94, %99 : vector<16x128xf32>
    %c0_52 = arith.constant 0 : index
    %c0_53 = arith.constant 0 : index
    %101 = vector.load %arg10[%c0_52, %c0_53] : memref<16x128xf32, #tpu.memory_space<vmem>>, vector<16x128xf32>
    tpu.vector_store %arg10[%c0_52, %c0_53], %98 {strides = array<i32>} : memref<16x128xf32, #tpu.memory_space<vmem>>, vector<16x128xf32>,
    %c0_54 = arith.constant 0 : index
    %c0_55 = arith.constant 0 : index
    %102 = vector.load %arg9[%c0_54, %c0_55] : memref<16x128xf32, #tpu.memory_space<vmem>>, vector<16x128xf32>
    tpu.vector_store %arg9[%c0_54, %c0_55], %100 {strides = array<i32>} : memref<16x128xf32, #tpu.memory_space<vmem>>, vector<16x128xf32>,
    %103 = arith.truncf %100 : vector<16x128xf32> to vector<16x128xbf16>
    %104 = arith.index_cast %c1_i32 : i32 to index
    %c0_56 = arith.constant 0 : index
    %c0_57 = arith.constant 0 : index
    %105 = vector.load %arg11[%104, %c0_56, %c0_57] : memref<8x16x128xbf16, #tpu.memory_space<vmem>>, vector<1x16x128xbf16>
    %106 = vector.shape_cast %105 : vector<1x16x128xbf16> to vector<16x128xbf16>
    %107 = vector.shape_cast %103 : vector<16x128xbf16> to vector<1x16x128xbf16>
    tpu.vector_store %arg11[%104, %c0_56, %c0_57], %107 {strides = array<i32>} : memref<8x16x128xbf16, #tpu.memory_space<vmem>>, vector<1x16x128xbf16>,
    %c2_i32 = arith.constant 2 : i32
    %108 = arith.index_cast %c2_i32 : i32 to index
    %c0_58 = arith.constant 0 : index
    %c0_59 = arith.constant 0 : index
    %109 = vector.load %arg8[%108, %c0_58, %c0_59] : memref<8x16x512xbf16, #tpu.memory_space<vmem>>, vector<1x16x512xbf16>
    %110 = vector.shape_cast %109 : vector<1x16x512xbf16> to vector<16x512xbf16>
    %111 = arith.extf %110 : vector<16x512xbf16> to vector<16x512xf32>
    %c0_60 = arith.constant 0 : index
    %c0_61 = arith.constant 0 : index
    %112 = vector.load %arg9[%c0_60, %c0_61] : memref<16x128xf32, #tpu.memory_space<vmem>>, vector<16x128xf32>
    %113 = arith.truncf %112 : vector<16x128xf32> to vector<16x128xbf16>
    %c0_62 = arith.constant 0 : index
    %c0_63 = arith.constant 0 : index
    %c0_64 = arith.constant 0 : index
    %114 = vector.load %arg3[%c0_62, %c0_63, %c0_64] : memref<1x128x512xbf16, #tpu.memory_space<vmem>>, vector<1x128x512xbf16>
    %115 = vector.shape_cast %114 : vector<1x128x512xbf16> to vector<128x512xbf16>
    %cst_65 = arith.constant dense<0.000000e+00> : vector<16x512xf32>
    %116 = tpu.matmul %113, %115, %cst_65 {dimension_numbers = #tpu.dot_dimension_numbers<[1], [0], [0], [1], [0, 0, 1, 1], [], []>} : vector<16x128xbf16>, vector<128x512xbf16>, vector<16x512xf32> -> vector<16x512xf32>
    %117 = arith.addf %111, %116 : vector<16x512xf32>
    %118 = vector.extract_strided_slice %117 {offsets = [0, 0], sizes = [16, 128], strides = [1, 1]} : vector<16x512xf32> to vector<16x128xf32>
    %cst_66 = arith.constant 5.000000e-01 : f32
    %119 = vector.broadcast %cst_66 : f32 to vector<16x128xf32>
    %120 = arith.mulf %119, %118 : vector<16x128xf32>
    %121 = math.tanh %120 : vector<16x128xf32>
    %cst_67 = arith.constant 5.000000e-01 : f32
    %122 = vector.broadcast %cst_67 : f32 to vector<16x128xf32>
    %123 = arith.mulf %122, %121 : vector<16x128xf32>
    %cst_68 = arith.constant 5.000000e-01 : f32
    %124 = vector.broadcast %cst_68 : f32 to vector<16x128xf32>
    %125 = arith.addf %123, %124 : vector<16x128xf32>
    %126 = vector.extract_strided_slice %117 {offsets = [0, 128], sizes = [16, 128], strides = [1, 1]} : vector<16x512xf32> to vector<16x128xf32>
    %cst_69 = arith.constant 5.000000e-01 : f32
    %127 = vector.broadcast %cst_69 : f32 to vector<16x128xf32>
    %128 = arith.mulf %127, %126 : vector<16x128xf32>
    %129 = math.tanh %128 : vector<16x128xf32>
    %cst_70 = arith.constant 5.000000e-01 : f32
    %130 = vector.broadcast %cst_70 : f32 to vector<16x128xf32>
    %131 = arith.mulf %130, %129 : vector<16x128xf32>
    %cst_71 = arith.constant 5.000000e-01 : f32
    %132 = vector.broadcast %cst_71 : f32 to vector<16x128xf32>
    %133 = arith.addf %131, %132 : vector<16x128xf32>
    %134 = vector.extract_strided_slice %117 {offsets = [0, 256], sizes = [16, 128], strides = [1, 1]} : vector<16x512xf32> to vector<16x128xf32>
    %135 = math.tanh %134 : vector<16x128xf32>
    %136 = vector.extract_strided_slice %117 {offsets = [0, 384], sizes = [16, 128], strides = [1, 1]} : vector<16x512xf32> to vector<16x128xf32>
    %cst_72 = arith.constant 5.000000e-01 : f32
    %137 = vector.broadcast %cst_72 : f32 to vector<16x128xf32>
    %138 = arith.mulf %137, %136 : vector<16x128xf32>
    %139 = math.tanh %138 : vector<16x128xf32>
    %cst_73 = arith.constant 5.000000e-01 : f32
    %140 = vector.broadcast %cst_73 : f32 to vector<16x128xf32>
    %141 = arith.mulf %140, %139 : vector<16x128xf32>
    %cst_74 = arith.constant 5.000000e-01 : f32
    %142 = vector.broadcast %cst_74 : f32 to vector<16x128xf32>
    %143 = arith.addf %141, %142 : vector<16x128xf32>
    %c0_75 = arith.constant 0 : index
    %c0_76 = arith.constant 0 : index
    %144 = vector.load %arg10[%c0_75, %c0_76] : memref<16x128xf32, #tpu.memory_space<vmem>>, vector<16x128xf32>
    %145 = arith.mulf %133, %144 : vector<16x128xf32>
    %146 = arith.mulf %125, %135 : vector<16x128xf32>
    %147 = arith.addf %145, %146 : vector<16x128xf32>
    %148 = math.tanh %147 : vector<16x128xf32>
    %149 = arith.mulf %143, %148 : vector<16x128xf32>
    %c0_77 = arith.constant 0 : index
    %c0_78 = arith.constant 0 : index
    %150 = vector.load %arg10[%c0_77, %c0_78] : memref<16x128xf32, #tpu.memory_space<vmem>>, vector<16x128xf32>
    tpu.vector_store %arg10[%c0_77, %c0_78], %147 {strides = array<i32>} : memref<16x128xf32, #tpu.memory_space<vmem>>, vector<16x128xf32>,
    %c0_79 = arith.constant 0 : index
    %c0_80 = arith.constant 0 : index
    %151 = vector.load %arg9[%c0_79, %c0_80] : memref<16x128xf32, #tpu.memory_space<vmem>>, vector<16x128xf32>
    tpu.vector_store %arg9[%c0_79, %c0_80], %149 {strides = array<i32>} : memref<16x128xf32, #tpu.memory_space<vmem>>, vector<16x128xf32>,
    %152 = arith.truncf %149 : vector<16x128xf32> to vector<16x128xbf16>
    %153 = arith.index_cast %c2_i32 : i32 to index
    %c0_81 = arith.constant 0 : index
    %c0_82 = arith.constant 0 : index
    %154 = vector.load %arg11[%153, %c0_81, %c0_82] : memref<8x16x128xbf16, #tpu.memory_space<vmem>>, vector<1x16x128xbf16>
    %155 = vector.shape_cast %154 : vector<1x16x128xbf16> to vector<16x128xbf16>
    %156 = vector.shape_cast %152 : vector<16x128xbf16> to vector<1x16x128xbf16>
    tpu.vector_store %arg11[%153, %c0_81, %c0_82], %156 {strides = array<i32>} : memref<8x16x128xbf16, #tpu.memory_space<vmem>>, vector<1x16x128xbf16>,
    %c3_i32 = arith.constant 3 : i32
    %157 = arith.index_cast %c3_i32 : i32 to index
    %c0_83 = arith.constant 0 : index
    %c0_84 = arith.constant 0 : index
    %158 = vector.load %arg8[%157, %c0_83, %c0_84] : memref<8x16x512xbf16, #tpu.memory_space<vmem>>, vector<1x16x512xbf16>
    %159 = vector.shape_cast %158 : vector<1x16x512xbf16> to vector<16x512xbf16>
    %160 = arith.extf %159 : vector<16x512xbf16> to vector<16x512xf32>
    %c0_85 = arith.constant 0 : index
    %c0_86 = arith.constant 0 : index
    %161 = vector.load %arg9[%c0_85, %c0_86] : memref<16x128xf32, #tpu.memory_space<vmem>>, vector<16x128xf32>
    %162 = arith.truncf %161 : vector<16x128xf32> to vector<16x128xbf16>
    %c0_87 = arith.constant 0 : index
    %c0_88 = arith.constant 0 : index
    %c0_89 = arith.constant 0 : index
    %163 = vector.load %arg3[%c0_87, %c0_88, %c0_89] : memref<1x128x512xbf16, #tpu.memory_space<vmem>>, vector<1x128x512xbf16>
    %164 = vector.shape_cast %163 : vector<1x128x512xbf16> to vector<128x512xbf16>
    %cst_90 = arith.constant dense<0.000000e+00> : vector<16x512xf32>
    %165 = tpu.matmul %162, %164, %cst_90 {dimension_numbers = #tpu.dot_dimension_numbers<[1], [0], [0], [1], [0, 0, 1, 1], [], []>} : vector<16x128xbf16>, vector<128x512xbf16>, vector<16x512xf32> -> vector<16x512xf32>
    %166 = arith.addf %160, %165 : vector<16x512xf32>
    %167 = vector.extract_strided_slice %166 {offsets = [0, 0], sizes = [16, 128], strides = [1, 1]} : vector<16x512xf32> to vector<16x128xf32>
    %cst_91 = arith.constant 5.000000e-01 : f32
    %168 = vector.broadcast %cst_91 : f32 to vector<16x128xf32>
    %169 = arith.mulf %168, %167 : vector<16x128xf32>
    %170 = math.tanh %169 : vector<16x128xf32>
    %cst_92 = arith.constant 5.000000e-01 : f32
    %171 = vector.broadcast %cst_92 : f32 to vector<16x128xf32>
    %172 = arith.mulf %171, %170 : vector<16x128xf32>
    %cst_93 = arith.constant 5.000000e-01 : f32
    %173 = vector.broadcast %cst_93 : f32 to vector<16x128xf32>
    %174 = arith.addf %172, %173 : vector<16x128xf32>
    %175 = vector.extract_strided_slice %166 {offsets = [0, 128], sizes = [16, 128], strides = [1, 1]} : vector<16x512xf32> to vector<16x128xf32>
    %cst_94 = arith.constant 5.000000e-01 : f32
    %176 = vector.broadcast %cst_94 : f32 to vector<16x128xf32>
    %177 = arith.mulf %176, %175 : vector<16x128xf32>
    %178 = math.tanh %177 : vector<16x128xf32>
    %cst_95 = arith.constant 5.000000e-01 : f32
    %179 = vector.broadcast %cst_95 : f32 to vector<16x128xf32>
    %180 = arith.mulf %179, %178 : vector<16x128xf32>
    %cst_96 = arith.constant 5.000000e-01 : f32
    %181 = vector.broadcast %cst_96 : f32 to vector<16x128xf32>
    %182 = arith.addf %180, %181 : vector<16x128xf32>
    %183 = vector.extract_strided_slice %166 {offsets = [0, 256], sizes = [16, 128], strides = [1, 1]} : vector<16x512xf32> to vector<16x128xf32>
    %184 = math.tanh %183 : vector<16x128xf32>
    %185 = vector.extract_strided_slice %166 {offsets = [0, 384], sizes = [16, 128], strides = [1, 1]} : vector<16x512xf32> to vector<16x128xf32>
    %cst_97 = arith.constant 5.000000e-01 : f32
    %186 = vector.broadcast %cst_97 : f32 to vector<16x128xf32>
    %187 = arith.mulf %186, %185 : vector<16x128xf32>
    %188 = math.tanh %187 : vector<16x128xf32>
    %cst_98 = arith.constant 5.000000e-01 : f32
    %189 = vector.broadcast %cst_98 : f32 to vector<16x128xf32>
    %190 = arith.mulf %189, %188 : vector<16x128xf32>
    %cst_99 = arith.constant 5.000000e-01 : f32
    %191 = vector.broadcast %cst_99 : f32 to vector<16x128xf32>
    %192 = arith.addf %190, %191 : vector<16x128xf32>
    %c0_100 = arith.constant 0 : index
    %c0_101 = arith.constant 0 : index
    %193 = vector.load %arg10[%c0_100, %c0_101] : memref<16x128xf32, #tpu.memory_space<vmem>>, vector<16x128xf32>
    %194 = arith.mulf %182, %193 : vector<16x128xf32>
    %195 = arith.mulf %174, %184 : vector<16x128xf32>
    %196 = arith.addf %194, %195 : vector<16x128xf32>
    %197 = math.tanh %196 : vector<16x128xf32>
    %198 = arith.mulf %192, %197 : vector<16x128xf32>
    %c0_102 = arith.constant 0 : index
    %c0_103 = arith.constant 0 : index
    %199 = vector.load %arg10[%c0_102, %c0_103] : memref<16x128xf32, #tpu.memory_space<vmem>>, vector<16x128xf32>
    tpu.vector_store %arg10[%c0_102, %c0_103], %196 {strides = array<i32>} : memref<16x128xf32, #tpu.memory_space<vmem>>, vector<16x128xf32>,
    %c0_104 = arith.constant 0 : index
    %c0_105 = arith.constant 0 : index
    %200 = vector.load %arg9[%c0_104, %c0_105] : memref<16x128xf32, #tpu.memory_space<vmem>>, vector<16x128xf32>
    tpu.vector_store %arg9[%c0_104, %c0_105], %198 {strides = array<i32>} : memref<16x128xf32, #tpu.memory_space<vmem>>, vector<16x128xf32>,
    %201 = arith.truncf %198 : vector<16x128xf32> to vector<16x128xbf16>
    %202 = arith.index_cast %c3_i32 : i32 to index
    %c0_106 = arith.constant 0 : index
    %c0_107 = arith.constant 0 : index
    %203 = vector.load %arg11[%202, %c0_106, %c0_107] : memref<8x16x128xbf16, #tpu.memory_space<vmem>>, vector<1x16x128xbf16>
    %204 = vector.shape_cast %203 : vector<1x16x128xbf16> to vector<16x128xbf16>
    %205 = vector.shape_cast %201 : vector<16x128xbf16> to vector<1x16x128xbf16>
    tpu.vector_store %arg11[%202, %c0_106, %c0_107], %205 {strides = array<i32>} : memref<8x16x128xbf16, #tpu.memory_space<vmem>>, vector<1x16x128xbf16>,
    %c4_i32 = arith.constant 4 : i32
    %206 = arith.index_cast %c4_i32 : i32 to index
    %c0_108 = arith.constant 0 : index
    %c0_109 = arith.constant 0 : index
    %207 = vector.load %arg8[%206, %c0_108, %c0_109] : memref<8x16x512xbf16, #tpu.memory_space<vmem>>, vector<1x16x512xbf16>
    %208 = vector.shape_cast %207 : vector<1x16x512xbf16> to vector<16x512xbf16>
    %209 = arith.extf %208 : vector<16x512xbf16> to vector<16x512xf32>
    %c0_110 = arith.constant 0 : index
    %c0_111 = arith.constant 0 : index
    %210 = vector.load %arg9[%c0_110, %c0_111] : memref<16x128xf32, #tpu.memory_space<vmem>>, vector<16x128xf32>
    %211 = arith.truncf %210 : vector<16x128xf32> to vector<16x128xbf16>
    %c0_112 = arith.constant 0 : index
    %c0_113 = arith.constant 0 : index
    %c0_114 = arith.constant 0 : index
    %212 = vector.load %arg3[%c0_112, %c0_113, %c0_114] : memref<1x128x512xbf16, #tpu.memory_space<vmem>>, vector<1x128x512xbf16>
    %213 = vector.shape_cast %212 : vector<1x128x512xbf16> to vector<128x512xbf16>
    %cst_115 = arith.constant dense<0.000000e+00> : vector<16x512xf32>
    %214 = tpu.matmul %211, %213, %cst_115 {dimension_numbers = #tpu.dot_dimension_numbers<[1], [0], [0], [1], [0, 0, 1, 1], [], []>} : vector<16x128xbf16>, vector<128x512xbf16>, vector<16x512xf32> -> vector<16x512xf32>
    %215 = arith.addf %209, %214 : vector<16x512xf32>
    %216 = vector.extract_strided_slice %215 {offsets = [0, 0], sizes = [16, 128], strides = [1, 1]} : vector<16x512xf32> to vector<16x128xf32>
    %cst_116 = arith.constant 5.000000e-01 : f32
    %217 = vector.broadcast %cst_116 : f32 to vector<16x128xf32>
    %218 = arith.mulf %217, %216 : vector<16x128xf32>
    %219 = math.tanh %218 : vector<16x128xf32>
    %cst_117 = arith.constant 5.000000e-01 : f32
    %220 = vector.broadcast %cst_117 : f32 to vector<16x128xf32>
    %221 = arith.mulf %220, %219 : vector<16x128xf32>
    %cst_118 = arith.constant 5.000000e-01 : f32
    %222 = vector.broadcast %cst_118 : f32 to vector<16x128xf32>
    %223 = arith.addf %221, %222 : vector<16x128xf32>
    %224 = vector.extract_strided_slice %215 {offsets = [0, 128], sizes = [16, 128], strides = [1, 1]} : vector<16x512xf32> to vector<16x128xf32>
    %cst_119 = arith.constant 5.000000e-01 : f32
    %225 = vector.broadcast %cst_119 : f32 to vector<16x128xf32>
    %226 = arith.mulf %225, %224 : vector<16x128xf32>
    %227 = math.tanh %226 : vector<16x128xf32>
    %cst_120 = arith.constant 5.000000e-01 : f32
    %228 = vector.broadcast %cst_120 : f32 to vector<16x128xf32>
    %229 = arith.mulf %228, %227 : vector<16x128xf32>
    %cst_121 = arith.constant 5.000000e-01 : f32
    %230 = vector.broadcast %cst_121 : f32 to vector<16x128xf32>
    %231 = arith.addf %229, %230 : vector<16x128xf32>
    %232 = vector.extract_strided_slice %215 {offsets = [0, 256], sizes = [16, 128], strides = [1, 1]} : vector<16x512xf32> to vector<16x128xf32>
    %233 = math.tanh %232 : vector<16x128xf32>
    %234 = vector.extract_strided_slice %215 {offsets = [0, 384], sizes = [16, 128], strides = [1, 1]} : vector<16x512xf32> to vector<16x128xf32>
    %cst_122 = arith.constant 5.000000e-01 : f32
    %235 = vector.broadcast %cst_122 : f32 to vector<16x128xf32>
    %236 = arith.mulf %235, %234 : vector<16x128xf32>
    %237 = math.tanh %236 : vector<16x128xf32>
    %cst_123 = arith.constant 5.000000e-01 : f32
    %238 = vector.broadcast %cst_123 : f32 to vector<16x128xf32>
    %239 = arith.mulf %238, %237 : vector<16x128xf32>
    %cst_124 = arith.constant 5.000000e-01 : f32
    %240 = vector.broadcast %cst_124 : f32 to vector<16x128xf32>
    %241 = arith.addf %239, %240 : vector<16x128xf32>
    %c0_125 = arith.constant 0 : index
    %c0_126 = arith.constant 0 : index
    %242 = vector.load %arg10[%c0_125, %c0_126] : memref<16x128xf32, #tpu.memory_space<vmem>>, vector<16x128xf32>
    %243 = arith.mulf %231, %242 : vector<16x128xf32>
    %244 = arith.mulf %223, %233 : vector<16x128xf32>
    %245 = arith.addf %243, %244 : vector<16x128xf32>
    %246 = math.tanh %245 : vector<16x128xf32>
    %247 = arith.mulf %241, %246 : vector<16x128xf32>
    %c0_127 = arith.constant 0 : index
    %c0_128 = arith.constant 0 : index
    %248 = vector.load %arg10[%c0_127, %c0_128] : memref<16x128xf32, #tpu.memory_space<vmem>>, vector<16x128xf32>
    tpu.vector_store %arg10[%c0_127, %c0_128], %245 {strides = array<i32>} : memref<16x128xf32, #tpu.memory_space<vmem>>, vector<16x128xf32>,
    %c0_129 = arith.constant 0 : index
    %c0_130 = arith.constant 0 : index
    %249 = vector.load %arg9[%c0_129, %c0_130] : memref<16x128xf32, #tpu.memory_space<vmem>>, vector<16x128xf32>
    tpu.vector_store %arg9[%c0_129, %c0_130], %247 {strides = array<i32>} : memref<16x128xf32, #tpu.memory_space<vmem>>, vector<16x128xf32>,
    %250 = arith.truncf %247 : vector<16x128xf32> to vector<16x128xbf16>
    %251 = arith.index_cast %c4_i32 : i32 to index
    %c0_131 = arith.constant 0 : index
    %c0_132 = arith.constant 0 : index
    %252 = vector.load %arg11[%251, %c0_131, %c0_132] : memref<8x16x128xbf16, #tpu.memory_space<vmem>>, vector<1x16x128xbf16>
    %253 = vector.shape_cast %252 : vector<1x16x128xbf16> to vector<16x128xbf16>
    %254 = vector.shape_cast %250 : vector<16x128xbf16> to vector<1x16x128xbf16>
    tpu.vector_store %arg11[%251, %c0_131, %c0_132], %254 {strides = array<i32>} : memref<8x16x128xbf16, #tpu.memory_space<vmem>>, vector<1x16x128xbf16>,
    %c5_i32 = arith.constant 5 : i32
    %255 = arith.index_cast %c5_i32 : i32 to index
    %c0_133 = arith.constant 0 : index
    %c0_134 = arith.constant 0 : index
    %256 = vector.load %arg8[%255, %c0_133, %c0_134] : memref<8x16x512xbf16, #tpu.memory_space<vmem>>, vector<1x16x512xbf16>
    %257 = vector.shape_cast %256 : vector<1x16x512xbf16> to vector<16x512xbf16>
    %258 = arith.extf %257 : vector<16x512xbf16> to vector<16x512xf32>
    %c0_135 = arith.constant 0 : index
    %c0_136 = arith.constant 0 : index
    %259 = vector.load %arg9[%c0_135, %c0_136] : memref<16x128xf32, #tpu.memory_space<vmem>>, vector<16x128xf32>
    %260 = arith.truncf %259 : vector<16x128xf32> to vector<16x128xbf16>
    %c0_137 = arith.constant 0 : index
    %c0_138 = arith.constant 0 : index
    %c0_139 = arith.constant 0 : index
    %261 = vector.load %arg3[%c0_137, %c0_138, %c0_139] : memref<1x128x512xbf16, #tpu.memory_space<vmem>>, vector<1x128x512xbf16>
    %262 = vector.shape_cast %261 : vector<1x128x512xbf16> to vector<128x512xbf16>
    %cst_140 = arith.constant dense<0.000000e+00> : vector<16x512xf32>
    %263 = tpu.matmul %260, %262, %cst_140 {dimension_numbers = #tpu.dot_dimension_numbers<[1], [0], [0], [1], [0, 0, 1, 1], [], []>} : vector<16x128xbf16>, vector<128x512xbf16>, vector<16x512xf32> -> vector<16x512xf32>
    %264 = arith.addf %258, %263 : vector<16x512xf32>
    %265 = vector.extract_strided_slice %264 {offsets = [0, 0], sizes = [16, 128], strides = [1, 1]} : vector<16x512xf32> to vector<16x128xf32>
    %cst_141 = arith.constant 5.000000e-01 : f32
    %266 = vector.broadcast %cst_141 : f32 to vector<16x128xf32>
    %267 = arith.mulf %266, %265 : vector<16x128xf32>
    %268 = math.tanh %267 : vector<16x128xf32>
    %cst_142 = arith.constant 5.000000e-01 : f32
    %269 = vector.broadcast %cst_142 : f32 to vector<16x128xf32>
    %270 = arith.mulf %269, %268 : vector<16x128xf32>
    %cst_143 = arith.constant 5.000000e-01 : f32
    %271 = vector.broadcast %cst_143 : f32 to vector<16x128xf32>
    %272 = arith.addf %270, %271 : vector<16x128xf32>
    %273 = vector.extract_strided_slice %264 {offsets = [0, 128], sizes = [16, 128], strides = [1, 1]} : vector<16x512xf32> to vector<16x128xf32>
    %cst_144 = arith.constant 5.000000e-01 : f32
    %274 = vector.broadcast %cst_144 : f32 to vector<16x128xf32>
    %275 = arith.mulf %274, %273 : vector<16x128xf32>
    %276 = math.tanh %275 : vector<16x128xf32>
    %cst_145 = arith.constant 5.000000e-01 : f32
    %277 = vector.broadcast %cst_145 : f32 to vector<16x128xf32>
    %278 = arith.mulf %277, %276 : vector<16x128xf32>
    %cst_146 = arith.constant 5.000000e-01 : f32
    %279 = vector.broadcast %cst_146 : f32 to vector<16x128xf32>
    %280 = arith.addf %278, %279 : vector<16x128xf32>
    %281 = vector.extract_strided_slice %264 {offsets = [0, 256], sizes = [16, 128], strides = [1, 1]} : vector<16x512xf32> to vector<16x128xf32>
    %282 = math.tanh %281 : vector<16x128xf32>
    %283 = vector.extract_strided_slice %264 {offsets = [0, 384], sizes = [16, 128], strides = [1, 1]} : vector<16x512xf32> to vector<16x128xf32>
    %cst_147 = arith.constant 5.000000e-01 : f32
    %284 = vector.broadcast %cst_147 : f32 to vector<16x128xf32>
    %285 = arith.mulf %284, %283 : vector<16x128xf32>
    %286 = math.tanh %285 : vector<16x128xf32>
    %cst_148 = arith.constant 5.000000e-01 : f32
    %287 = vector.broadcast %cst_148 : f32 to vector<16x128xf32>
    %288 = arith.mulf %287, %286 : vector<16x128xf32>
    %cst_149 = arith.constant 5.000000e-01 : f32
    %289 = vector.broadcast %cst_149 : f32 to vector<16x128xf32>
    %290 = arith.addf %288, %289 : vector<16x128xf32>
    %c0_150 = arith.constant 0 : index
    %c0_151 = arith.constant 0 : index
    %291 = vector.load %arg10[%c0_150, %c0_151] : memref<16x128xf32, #tpu.memory_space<vmem>>, vector<16x128xf32>
    %292 = arith.mulf %280, %291 : vector<16x128xf32>
    %293 = arith.mulf %272, %282 : vector<16x128xf32>
    %294 = arith.addf %292, %293 : vector<16x128xf32>
    %295 = math.tanh %294 : vector<16x128xf32>
    %296 = arith.mulf %290, %295 : vector<16x128xf32>
    %c0_152 = arith.constant 0 : index
    %c0_153 = arith.constant 0 : index
    %297 = vector.load %arg10[%c0_152, %c0_153] : memref<16x128xf32, #tpu.memory_space<vmem>>, vector<16x128xf32>
    tpu.vector_store %arg10[%c0_152, %c0_153], %294 {strides = array<i32>} : memref<16x128xf32, #tpu.memory_space<vmem>>, vector<16x128xf32>,
    %c0_154 = arith.constant 0 : index
    %c0_155 = arith.constant 0 : index
    %298 = vector.load %arg9[%c0_154, %c0_155] : memref<16x128xf32, #tpu.memory_space<vmem>>, vector<16x128xf32>
    tpu.vector_store %arg9[%c0_154, %c0_155], %296 {strides = array<i32>} : memref<16x128xf32, #tpu.memory_space<vmem>>, vector<16x128xf32>,
    %299 = arith.truncf %296 : vector<16x128xf32> to vector<16x128xbf16>
    %300 = arith.index_cast %c5_i32 : i32 to index
    %c0_156 = arith.constant 0 : index
    %c0_157 = arith.constant 0 : index
    %301 = vector.load %arg11[%300, %c0_156, %c0_157] : memref<8x16x128xbf16, #tpu.memory_space<vmem>>, vector<1x16x128xbf16>
    %302 = vector.shape_cast %301 : vector<1x16x128xbf16> to vector<16x128xbf16>
    %303 = vector.shape_cast %299 : vector<16x128xbf16> to vector<1x16x128xbf16>
    tpu.vector_store %arg11[%300, %c0_156, %c0_157], %303 {strides = array<i32>} : memref<8x16x128xbf16, #tpu.memory_space<vmem>>, vector<1x16x128xbf16>,
    %c6_i32 = arith.constant 6 : i32
    %304 = arith.index_cast %c6_i32 : i32 to index
    %c0_158 = arith.constant 0 : index
    %c0_159 = arith.constant 0 : index
    %305 = vector.load %arg8[%304, %c0_158, %c0_159] : memref<8x16x512xbf16, #tpu.memory_space<vmem>>, vector<1x16x512xbf16>
    %306 = vector.shape_cast %305 : vector<1x16x512xbf16> to vector<16x512xbf16>
    %307 = arith.extf %306 : vector<16x512xbf16> to vector<16x512xf32>
    %c0_160 = arith.constant 0 : index
    %c0_161 = arith.constant 0 : index
    %308 = vector.load %arg9[%c0_160, %c0_161] : memref<16x128xf32, #tpu.memory_space<vmem>>, vector<16x128xf32>
    %309 = arith.truncf %308 : vector<16x128xf32> to vector<16x128xbf16>
    %c0_162 = arith.constant 0 : index
    %c0_163 = arith.constant 0 : index
    %c0_164 = arith.constant 0 : index
    %310 = vector.load %arg3[%c0_162, %c0_163, %c0_164] : memref<1x128x512xbf16, #tpu.memory_space<vmem>>, vector<1x128x512xbf16>
    %311 = vector.shape_cast %310 : vector<1x128x512xbf16> to vector<128x512xbf16>
    %cst_165 = arith.constant dense<0.000000e+00> : vector<16x512xf32>
    %312 = tpu.matmul %309, %311, %cst_165 {dimension_numbers = #tpu.dot_dimension_numbers<[1], [0], [0], [1], [0, 0, 1, 1], [], []>} : vector<16x128xbf16>, vector<128x512xbf16>, vector<16x512xf32> -> vector<16x512xf32>
    %313 = arith.addf %307, %312 : vector<16x512xf32>
    %314 = vector.extract_strided_slice %313 {offsets = [0, 0], sizes = [16, 128], strides = [1, 1]} : vector<16x512xf32> to vector<16x128xf32>
    %cst_166 = arith.constant 5.000000e-01 : f32
    %315 = vector.broadcast %cst_166 : f32 to vector<16x128xf32>
    %316 = arith.mulf %315, %314 : vector<16x128xf32>
    %317 = math.tanh %316 : vector<16x128xf32>
    %cst_167 = arith.constant 5.000000e-01 : f32
    %318 = vector.broadcast %cst_167 : f32 to vector<16x128xf32>
    %319 = arith.mulf %318, %317 : vector<16x128xf32>
    %cst_168 = arith.constant 5.000000e-01 : f32
    %320 = vector.broadcast %cst_168 : f32 to vector<16x128xf32>
    %321 = arith.addf %319, %320 : vector<16x128xf32>
    %322 = vector.extract_strided_slice %313 {offsets = [0, 128], sizes = [16, 128], strides = [1, 1]} : vector<16x512xf32> to vector<16x128xf32>
    %cst_169 = arith.constant 5.000000e-01 : f32
    %323 = vector.broadcast %cst_169 : f32 to vector<16x128xf32>
    %324 = arith.mulf %323, %322 : vector<16x128xf32>
    %325 = math.tanh %324 : vector<16x128xf32>
    %cst_170 = arith.constant 5.000000e-01 : f32
    %326 = vector.broadcast %cst_170 : f32 to vector<16x128xf32>
    %327 = arith.mulf %326, %325 : vector<16x128xf32>
    %cst_171 = arith.constant 5.000000e-01 : f32
    %328 = vector.broadcast %cst_171 : f32 to vector<16x128xf32>
    %329 = arith.addf %327, %328 : vector<16x128xf32>
    %330 = vector.extract_strided_slice %313 {offsets = [0, 256], sizes = [16, 128], strides = [1, 1]} : vector<16x512xf32> to vector<16x128xf32>
    %331 = math.tanh %330 : vector<16x128xf32>
    %332 = vector.extract_strided_slice %313 {offsets = [0, 384], sizes = [16, 128], strides = [1, 1]} : vector<16x512xf32> to vector<16x128xf32>
    %cst_172 = arith.constant 5.000000e-01 : f32
    %333 = vector.broadcast %cst_172 : f32 to vector<16x128xf32>
    %334 = arith.mulf %333, %332 : vector<16x128xf32>
    %335 = math.tanh %334 : vector<16x128xf32>
    %cst_173 = arith.constant 5.000000e-01 : f32
    %336 = vector.broadcast %cst_173 : f32 to vector<16x128xf32>
    %337 = arith.mulf %336, %335 : vector<16x128xf32>
    %cst_174 = arith.constant 5.000000e-01 : f32
    %338 = vector.broadcast %cst_174 : f32 to vector<16x128xf32>
    %339 = arith.addf %337, %338 : vector<16x128xf32>
    %c0_175 = arith.constant 0 : index
    %c0_176 = arith.constant 0 : index
    %340 = vector.load %arg10[%c0_175, %c0_176] : memref<16x128xf32, #tpu.memory_space<vmem>>, vector<16x128xf32>
    %341 = arith.mulf %329, %340 : vector<16x128xf32>
    %342 = arith.mulf %321, %331 : vector<16x128xf32>
    %343 = arith.addf %341, %342 : vector<16x128xf32>
    %344 = math.tanh %343 : vector<16x128xf32>
    %345 = arith.mulf %339, %344 : vector<16x128xf32>
    %c0_177 = arith.constant 0 : index
    %c0_178 = arith.constant 0 : index
    %346 = vector.load %arg10[%c0_177, %c0_178] : memref<16x128xf32, #tpu.memory_space<vmem>>, vector<16x128xf32>
    tpu.vector_store %arg10[%c0_177, %c0_178], %343 {strides = array<i32>} : memref<16x128xf32, #tpu.memory_space<vmem>>, vector<16x128xf32>,
    %c0_179 = arith.constant 0 : index
    %c0_180 = arith.constant 0 : index
    %347 = vector.load %arg9[%c0_179, %c0_180] : memref<16x128xf32, #tpu.memory_space<vmem>>, vector<16x128xf32>
    tpu.vector_store %arg9[%c0_179, %c0_180], %345 {strides = array<i32>} : memref<16x128xf32, #tpu.memory_space<vmem>>, vector<16x128xf32>,
    %348 = arith.truncf %345 : vector<16x128xf32> to vector<16x128xbf16>
    %349 = arith.index_cast %c6_i32 : i32 to index
    %c0_181 = arith.constant 0 : index
    %c0_182 = arith.constant 0 : index
    %350 = vector.load %arg11[%349, %c0_181, %c0_182] : memref<8x16x128xbf16, #tpu.memory_space<vmem>>, vector<1x16x128xbf16>
    %351 = vector.shape_cast %350 : vector<1x16x128xbf16> to vector<16x128xbf16>
    %352 = vector.shape_cast %348 : vector<16x128xbf16> to vector<1x16x128xbf16>
    tpu.vector_store %arg11[%349, %c0_181, %c0_182], %352 {strides = array<i32>} : memref<8x16x128xbf16, #tpu.memory_space<vmem>>, vector<1x16x128xbf16>,
    %c7_i32 = arith.constant 7 : i32
    %353 = arith.index_cast %c7_i32 : i32 to index
    %c0_183 = arith.constant 0 : index
    %c0_184 = arith.constant 0 : index
    %354 = vector.load %arg8[%353, %c0_183, %c0_184] : memref<8x16x512xbf16, #tpu.memory_space<vmem>>, vector<1x16x512xbf16>
    %355 = vector.shape_cast %354 : vector<1x16x512xbf16> to vector<16x512xbf16>
    %356 = arith.extf %355 : vector<16x512xbf16> to vector<16x512xf32>
    %c0_185 = arith.constant 0 : index
    %c0_186 = arith.constant 0 : index
    %357 = vector.load %arg9[%c0_185, %c0_186] : memref<16x128xf32, #tpu.memory_space<vmem>>, vector<16x128xf32>
    %358 = arith.truncf %357 : vector<16x128xf32> to vector<16x128xbf16>
    %c0_187 = arith.constant 0 : index
    %c0_188 = arith.constant 0 : index
    %c0_189 = arith.constant 0 : index
    %359 = vector.load %arg3[%c0_187, %c0_188, %c0_189] : memref<1x128x512xbf16, #tpu.memory_space<vmem>>, vector<1x128x512xbf16>
    %360 = vector.shape_cast %359 : vector<1x128x512xbf16> to vector<128x512xbf16>
    %cst_190 = arith.constant dense<0.000000e+00> : vector<16x512xf32>
    %361 = tpu.matmul %358, %360, %cst_190 {dimension_numbers = #tpu.dot_dimension_numbers<[1], [0], [0], [1], [0, 0, 1, 1], [], []>} : vector<16x128xbf16>, vector<128x512xbf16>, vector<16x512xf32> -> vector<16x512xf32>
    %362 = arith.addf %356, %361 : vector<16x512xf32>
    %363 = vector.extract_strided_slice %362 {offsets = [0, 0], sizes = [16, 128], strides = [1, 1]} : vector<16x512xf32> to vector<16x128xf32>
    %cst_191 = arith.constant 5.000000e-01 : f32
    %364 = vector.broadcast %cst_191 : f32 to vector<16x128xf32>
    %365 = arith.mulf %364, %363 : vector<16x128xf32>
    %366 = math.tanh %365 : vector<16x128xf32>
    %cst_192 = arith.constant 5.000000e-01 : f32
    %367 = vector.broadcast %cst_192 : f32 to vector<16x128xf32>
    %368 = arith.mulf %367, %366 : vector<16x128xf32>
    %cst_193 = arith.constant 5.000000e-01 : f32
    %369 = vector.broadcast %cst_193 : f32 to vector<16x128xf32>
    %370 = arith.addf %368, %369 : vector<16x128xf32>
    %371 = vector.extract_strided_slice %362 {offsets = [0, 128], sizes = [16, 128], strides = [1, 1]} : vector<16x512xf32> to vector<16x128xf32>
    %cst_194 = arith.constant 5.000000e-01 : f32
    %372 = vector.broadcast %cst_194 : f32 to vector<16x128xf32>
    %373 = arith.mulf %372, %371 : vector<16x128xf32>
    %374 = math.tanh %373 : vector<16x128xf32>
    %cst_195 = arith.constant 5.000000e-01 : f32
    %375 = vector.broadcast %cst_195 : f32 to vector<16x128xf32>
    %376 = arith.mulf %375, %374 : vector<16x128xf32>
    %cst_196 = arith.constant 5.000000e-01 : f32
    %377 = vector.broadcast %cst_196 : f32 to vector<16x128xf32>
    %378 = arith.addf %376, %377 : vector<16x128xf32>
    %379 = vector.extract_strided_slice %362 {offsets = [0, 256], sizes = [16, 128], strides = [1, 1]} : vector<16x512xf32> to vector<16x128xf32>
    %380 = math.tanh %379 : vector<16x128xf32>
    %381 = vector.extract_strided_slice %362 {offsets = [0, 384], sizes = [16, 128], strides = [1, 1]} : vector<16x512xf32> to vector<16x128xf32>
    %cst_197 = arith.constant 5.000000e-01 : f32
    %382 = vector.broadcast %cst_197 : f32 to vector<16x128xf32>
    %383 = arith.mulf %382, %381 : vector<16x128xf32>
    %384 = math.tanh %383 : vector<16x128xf32>
    %cst_198 = arith.constant 5.000000e-01 : f32
    %385 = vector.broadcast %cst_198 : f32 to vector<16x128xf32>
    %386 = arith.mulf %385, %384 : vector<16x128xf32>
    %cst_199 = arith.constant 5.000000e-01 : f32
    %387 = vector.broadcast %cst_199 : f32 to vector<16x128xf32>
    %388 = arith.addf %386, %387 : vector<16x128xf32>
    %c0_200 = arith.constant 0 : index
    %c0_201 = arith.constant 0 : index
    %389 = vector.load %arg10[%c0_200, %c0_201] : memref<16x128xf32, #tpu.memory_space<vmem>>, vector<16x128xf32>
    %390 = arith.mulf %378, %389 : vector<16x128xf32>
    %391 = arith.mulf %370, %380 : vector<16x128xf32>
    %392 = arith.addf %390, %391 : vector<16x128xf32>
    %393 = math.tanh %392 : vector<16x128xf32>
    %394 = arith.mulf %388, %393 : vector<16x128xf32>
    %c0_202 = arith.constant 0 : index
    %c0_203 = arith.constant 0 : index
    %395 = vector.load %arg10[%c0_202, %c0_203] : memref<16x128xf32, #tpu.memory_space<vmem>>, vector<16x128xf32>
    tpu.vector_store %arg10[%c0_202, %c0_203], %392 {strides = array<i32>} : memref<16x128xf32, #tpu.memory_space<vmem>>, vector<16x128xf32>,
    %c0_204 = arith.constant 0 : index
    %c0_205 = arith.constant 0 : index
    %396 = vector.load %arg9[%c0_204, %c0_205] : memref<16x128xf32, #tpu.memory_space<vmem>>, vector<16x128xf32>
    tpu.vector_store %arg9[%c0_204, %c0_205], %394 {strides = array<i32>} : memref<16x128xf32, #tpu.memory_space<vmem>>, vector<16x128xf32>,
    %397 = arith.truncf %394 : vector<16x128xf32> to vector<16x128xbf16>
    %398 = arith.index_cast %c7_i32 : i32 to index
    %c0_206 = arith.constant 0 : index
    %c0_207 = arith.constant 0 : index
    %399 = vector.load %arg11[%398, %c0_206, %c0_207] : memref<8x16x128xbf16, #tpu.memory_space<vmem>>, vector<1x16x128xbf16>
    %400 = vector.shape_cast %399 : vector<1x16x128xbf16> to vector<16x128xbf16>
    %401 = vector.shape_cast %397 : vector<16x128xbf16> to vector<1x16x128xbf16>
    tpu.vector_store %arg11[%398, %c0_206, %c0_207], %401 {strides = array<i32>} : memref<8x16x128xbf16, #tpu.memory_space<vmem>>, vector<1x16x128xbf16>,
    %c8_i32 = arith.constant 8 : i32
    %c1_i32_208 = arith.constant 1 : i32
    %402 = arith.cmpi eq, %arg0, %c1_i32_208 : i32
    %403 = arith.extui %402 : i1 to i32
    %c0_i32_209 = arith.constant 0 : i32
    %404 = arith.cmpi ne, %403, %c0_i32_209 : i32
    scf.if %404 {
      %c0_210 = arith.constant 0 : index
      %c0_211 = arith.constant 0 : index
      %405 = vector.load %arg9[%c0_210, %c0_211] : memref<16x128xf32, #tpu.memory_space<vmem>>, vector<16x128xf32>
      %406 = arith.truncf %405 : vector<16x128xf32> to vector<16x128xbf16>
      %c0_212 = arith.constant 0 : index
      %c0_213 = arith.constant 0 : index
      %407 = vector.load %arg5[%c0_212, %c0_213] : memref<128x128xbf16, #tpu.memory_space<vmem>>, vector<128x128xbf16>
      %cst_214 = arith.constant dense<0.000000e+00> : vector<16x128xf32>
      %408 = tpu.matmul %406, %407, %cst_214 {dimension_numbers = #tpu.dot_dimension_numbers<[1], [0], [0], [1], [0, 0, 1, 1], [], []>} : vector<16x128xbf16>, vector<128x128xbf16>, vector<16x128xf32> -> vector<16x128xf32>
      %c0_215 = arith.constant 0 : index
      %c0_216 = arith.constant 0 : index
      %409 = vector.load %arg6[%c0_215, %c0_216] : memref<1x128xf32, #tpu.memory_space<vmem>>, vector<1x128xf32>
      %410 = vector.broadcast %409 : vector<1x128xf32> to vector<16x128xf32>
      %411 = arith.addf %408, %410 : vector<16x128xf32>
      %c0_217 = arith.constant 0 : index
      %c0_218 = arith.constant 0 : index
      %412 = vector.load %arg7[%c0_217, %c0_218] : memref<16x128xf32, #tpu.memory_space<vmem>>, vector<16x128xf32>
      tpu.vector_store %arg7[%c0_217, %c0_218], %411 {strides = array<i32>} : memref<16x128xf32, #tpu.memory_space<vmem>>, vector<16x128xf32>,
    } else {
    }
    return
  }
  func.func @transform_0(%arg0: i32) -> (i32, i32, i32) {
    %c0_i32 = arith.constant 0 : i32
    %c0_i32_0 = arith.constant 0 : i32
    %c0_i32_1 = arith.constant 0 : i32
    %c0_i32_2 = arith.constant 0 : i32
    return %c0_i32, %c0_i32_0, %c0_i32_1 : i32, i32, i32
  }
  func.func @transform_1(%arg0: i32) -> (i32, i32, i32) {
    %c0_i32 = arith.constant 0 : i32
    %c0_i32_0 = arith.constant 0 : i32
    %c0_i32_1 = arith.constant 0 : i32
    return %arg0, %c0_i32, %c0_i32_0 : i32, i32, i32
  }
  func.func @transform_2(%arg0: i32) -> (i32, i32, i32) {
    %c0_i32 = arith.constant 0 : i32
    %c0_i32_0 = arith.constant 0 : i32
    %c0_i32_1 = arith.constant 0 : i32
    return %arg0, %c0_i32, %c0_i32_0 : i32, i32, i32
  }
  func.func @transform_3(%arg0: i32) -> (i32, i32, i32) {
    %c0_i32 = arith.constant 0 : i32
    %c0_i32_0 = arith.constant 0 : i32
    %c0_i32_1 = arith.constant 0 : i32
    return %arg0, %c0_i32, %c0_i32_0 : i32, i32, i32
  }
  func.func @transform_4(%arg0: i32) -> (i32, i32) {
    %c0_i32 = arith.constant 0 : i32
    %c0_i32_0 = arith.constant 0 : i32
    %c0_i32_1 = arith.constant 0 : i32
    return %c0_i32, %c0_i32_0 : i32, i32
  }
  func.func @transform_5(%arg0: i32) -> (i32, i32) {
    %c0_i32 = arith.constant 0 : i32
    %c0_i32_0 = arith.constant 0 : i32
    %c0_i32_1 = arith.constant 0 : i32
    return %c0_i32, %c0_i32_0 : i32, i32
  }
  func.func @transform_6(%arg0: i32) -> (i32, i32) {
    %c0_i32 = arith.constant 0 : i32
    %c0_i32_0 = arith.constant 0 : i32
    %c0_i32_1 = arith.constant 0 : i32
    return %c0_i32, %c0_i32_0 : i32, i32
  }
}

</mosaic_0001>

<bundles_post_ra>
// kernel: lstm_model_forward.1
= control target key start
LH: loop header
LB: loop body
LE: loop exit
PB: predicated region body
PF: predicated region fallthrough
CT: control target
= control target key end

     0   :  { %s7267_s0 = inlined_call_operand.vmem [shape: bf16[8,16,128], index: 0, kind: input, shape index: {}]   ;;  %s7268_s1 = inlined_call_operand.hbm [shape: bf16[2,128,512], index: 1, kind: input, shape index: {}]   ;;  %s7269_s2 = inlined_call_operand.hbm [shape: bf16[2,128,512], index: 2, kind: input, shape index: {}]   ;;  %s7270_s3 = inlined_call_operand.vmem [shape: f32[2,1,512], index: 3, kind: input, shape index: {}]   ;;  %s7271_s4 = inlined_call_operand.vmem [shape: bf16[128,128], index: 4, kind: input, shape index: {}]   ;;  %s7272_s5 = inlined_call_operand.vmem [shape: f32[1,128], index: 5, kind: input, shape index: {}]   ;;  %s7273_s6 = inlined_call_operand.vmem [shape: f32[16,128], index: 6, kind: output, shape index: {}]  }
   0x1   :  { %7274 = sst [smem:[#allocation12_spill]] %s7268_s1 }
   0x2   :  { %11 = vsyncpa [#allocation7], 0 }
   0x3   :  { %13 = vsyncpa [#allocation7 + $0x1], 0 }
   0x4   :  { %14 = vsyncpa [#allocation9], 0 }
   0x5   :  { %16 = vsyncpa [#allocation9 + $0x1], 0  ;;  %s6223_s21 = smov 0   ;;  %s6225_s22 = smov 0  }
   0x6   :  { %s6227_s23 = smov 0   ;;  %s6229_s24 = smov 0  }
   0x7 LB: > { %s6242_s25 = sadd.s32 4294967295, %s6183_s24   ;;  %s6245_s26 = sadd.s32 1, %s6183_s24   ;;  %s6183_s24 = sphi %s6229_s24, %s7283_s24   ;;  %s6179_s23 = sphi %s6227_s23, %s7282_s23   ;;  %s6175_s22 = sphi %s6225_s22, %s7281_s22   ;;  %s6171_s21 = sphi %s6223_s21, %s7280_s21  }
   0x8   : > { %s47_s27 = ssub.s32 %s6183_s24, %s6245_s26  ;;  %s50_s28 = sadd.s32 1, %s6179_s23 }
   0x9   : > { %p48_p0 = scmp.eq.s32.totalorder %s47_s27, 0  ;;  %p57_p1 = scmp.ne.s32.totalorder %s6179_s23, %s6175_s22 }
   0xa   : > { %p58_p2 = scmp.eq.s32.totalorder %s6183_s24, 0  ;;  %p63_p3 = scmp.ne.s32.totalorder %s6175_s22, %s6171_s21 }
   0xb   : > { %s6255_s29 = scalar_select %p48_p0, %s6179_s23, %s50_s28  }
   0xc   : > { %p6257_p4 = por %p58_p2, %p57_p1  ;;  %p64_p5 = scmp.eq.s32.totalorder %s6242_s25, 0 }
   0xd   : > { %p5888_p6 = scmp.lt.s32.totalorder %s6183_s24, 2  ;;  %s6268_s8 = sand.u32 1, %s6179_s23  }
   0xe   : > { %p6263_p7 = por %p64_p5, %p63_p3  ;;  %s4100_s9 = sshll.u32 %s6268_s8, 8 }
   0xf   : > { %s5491_s10 = sshll.u32 %s6183_s24, 8  ;;  %s7277_s1 = sld [smem:[#allocation12_spill]] }
  0x10   : > { %s215_s14 = scalar_lea.vmem [#allocation6], %s4100_s9  ;;  %p6281_p8 = pnand %p5888_p6, %p6257_p4 }
  0x11   : > { %s223_s15 = sshll.u32 %s215_s14, 4  ;;  %p4106_p9 = scmp.ge.s32.totalorder %s6183_s24, 1  ;;  %s224_s15 = int_to_ptr.vmem [resolvable:$true] %s223_s15 }
  0x12   : > { %s212_s18 = scalar_lea.sflag [#allocation7], %s6268_s8  ;;  %p6089_p11 = pneg %p6281_p8 }
  0x15   : > { %s220_s13 = scalar_lea.hbm %s7277_s1, %s5491_s10  ;;  %s6092_s28 = scalar_lea.hbm %s7277_s1, 512 }
  0x16   : > { %s221_s16 = sshll.u32 %s220_s13, 4  ;;  %s222_s16 = int_to_ptr.hbm [resolvable:$true] %s221_s16 }
  0x17   : > { %s6085_s19 = sshra.s32 %s222_s16, 4  ;;  %s6086_s19 = int_to_ptr.hbm [resolvable:$true] %s6085_s19 }
  0x18   : > { %s6087_s20 = scalar_lea.hbm %s6086_s19, 256  ;;  %p6093_p0 = scmp.lt.s32.totalorder %s6086_s19, %s7277_s1 }
  0x19   : > { %p6088_p10 = scmp.ne.s32.totalorder %s6086_s19, %s6087_s20  ;;  %p6094_p1 = scmp.lt.s32.totalorder %s6092_s28, %s6087_s20 }
  0x1b   : > { %p6090_p12 = pnand %p6089_p11, %p6088_p10  ;;  %p6095_p2 = por %p6094_p1, %p6093_p0 }
  0x1d   : > { %p6091_p13 = pneg %p6090_p12 }
  0x1f   : > { %p6096_p3 = pnand %p6095_p2, %p6091_p13 }
  0x21   : > { %6099 = shalt.err (!%p6096_p3)
}
  0x22   : > { %s6185_s12 = smov 256   ;;  %s6186_s13 = smov 16  }
  0x23   : > { %5884 = dma.hbm_to_vmem [thread:$0]  (!%p6281_p8), %s222_s16, 4096, %s224_s15, %s212_s18, %s6185_s12, %s6185_s12, %s6186_s13  }
  0x24   : > { %p260_p4 = scmp.lt.s32.totalorder %s6183_s24, 3  ;;  %s242_s19 = scalar_lea.hbm %s7269_s2, %s5491_s10 }
  0x25   : > { %s243_s27 = sshll.u32 %s242_s19, 4  ;;  %s237_s28 = scalar_lea.vmem [#allocation8], %s4100_s9  ;;  %s244_s27 = int_to_ptr.hbm [resolvable:$true] %s243_s27 }
  0x26   : > { %p6308_p5 = pnand %p4106_p9, %p260_p4  ;;  %s245_s30 = sshll.u32 %s237_s28, 4  ;;  %s246_s30 = int_to_ptr.vmem [resolvable:$true] %s245_s30 }
  0x27   : > { %s234_s11 = scalar_lea.sflag [#allocation9], %s6268_s8  ;;  %s6115_s1 = sshra.s32 %s244_s27, 4  ;;  %s6116_s1 = int_to_ptr.hbm [resolvable:$true] %s6115_s1 }
  0x28   : > { %s6117_s15 = scalar_lea.hbm %s6116_s1, 256  ;;  %s6122_s16 = scalar_lea.hbm %s7269_s2, 512 }
  0x29   : > { %p6118_p6 = scmp.ne.s32.totalorder %s6116_s1, %s6117_s15  ;;  %p6123_p9 = scmp.lt.s32.totalorder %s6116_s1, %s7269_s2 }
  0x2a   : > { %p6124_p13 = scmp.lt.s32.totalorder %s6122_s16, %s6117_s15 }
  0x2b   : > { %p6120_p10 = pnand %p6118_p6, %p6089_p11 }
  0x2c   : > { %p6125_p0 = por %p6124_p13, %p6123_p9 }
  0x2d   : > { %p6121_p12 = pneg %p6120_p10 }
  0x2f   : > { %p6126_p1 = pnand %p6125_p0, %p6121_p12 }
  0x31   : > { %6129 = shalt.err (!%p6126_p1)
}
  0x32   : > { %5887 = dma.hbm_to_vmem [thread:$0]  (!%p6281_p8), %s244_s27, 4096, %s246_s30, %s234_s11, %s6185_s12, %s6185_s12, %s6186_s13  }
  0x33   : > { %264 = sbr.rel (%p6308_p5) target bundleno = 2184 (0x888), region = 44  ;;  %s266_s8 = sand.u32 (!%p6308_p5), 1, %s6175_s22  }
  0x34   : > { %s4107_s9 = sshll.u32 (!%p6308_p5), %s266_s8, 8  ;;  %s267_s21 = scalar_lea.sflag (!%p6308_p5), [#allocation7], %s266_s8 }
  0x35   : > { %s6329_s19 = scalar_lea.vmem (!%p6308_p5), [#allocation6], %s4107_s9 }
  0x38   : > { %6162 = dma.done.wait (%p6263_p7), %s267_s21, 4096  }
  0x39   : > { %6164 = vsyncadd (%p6263_p7), %s267_s21, 4294963200  ;;  %s277_s1 = scalar_lea.sflag [#allocation9], %s266_s8  ;;  %s6335_s28 = scalar_lea.vmem [#allocation8], %s4107_s9 }
  0x3a   : > { %6166 = dma.done.wait (%p6263_p7), %s277_s1, 4096  }
  0x3b   : > { %6168 = vsyncadd (%p6263_p7), %s277_s1, 4294963200  ;;  %p314_p8 = scmp.lt.s32.totalorder %s6242_s25, 1  ;;  %p4110_p11 = scmp.ne.s32.totalorder %s6242_s25, 0 }
  0x3d   : > { %s315_s17 = scalar_select %p314_p8, %s6242_s25, 1 }
  0x3e   : > { %321 = sbr.rel (%p4110_p11) target bundleno = 360 (0x168), region = 56 }
  0x3f   : > { %s4109_s12 = sshll.u32 %s315_s17, 2 }
  0x40   : > { %s6346_s27 = scalar_lea.vmem %s7270_s3, %s4109_s12 }
  0x43   : > { %v4257_v0 = vld [vmem:[%s6329_s19 + $0xe0] sm:$0xf]  ;;  %v5531_v1 = vld [vmem:[%s6329_s19 + $0xec] sm:$0xf0]  ;;  %v5529_v2 = vld [vmem:[%s6329_s19 + $0xe4] sm:$0xf] }
  0x44   : > { %v4258_v3 = vor.u32 %v5531_v1, %v4257_v0  ;;  %v4259_v4 = vld [vmem:[%s6329_s19 + $0xf0] sm:$0xf0]  ;;  %v4265_v5 = vld [vmem:[%s6329_s19 + $0xe8] sm:$0xf]  ;;  %v5532_v6 = vld [vmem:[%s6329_s19 + $0xf4] sm:$0xf0] }
  0x45   : > { %v4262_v7 = vor.u32 %v5529_v2, %v4259_v4  ;;  %v4266_v8 = vor.u32 %v5532_v6, %v4265_v5  ;;  %v5530_v9 = vld [vmem:[%s6329_s19 + $0xec] sm:$0xf]  ;;  %v4267_v10 = vld [vmem:[%s6329_s19 + $0xf8] sm:$0xf0]  ;;  %v4241_v11 = vld [vmem:[%s6329_s19 + $0xc0] sm:$0xf] }
  0x46   : > { %588 = vmatpush.bf16.msra.mxu0 %v4258_v3  ;;  %v4270_v12 = vor.u32 %v5530_v9, %v4267_v10  ;;  %v5527_v13 = vld [vmem:[%s6329_s19 + $0xcc] sm:$0xf0]  ;;  %v5525_v14 = vld [vmem:[%s6329_s19 + $0xc4] sm:$0xf]  ;;  %v4243_v15 = vld [vmem:[%s6329_s19 + $0xd0] sm:$0xf0] }
  0x47   : > { %637 = vmatpush.bf16.msra.mxu1 %v4262_v7  ;;  %686 = vmatpush.bf16.msra.mxu2 %v4266_v8  ;;  %v4242_v16 = vor.u32 %v5527_v13, %v4241_v11  ;;  %v4246_v17 = vor.u32 %v5525_v14, %v4243_v15  ;;  %v4249_v18 = vld [vmem:[%s6329_s19 + $0xc8] sm:$0xf]  ;;  %v5528_v19 = vld [vmem:[%s6329_s19 + $0xd4] sm:$0xf0]  ;;  %v5526_v20 = vld [vmem:[%s6329_s19 + $0xcc] sm:$0xf] }
  0x48   : > { %735 = vmatpush.bf16.msra.mxu3 %v4270_v12  ;;  %v4250_v21 = vor.u32 %v5528_v19, %v4249_v18  ;;  %v4251_v22 = vld [vmem:[%s6329_s19 + $0xd8] sm:$0xf0]  ;;  %v4225_v23 = vld [vmem:[%s6329_s19 + $0xa0] sm:$0xf]  ;;  %v5523_v24 = vld [vmem:[%s6329_s19 + $0xac] sm:$0xf0] }
  0x49   : > { %v4254_v25 = vor.u32 %v5526_v20, %v4251_v22  ;;  %v5521_v26 = vld [vmem:[%s6329_s19 + $0xa4] sm:$0xf]  ;;  %v4227_v27 = vld [vmem:[%s6329_s19 + $0xb0] sm:$0xf0]  ;;  %v4233_v28 = vld [vmem:[%s6329_s19 + $0xa8] sm:$0xf]  ;;  %v4226_v29 = vor.u32 %v5523_v24, %v4225_v23 }
  0x4a   : > { %589 = vmatpush.bf16.msra.mxu0 %v4242_v16  ;;  %v5524_v30 = vld [vmem:[%s6329_s19 + $0xb4] sm:$0xf0]  ;;  %v5522_v31 = vld [vmem:[%s6329_s19 + $0xac] sm:$0xf]  ;;  %v4235_v32 = vld [vmem:[%s6329_s19 + $0xb8] sm:$0xf0]  ;;  %v4230_v33 = vor.u32 %v5521_v26, %v4227_v27 }
  0x4b   : > { %638 = vmatpush.bf16.msra.mxu1 %v4246_v17  ;;  %687 = vmatpush.bf16.msra.mxu2 %v4250_v21  ;;  %v4234_v34 = vor.u32 %v5524_v30, %v4233_v28  ;;  %v4209_v35 = vld [vmem:[%s6329_s19 + $0x80] sm:$0xf]  ;;  %v5519_v36 = vld [vmem:[%s6329_s19 + $0x8c] sm:$0xf0]  ;;  %v5517_v37 = vld [vmem:[%s6329_s19 + $0x84] sm:$0xf]  ;;  %v4238_v38 = vor.u32 %v5522_v31, %v4235_v32 }
  0x4c   : > { %736 = vmatpush.bf16.msra.mxu3 %v4254_v25  ;;  %v4211_v39 = vld [vmem:[%s6329_s19 + $0x90] sm:$0xf0]  ;;  %v4217_v40 = vld [vmem:[%s6329_s19 + $0x88] sm:$0xf]  ;;  %v5520_v41 = vld [vmem:[%s6329_s19 + $0x94] sm:$0xf0]  ;;  %v4210_v44 = vor.u32 %v5519_v36, %v4209_v35 }
  0x4d   : > { %v5518_v42 = vld [vmem:[%s6329_s19 + $0x8c] sm:$0xf]  ;;  %v4219_v43 = vld [vmem:[%s6329_s19 + $0x98] sm:$0xf0]  ;;  %v4214_v45 = vor.u32 %v5517_v37, %v4211_v39  ;;  %v4218_v46 = vor.u32 %v5520_v41, %v4217_v40  ;;  %v4193_v47 = vld [vmem:[%s6329_s19 + $0x60] sm:$0xf] }
  0x4e   : > { %590 = vmatpush.bf16.msra.mxu0 %v4226_v29  ;;  %v5515_v48 = vld [vmem:[%s6329_s19 + $0x6c] sm:$0xf0]  ;;  %v5513_v49 = vld [vmem:[%s6329_s19 + $0x64] sm:$0xf]  ;;  %v4222_v50 = vor.u32 %v5518_v42, %v4219_v43  ;;  %v4195_v51 = vld [vmem:[%s6329_s19 + $0x70] sm:$0xf0] }
  0x4f   : > { %639 = vmatpush.bf16.msra.mxu1 %v4230_v33  ;;  %688 = vmatpush.bf16.msra.mxu2 %v4234_v34  ;;  %v4201_v52 = vld [vmem:[%s6329_s19 + $0x68] sm:$0xf]  ;;  %v5516_v53 = vld [vmem:[%s6329_s19 + $0x74] sm:$0xf0]  ;;  %v5514_v54 = vld [vmem:[%s6329_s19 + $0x6c] sm:$0xf]  ;;  %v4194_v56 = vor.u32 %v5515_v48, %v4193_v47  ;;  %v4198_v57 = vor.u32 %v5513_v49, %v4195_v51 }
  0x50   : > { %737 = vmatpush.bf16.msra.mxu3 %v4238_v38  ;;  %v4203_v55 = vld [vmem:[%s6329_s19 + $0x78] sm:$0xf0]  ;;  %v4202_v58 = vor.u32 %v5516_v53, %v4201_v52  ;;  %v4177_v59 = vld [vmem:[%s6329_s19 + $0x40] sm:$0xf]  ;;  %v5511_v60 = vld [vmem:[%s6329_s19 + $0x4c] sm:$0xf0] }
  0x51   : > { %v5509_v61 = vld [vmem:[%s6329_s19 + $0x44] sm:$0xf]  ;;  %v4206_v62 = vor.u32 %v5514_v54, %v4203_v55  ;;  %v4179_v63 = vld [vmem:[%s6329_s19 + $0x50] sm:$0xf0]  ;;  %v4185_v0 = vld [vmem:[%s6329_s19 + $0x48] sm:$0xf]  ;;  %v4178_v4 = vor.u32 %v5511_v60, %v4177_v59 }
  0x52   : > { %591 = vmatpush.bf16.msra.mxu0 %v4210_v44  ;;  %v5512_v1 = vld [vmem:[%s6329_s19 + $0x54] sm:$0xf0]  ;;  %v5510_v2 = vld [vmem:[%s6329_s19 + $0x4c] sm:$0xf]  ;;  %v4187_v3 = vld [vmem:[%s6329_s19 + $0x58] sm:$0xf0]  ;;  %v4182_v5 = vor.u32 %v5509_v61, %v4179_v63 }
  0x53   : > { %640 = vmatpush.bf16.msra.mxu1 %v4214_v45  ;;  %689 = vmatpush.bf16.msra.mxu2 %v4218_v46  ;;  %v4186_v6 = vor.u32 %v5512_v1, %v4185_v0  ;;  %v4161_v7 = vld [vmem:[%s6329_s19 + $0x20] sm:$0xf]  ;;  %v5507_v8 = vld [vmem:[%s6329_s19 + $0x2c] sm:$0xf0]  ;;  %v5505_v9 = vld [vmem:[%s6329_s19 + $0x24] sm:$0xf]  ;;  %v4190_v10 = vor.u32 %v5510_v2, %v4187_v3 }
  0x54   : > { %738 = vmatpush.bf16.msra.mxu3 %v4222_v50  ;;  %v4163_v11 = vld [vmem:[%s6329_s19 + $0x30] sm:$0xf0]  ;;  %v4169_v12 = vld [vmem:[%s6329_s19 + $0x28] sm:$0xf]  ;;  %v5508_v13 = vld [vmem:[%s6329_s19 + $0x34] sm:$0xf0]  ;;  %v4162_v16 = vor.u32 %v5507_v8, %v4161_v7 }
  0x55   : > { %v5506_v14 = vld [vmem:[%s6329_s19 + $0x2c] sm:$0xf]  ;;  %v4171_v15 = vld [vmem:[%s6329_s19 + $0x38] sm:$0xf0]  ;;  %v4166_v17 = vor.u32 %v5505_v9, %v4163_v11  ;;  %v4170_v18 = vor.u32 %v5508_v13, %v4169_v12  ;;  %v4145_v19 = vld [vmem:[%s6329_s19] sm:$0xf] }
  0x56   : > { %592 = vmatpush.bf16.msra.mxu0 %v4194_v56  ;;  %v5503_v20 = vld [vmem:[%s6329_s19 + $0xc] sm:$0xf0]  ;;  %v5501_v21 = vld [vmem:[%s6329_s19 + $0x4] sm:$0xf]  ;;  %v4174_v22 = vor.u32 %v5506_v14, %v4171_v15  ;;  %v4147_v23 = vld [vmem:[%s6329_s19 + $0x10] sm:$0xf0] }
  0x57   : > { %641 = vmatpush.bf16.msra.mxu1 %v4198_v57  ;;  %690 = vmatpush.bf16.msra.mxu2 %v4202_v58  ;;  %v4153_v24 = vld [vmem:[%s6329_s19 + $0x8] sm:$0xf]  ;;  %v5504_v25 = vld [vmem:[%s6329_s19 + $0x14] sm:$0xf0]  ;;  %v5502_v26 = vld [vmem:[%s6329_s19 + $0xc] sm:$0xf]  ;;  %v4146_v28 = vor.u32 %v5503_v20, %v4145_v19  ;;  %v4150_v29 = vor.u32 %v5501_v21, %v4147_v23 }
  0x58   : > { %739 = vmatpush.bf16.msra.mxu3 %v4206_v62  ;;  %v4155_v27 = vld [vmem:[%s6329_s19 + $0x18] sm:$0xf0]  ;;  %v4154_v30 = vor.u32 %v5504_v25, %v4153_v24  ;;  %v5493_v32 = vld [vmem:[%s7267_s0] sm:$0xff]  ;;  %v5495_v34 = vld [vmem:[%s7267_s0 + $0x10] sm:$0xff] }
  0x59   : > { %v4158_v31 = vor.u32 %v5502_v26, %v4155_v27  ;;  %v5494_v33 = vld [vmem:[%s7267_s0 + $0x8] sm:$0xff]  ;;  %v5496_v35 = vld [vmem:[%s7267_s0 + $0x18] sm:$0xff]  ;;  %v5497_v36 = vld [vmem:[%s7267_s0 + $0x20] sm:$0xff] }
  0x5a   : > { %593 = vmatpush.bf16.msra.mxu0 %v4178_v4  ;;  %v5498_v37 = vld [vmem:[%s7267_s0 + $0x28] sm:$0xff]  ;;  %v5499_v38 = vld [vmem:[%s7267_s0 + $0x30] sm:$0xff]  ;;  %v5500_v39 = vld [vmem:[%s7267_s0 + $0x38] sm:$0xff] }
  0x5b   : > { %642 = vmatpush.bf16.msra.mxu1 %v4182_v5  ;;  %691 = vmatpush.bf16.msra.mxu2 %v4186_v6  ;;  %v370_v40 = vld [vmem:[%s6346_s27] sm:$0xf] }
  0x5c   : > { %740 = vmatpush.bf16.msra.mxu3 %v4190_v10  ;;  %v6438_v41 = vperm.slane %v370_v40, 0  ;;  %v6440_v42 = vperm.slane %v370_v40, 1  ;;  %v6444_v48 = vperm.slane %v370_v40, 2  ;;  %v6446_v49 = vperm.slane %v370_v40, 3 }
  0x5e   : > { %594 = vmatpush.bf16.msra.mxu0 %v4162_v16 }
  0x5f   : > { %643 = vmatpush.bf16.msra.mxu1 %v4166_v17  ;;  %692 = vmatpush.bf16.msra.mxu2 %v4170_v18 }
  0x60   : > { %741 = vmatpush.bf16.msra.mxu3 %v4174_v22 }
  0x62   : > { %595 = vmatpush.bf16.msra.mxu0 %v4146_v28 }
  0x63   : > { %644 = vmatpush.bf16.msra.mxu1 %v4150_v29  ;;  %693 = vmatpush.bf16.msra.mxu2 %v4154_v30 }
  0x64   : > { %742 = vmatpush.bf16.msra.mxu3 %v4158_v31 }
  0x65   : > { %596 = vmatmul.bf16.vlgmr.msra.gmra.mxu0 %v5493_v32 }
  0x66   : > { %645 = vmatmul.bf16.vlgmr.msra.gmra.mxu1 %v5493_v32  ;;  %694 = vmatmul.bf16.vlgmr.msra.gmra.mxu2 %v5493_v32 }
  0x67   : > { %743 = vmatmul.bf16.vlgmr.msra.gmra.mxu3 %v5493_v32 }
  0x75   : > { %601 = vmatmul.bf16.gmra.mxu0 %v5494_v33 }
  0x76   : > { %650 = vmatmul.bf16.gmra.mxu1 %v5494_v33  ;;  %699 = vmatmul.bf16.gmra.mxu2 %v5494_v33 }
  0x77   : > { %748 = vmatmul.bf16.gmra.mxu3 %v5494_v33 }
  0x85   : > { %606 = vmatmul.bf16.gmra.mxu0 %v5495_v34 }
  0x86   : > { %655 = vmatmul.bf16.gmra.mxu1 %v5495_v34  ;;  %704 = vmatmul.bf16.gmra.mxu2 %v5495_v34 }
  0x87   : > { %753 = vmatmul.bf16.gmra.mxu3 %v5495_v34 }
  0x95   : > { %611 = vmatmul.bf16.gmra.mxu0 %v5496_v35 }
  0x96   : > { %660 = vmatmul.bf16.gmra.mxu1 %v5496_v35  ;;  %709 = vmatmul.bf16.gmra.mxu2 %v5496_v35 }
  0x97   : > { %758 = vmatmul.bf16.gmra.mxu3 %v5496_v35 }
  0xa5   : > { %616 = vmatmul.bf16.gmra.mxu0 %v5497_v36 }
  0xa6   : > { %665 = vmatmul.bf16.gmra.mxu1 %v5497_v36  ;;  %714 = vmatmul.bf16.gmra.mxu2 %v5497_v36 }
  0xa7   : > { %763 = vmatmul.bf16.gmra.mxu3 %v5497_v36 }
  0xb5   : > { %621 = vmatmul.bf16.gmra.mxu0 %v5498_v37 }
  0xb6   : > { %670 = vmatmul.bf16.gmra.mxu1 %v5498_v37  ;;  %719 = vmatmul.bf16.gmra.mxu2 %v5498_v37 }
  0xb7   : > { %768 = vmatmul.bf16.gmra.mxu3 %v5498_v37 }
  0xc5   : > { %626 = vmatmul.bf16.gmra.mxu0 %v5499_v38 }
  0xc6   : > { %675 = vmatmul.bf16.gmra.mxu1 %v5499_v38  ;;  %724 = vmatmul.bf16.gmra.mxu2 %v5499_v38 }
  0xc7   : > { %773 = vmatmul.bf16.gmra.mxu3 %v5499_v38 }
  0xd5   : > { %631 = vmatmul.bf16.gmra.mxu0 %v5500_v39 }
  0xd6   : > { %680 = vmatmul.bf16.gmra.mxu1 %v5500_v39  ;;  %729 = vmatmul.bf16.gmra.mxu2 %v5500_v39 }
  0xd7   : > { %778 = vmatmul.bf16.gmra.mxu3 %v5500_v39 }
  0xe2   : > { %v597_v43 = vpop.f32.mrf.mxu0 }
  0xe3   : > { %v598_v44 = vadd.f32 %v597_v43, %v6438_v41  ;;  %v646_v45 = vpop.f32.mrf.mxu1 }
  0xe4   : > { %v647_v46 = vadd.f32 %v646_v45, %v6440_v42 }
  0xe6   : > { %v784_v47 = vpack.c.bf16 %v647_v46, %v598_v44 }
  0xe8   : > { %816 = vst [vmem:[#allocation2 + $0xb0] sm:$0xff] %v784_v47 }
  0xe9   : > { %v695_v50 = vpop.f32.mrf.mxu2 }
  0xea   : > { %v696_v51 = vadd.f32 %v695_v50, %v6444_v48  ;;  %v744_v52 = vpop.f32.mrf.mxu3  ;;  %v599_v53 = vpop.f32.mrf.mxu0 }
  0xeb   : > { %v745_v54 = vadd.f32 %v744_v52, %v6446_v49  ;;  %v600_v55 = vadd.f32 %v599_v53, %v6438_v41  ;;  %v648_v56 = vpop.f32.mrf.mxu1 }
  0xec   : > { %v649_v57 = vadd.f32 %v648_v56, %v6440_v42 }
  0xed   : > { %v785_v58 = vpack.c.bf16 %v745_v54, %v696_v51 }
  0xee   : > { %v786_v59 = vpack.c.bf16 %v649_v57, %v600_v55 }
  0xef   : > { %817 = vst [vmem:[#allocation2] sm:$0xff] %v785_v58 }
  0xf0   : > { %818 = vst [vmem:[#allocation2 + $0xd8] sm:$0xff] %v786_v59 }
  0xf1   : > { %v697_v60 = vpop.f32.mrf.mxu2 }
  0xf2   : > { %v698_v61 = vadd.f32 %v697_v60, %v6444_v48  ;;  %v746_v62 = vpop.f32.mrf.mxu3  ;;  %v602_v63 = vpop.f32.mrf.mxu0 }
  0xf3   : > { %v747_v0 = vadd.f32 %v746_v62, %v6446_v49  ;;  %v603_v1 = vadd.f32 %v602_v63, %v6438_v41  ;;  %v651_v2 = vpop.f32.mrf.mxu1 }
  0xf4   : > { %v652_v3 = vadd.f32 %v651_v2, %v6440_v42 }
  0xf5   : > { %v787_v4 = vpack.c.bf16 %v747_v0, %v698_v61 }
  0xf6   : > { %v788_v5 = vpack.c.bf16 %v652_v3, %v603_v1 }
  0xf7   : > { %819 = vst [vmem:[#allocation2 + $0x18] sm:$0xff] %v787_v4 }
  0xf8   : > { %820 = vst [vmem:[#allocation2 + $0x50] sm:$0xff] %v788_v5 }
  0xf9   : > { %v700_v6 = vpop.f32.mrf.mxu2 }
  0xfa   : > { %v701_v7 = vadd.f32 %v700_v6, %v6444_v48  ;;  %v749_v8 = vpop.f32.mrf.mxu3  ;;  %v604_v9 = vpop.f32.mrf.mxu0 }
  0xfb   : > { %v750_v10 = vadd.f32 %v749_v8, %v6446_v49  ;;  %v605_v11 = vadd.f32 %v604_v9, %v6438_v41  ;;  %v653_v12 = vpop.f32.mrf.mxu1 }
  0xfc   : > { %v654_v13 = vadd.f32 %v653_v12, %v6440_v42 }
  0xfd   : > { %v789_v14 = vpack.c.bf16 %v750_v10, %v701_v7 }
  0xfe   : > { %v790_v15 = vpack.c.bf16 %v654_v13, %v605_v11 }
  0xff   : > { %821 = vst [vmem:[#allocation2 + $0x68] sm:$0xff] %v789_v14 }
 0x100   : > { %822 = vst [vmem:[#allocation2 + $0x30] sm:$0xff] %v790_v15 }
 0x101   : > { %v702_v16 = vpop.f32.mrf.mxu2 }
 0x102   : > { %v703_v17 = vadd.f32 %v702_v16, %v6444_v48  ;;  %v751_v18 = vpop.f32.mrf.mxu3  ;;  %v607_v19 = vpop.f32.mrf.mxu0 }
 0x103   : > { %v752_v20 = vadd.f32 %v751_v18, %v6446_v49  ;;  %v608_v21 = vadd.f32 %v607_v19, %v6438_v41  ;;  %v656_v22 = vpop.f32.mrf.mxu1 }
 0x104   : > { %v657_v23 = vadd.f32 %v656_v22, %v6440_v42 }
 0x105   : > { %v791_v24 = vpack.c.bf16 %v752_v20, %v703_v17 }
 0x106   : > { %v792_v25 = vpack.c.bf16 %v657_v23, %v608_v21 }
 0x107   : > { %823 = vst [vmem:[#allocation2 + $0x48] sm:$0xff] %v791_v24 }
 0x108   : > { %824 = vst [vmem:[#allocation2 + $0x80] sm:$0xff] %v792_v25 }
 0x109   : > { %v705_v26 = vpop.f32.mrf.mxu2 }
 0x10a   : > { %v706_v27 = vadd.f32 %v705_v26, %v6444_v48  ;;  %v754_v28 = vpop.f32.mrf.mxu3  ;;  %v609_v29 = vpop.f32.mrf.mxu0 }
 0x10b   : > { %v755_v30 = vadd.f32 %v754_v28, %v6446_v49  ;;  %v610_v31 = vadd.f32 %v609_v29, %v6438_v41  ;;  %v658_v32 = vpop.f32.mrf.mxu1 }
 0x10c   : > { %v659_v33 = vadd.f32 %v658_v32, %v6440_v42 }
 0x10d   : > { %v793_v34 = vpack.c.bf16 %v755_v30, %v706_v27 }
 0x10e   : > { %v794_v35 = vpack.c.bf16 %v659_v33, %v610_v31 }
 0x10f   : > { %825 = vst [vmem:[#allocation2 + $0x88] sm:$0xff] %v793_v34 }
 0x110   : > { %826 = vst [vmem:[#allocation2 + $0xe8] sm:$0xff] %v794_v35 }
 0x111   : > { %v707_v36 = vpop.f32.mrf.mxu2 }
 0x112   : > { %v708_v37 = vadd.f32 %v707_v36, %v6444_v48  ;;  %v756_v38 = vpop.f32.mrf.mxu3  ;;  %v612_v39 = vpop.f32.mrf.mxu0 }
 0x113   : > { %v757_v40 = vadd.f32 %v756_v38, %v6446_v49  ;;  %v613_v43 = vadd.f32 %v612_v39, %v6438_v41  ;;  %v661_v44 = vpop.f32.mrf.mxu1 }
 0x114   : > { %v662_v45 = vadd.f32 %v661_v44, %v6440_v42 }
 0x115   : > { %v795_v46 = vpack.c.bf16 %v757_v40, %v708_v37 }
 0x116   : > { %v796_v47 = vpack.c.bf16 %v662_v45, %v613_v43 }
 0x117   : > { %827 = vst [vmem:[#allocation2 + $0xb8] sm:$0xff] %v795_v46 }
 0x118   : > { %828 = vst [vmem:[#allocation2 + $0x60] sm:$0xff] %v796_v47 }
 0x119   : > { %v710_v50 = vpop.f32.mrf.mxu2 }
 0x11a   : > { %v711_v51 = vadd.f32 %v710_v50, %v6444_v48  ;;  %v759_v52 = vpop.f32.mrf.mxu3  ;;  %v614_v53 = vpop.f32.mrf.mxu0 }
 0x11b   : > { %v760_v54 = vadd.f32 %v759_v52, %v6446_v49  ;;  %v615_v55 = vadd.f32 %v614_v53, %v6438_v41  ;;  %v663_v56 = vpop.f32.mrf.mxu1 }
 0x11c   : > { %v664_v57 = vadd.f32 %v663_v56, %v6440_v42 }
 0x11d   : > { %v797_v58 = vpack.c.bf16 %v760_v54, %v711_v51 }
 0x11e   : > { %v798_v59 = vpack.c.bf16 %v664_v57, %v615_v55 }
 0x11f   : > { %829 = vst [vmem:[#allocation2 + $0xf0] sm:$0xff] %v797_v58 }
 0x120   : > { %830 = vst [vmem:[#allocation2 + $0x8] sm:$0xff] %v798_v59 }
 0x121   : > { %v712_v60 = vpop.f32.mrf.mxu2 }
 0x122   : > { %v713_v61 = vadd.f32 %v712_v60, %v6444_v48  ;;  %v761_v62 = vpop.f32.mrf.mxu3  ;;  %v617_v63 = vpop.f32.mrf.mxu0 }
 0x123   : > { %v762_v0 = vadd.f32 %v761_v62, %v6446_v49  ;;  %v618_v1 = vadd.f32 %v617_v63, %v6438_v41  ;;  %v666_v2 = vpop.f32.mrf.mxu1 }
 0x124   : > { %v667_v3 = vadd.f32 %v666_v2, %v6440_v42 }
 0x125   : > { %v799_v4 = vpack.c.bf16 %v762_v0, %v713_v61 }
 0x126   : > { %v800_v5 = vpack.c.bf16 %v667_v3, %v618_v1 }
 0x127   : > { %831 = vst [vmem:[#allocation2 + $0x78] sm:$0xff] %v799_v4 }
 0x128   : > { %832 = vst [vmem:[#allocation2 + $0x38] sm:$0xff] %v800_v5 }
 0x129   : > { %v715_v6 = vpop.f32.mrf.mxu2 }
 0x12a   : > { %v716_v7 = vadd.f32 %v715_v6, %v6444_v48  ;;  %v764_v8 = vpop.f32.mrf.mxu3  ;;  %v619_v9 = vpop.f32.mrf.mxu0 }
 0x12b   : > { %v765_v10 = vadd.f32 %v764_v8, %v6446_v49  ;;  %v620_v11 = vadd.f32 %v619_v9, %v6438_v41  ;;  %v668_v12 = vpop.f32.mrf.mxu1 }
 0x12c   : > { %v669_v13 = vadd.f32 %v668_v12, %v6440_v42 }
 0x12d   : > { %v801_v14 = vpack.c.bf16 %v765_v10, %v716_v7 }
 0x12e   : > { %v802_v15 = vpack.c.bf16 %v669_v13, %v620_v11 }
 0x12f   : > { %833 = vst [vmem:[#allocation2 + $0x58] sm:$0xff] %v801_v14 }
 0x130   : > { %834 = vst [vmem:[#allocation2 + $0x40] sm:$0xff] %v802_v15 }
 0x131   : > { %v717_v16 = vpop.f32.mrf.mxu2 }
 0x132   : > { %v718_v17 = vadd.f32 %v717_v16, %v6444_v48  ;;  %v766_v18 = vpop.f32.mrf.mxu3  ;;  %v622_v19 = vpop.f32.mrf.mxu0 }
 0x133   : > { %v767_v20 = vadd.f32 %v766_v18, %v6446_v49  ;;  %v623_v21 = vadd.f32 %v622_v19, %v6438_v41  ;;  %v671_v22 = vpop.f32.mrf.mxu1 }
 0x134   : > { %v672_v23 = vadd.f32 %v671_v22, %v6440_v42 }
 0x135   : > { %v803_v24 = vpack.c.bf16 %v767_v20, %v718_v17 }
 0x136   : > { %v804_v25 = vpack.c.bf16 %v672_v23, %v623_v21 }
 0x137   : > { %835 = vst [vmem:[#allocation2 + $0xc8] sm:$0xff] %v803_v24 }
 0x138   : > { %836 = vst [vmem:[#allocation2 + $0xe0] sm:$0xff] %v804_v25 }
 0x139   : > { %v720_v26 = vpop.f32.mrf.mxu2 }
 0x13a   : > { %v721_v27 = vadd.f32 %v720_v26, %v6444_v48  ;;  %v769_v28 = vpop.f32.mrf.mxu3  ;;  %v624_v29 = vpop.f32.mrf.mxu0 }
 0x13b   : > { %v770_v30 = vadd.f32 %v769_v28, %v6446_v49  ;;  %v625_v31 = vadd.f32 %v624_v29, %v6438_v41  ;;  %v673_v32 = vpop.f32.mrf.mxu1 }
 0x13c   : > { %v674_v33 = vadd.f32 %v673_v32, %v6440_v42 }
 0x13d   : > { %v805_v34 = vpack.c.bf16 %v770_v30, %v721_v27 }
 0x13e   : > { %v806_v35 = vpack.c.bf16 %v674_v33, %v625_v31 }
 0x13f   : > { %837 = vst [vmem:[#allocation2 + $0x90] sm:$0xff] %v805_v34 }
 0x140   : > { %838 = vst [vmem:[#allocation2 + $0x70] sm:$0xff] %v806_v35 }
 0x141   : > { %v722_v36 = vpop.f32.mrf.mxu2 }
 0x142   : > { %v723_v37 = vadd.f32 %v722_v36, %v6444_v48  ;;  %v771_v38 = vpop.f32.mrf.mxu3  ;;  %v627_v39 = vpop.f32.mrf.mxu0 }
 0x143   : > { %v772_v40 = vadd.f32 %v771_v38, %v6446_v49  ;;  %v628_v43 = vadd.f32 %v627_v39, %v6438_v41  ;;  %v676_v44 = vpop.f32.mrf.mxu1 }
 0x144   : > { %v677_v45 = vadd.f32 %v676_v44, %v6440_v42 }
 0x145   : > { %v807_v46 = vpack.c.bf16 %v772_v40, %v723_v37 }
 0x146   : > { %v808_v47 = vpack.c.bf16 %v677_v45, %v628_v43 }
 0x147   : > { %839 = vst [vmem:[#allocation2 + $0xc0] sm:$0xff] %v807_v46 }
 0x148   : > { %840 = vst [vmem:[#allocation2 + $0xa8] sm:$0xff] %v808_v47 }
 0x149   : > { %v725_v50 = vpop.f32.mrf.mxu2 }
 0x14a   : > { %v726_v51 = vadd.f32 %v725_v50, %v6444_v48  ;;  %v774_v52 = vpop.f32.mrf.mxu3  ;;  %v629_v53 = vpop.f32.mrf.mxu0 }
 0x14b   : > { %v775_v54 = vadd.f32 %v774_v52, %v6446_v49  ;;  %v630_v55 = vadd.f32 %v629_v53, %v6438_v41  ;;  %v678_v56 = vpop.f32.mrf.mxu1 }
 0x14c   : > { %v679_v57 = vadd.f32 %v678_v56, %v6440_v42 }
 0x14d   : > { %v809_v58 = vpack.c.bf16 %v775_v54, %v726_v51 }
 0x14e   : > { %v810_v59 = vpack.c.bf16 %v679_v57, %v630_v55 }
 0x14f   : > { %841 = vst [vmem:[#allocation2 + $0xd0] sm:$0xff] %v809_v58 }
 0x150   : > { %842 = vst [vmem:[#allocation2 + $0x10] sm:$0xff] %v810_v59 }
 0x151   : > { %v727_v60 = vpop.f32.mrf.mxu2 }
 0x152   : > { %v728_v61 = vadd.f32 %v727_v60, %v6444_v48  ;;  %v776_v62 = vpop.f32.mrf.mxu3  ;;  %v632_v63 = vpop.f32.mrf.mxu0 }
 0x153   : > { %v777_v0 = vadd.f32 %v776_v62, %v6446_v49  ;;  %v633_v1 = vadd.f32 %v632_v63, %v6438_v41  ;;  %v681_v2 = vpop.f32.mrf.mxu1 }
 0x154   : > { %v682_v3 = vadd.f32 %v681_v2, %v6440_v42 }
 0x155   : > { %v811_v4 = vpack.c.bf16 %v777_v0, %v728_v61 }
 0x156   : > { %v812_v5 = vpack.c.bf16 %v682_v3, %v633_v1 }
 0x157   : > { %843 = vst [vmem:[#allocation2 + $0x28] sm:$0xff] %v811_v4 }
 0x158   : > { %844 = vst [vmem:[#allocation2 + $0xa0] sm:$0xff] %v812_v5 }
 0x159   : > { %v730_v6 = vpop.f32.mrf.mxu2 }
 0x15a   : > { %v731_v7 = vadd.f32 %v730_v6, %v6444_v48  ;;  %v779_v8 = vpop.f32.mrf.mxu3  ;;  %v634_v9 = vpop.f32.mrf.mxu0 }
 0x15b   : > { %v780_v10 = vadd.f32 %v779_v8, %v6446_v49  ;;  %v635_v11 = vadd.f32 %v634_v9, %v6438_v41  ;;  %v683_v12 = vpop.f32.mrf.mxu1 }
 0x15c   : > { %v684_v13 = vadd.f32 %v683_v12, %v6440_v42 }
 0x15d   : > { %v813_v14 = vpack.c.bf16 %v780_v10, %v731_v7 }
 0x15e   : > { %v814_v15 = vpack.c.bf16 %v684_v13, %v635_v11 }
 0x15f   : > { %845 = vst [vmem:[#allocation2 + $0xf8] sm:$0xff] %v813_v14 }
 0x160   : > { %846 = vst [vmem:[#allocation2 + $0x20] sm:$0xff] %v814_v15 }
 0x161   : > { %v732_v16 = vpop.f32.mrf.mxu2 }
 0x162   : > { %v733_v17 = vadd.f32 %v732_v16, %v6444_v48  ;;  %v781_v18 = vpop.f32.mrf.mxu3 }
 0x163   : > { %v782_v19 = vadd.f32 %v781_v18, %v6446_v49 }
 0x165   : > { %v815_v20 = vpack.c.bf16 %v782_v19, %v733_v17 }
 0x167   : > { %847 = vst [vmem:[#allocation2 + $0x98] sm:$0xff] %v815_v20 }
 0x168 PF: > { %p4271_p7 = scmp.le.s32.totalorder %s6242_s25, 0 }
 0x16a   : > { %851 = sbr.rel (%p4271_p7) target bundleno = 660 (0x294), region = 60 }
 0x16f   : > { %v4418_v41 = vld [vmem:[%s6329_s19 + $0xe0] sm:$0xf]  ;;  %v5571_v42 = vld [vmem:[%s6329_s19 + $0xec] sm:$0xf0]  ;;  %v5569_v48 = vld [vmem:[%s6329_s19 + $0xe4] sm:$0xf] }
 0x170   : > { %v4419_v49 = vor.u32 %v5571_v42, %v4418_v41  ;;  %v4420_v21 = vld [vmem:[%s6329_s19 + $0xf0] sm:$0xf0]  ;;  %v4426_v22 = vld [vmem:[%s6329_s19 + $0xe8] sm:$0xf]  ;;  %v5572_v23 = vld [vmem:[%s6329_s19 + $0xf4] sm:$0xf0] }
 0x171   : > { %v4423_v24 = vor.u32 %v5569_v48, %v4420_v21  ;;  %v4427_v25 = vor.u32 %v5572_v23, %v4426_v22  ;;  %v5570_v26 = vld [vmem:[%s6329_s19 + $0xec] sm:$0xf]  ;;  %v4428_v27 = vld [vmem:[%s6329_s19 + $0xf8] sm:$0xf0]  ;;  %v4402_v28 = vld [vmem:[%s6329_s19 + $0xc0] sm:$0xf] }
 0x172   : > { %1118 = vmatpush.bf16.msra.mxu0 %v4419_v49  ;;  %v4431_v29 = vor.u32 %v5570_v26, %v4428_v27  ;;  %v5567_v30 = vld [vmem:[%s6329_s19 + $0xcc] sm:$0xf0]  ;;  %v5565_v31 = vld [vmem:[%s6329_s19 + $0xc4] sm:$0xf]  ;;  %v4404_v32 = vld [vmem:[%s6329_s19 + $0xd0] sm:$0xf0] }
 0x173   : > { %1167 = vmatpush.bf16.msra.mxu1 %v4423_v24  ;;  %1216 = vmatpush.bf16.msra.mxu2 %v4427_v25  ;;  %v4403_v33 = vor.u32 %v5567_v30, %v4402_v28  ;;  %v4407_v34 = vor.u32 %v5565_v31, %v4404_v32  ;;  %v4410_v35 = vld [vmem:[%s6329_s19 + $0xc8] sm:$0xf]  ;;  %v5568_v36 = vld [vmem:[%s6329_s19 + $0xd4] sm:$0xf0]  ;;  %v5566_v37 = vld [vmem:[%s6329_s19 + $0xcc] sm:$0xf] }
 0x174   : > { %1265 = vmatpush.bf16.msra.mxu3 %v4431_v29  ;;  %v4411_v38 = vor.u32 %v5568_v36, %v4410_v35  ;;  %v4412_v39 = vld [vmem:[%s6329_s19 + $0xd8] sm:$0xf0]  ;;  %v4386_v40 = vld [vmem:[%s6329_s19 + $0xa0] sm:$0xf]  ;;  %v5563_v43 = vld [vmem:[%s6329_s19 + $0xac] sm:$0xf0] }
 0x175   : > { %v4415_v44 = vor.u32 %v5566_v37, %v4412_v39  ;;  %v5561_v45 = vld [vmem:[%s6329_s19 + $0xa4] sm:$0xf]  ;;  %v4388_v46 = vld [vmem:[%s6329_s19 + $0xb0] sm:$0xf0]  ;;  %v4394_v47 = vld [vmem:[%s6329_s19 + $0xa8] sm:$0xf]  ;;  %v4387_v50 = vor.u32 %v5563_v43, %v4386_v40 }
 0x176   : > { %1119 = vmatpush.bf16.msra.mxu0 %v4403_v33  ;;  %v5564_v51 = vld [vmem:[%s6329_s19 + $0xb4] sm:$0xf0]  ;;  %v5562_v52 = vld [vmem:[%s6329_s19 + $0xac] sm:$0xf]  ;;  %v4396_v53 = vld [vmem:[%s6329_s19 + $0xb8] sm:$0xf0]  ;;  %v4391_v54 = vor.u32 %v5561_v45, %v4388_v46 }
 0x177   : > { %1168 = vmatpush.bf16.msra.mxu1 %v4407_v34  ;;  %1217 = vmatpush.bf16.msra.mxu2 %v4411_v38  ;;  %v4395_v55 = vor.u32 %v5564_v51, %v4394_v47  ;;  %v4370_v56 = vld [vmem:[%s6329_s19 + $0x80] sm:$0xf]  ;;  %v5559_v57 = vld [vmem:[%s6329_s19 + $0x8c] sm:$0xf0]  ;;  %v5557_v58 = vld [vmem:[%s6329_s19 + $0x84] sm:$0xf]  ;;  %v4399_v59 = vor.u32 %v5562_v52, %v4396_v53 }
 0x178   : > { %1266 = vmatpush.bf16.msra.mxu3 %v4415_v44  ;;  %v4372_v60 = vld [vmem:[%s6329_s19 + $0x90] sm:$0xf0]  ;;  %v4378_v61 = vld [vmem:[%s6329_s19 + $0x88] sm:$0xf]  ;;  %v5560_v62 = vld [vmem:[%s6329_s19 + $0x94] sm:$0xf0]  ;;  %v4371_v1 = vor.u32 %v5559_v57, %v4370_v56 }
 0x179   : > { %v5558_v63 = vld [vmem:[%s6329_s19 + $0x8c] sm:$0xf]  ;;  %v4380_v0 = vld [vmem:[%s6329_s19 + $0x98] sm:$0xf0]  ;;  %v4375_v2 = vor.u32 %v5557_v58, %v4372_v60  ;;  %v4379_v3 = vor.u32 %v5560_v62, %v4378_v61  ;;  %v4354_v4 = vld [vmem:[%s6329_s19 + $0x60] sm:$0xf] }
 0x17a   : > { %1120 = vmatpush.bf16.msra.mxu0 %v4387_v50  ;;  %v5555_v5 = vld [vmem:[%s6329_s19 + $0x6c] sm:$0xf0]  ;;  %v5553_v6 = vld [vmem:[%s6329_s19 + $0x64] sm:$0xf]  ;;  %v4383_v7 = vor.u32 %v5558_v63, %v4380_v0  ;;  %v4356_v8 = vld [vmem:[%s6329_s19 + $0x70] sm:$0xf0] }
 0x17b   : > { %1169 = vmatpush.bf16.msra.mxu1 %v4391_v54  ;;  %1218 = vmatpush.bf16.msra.mxu2 %v4395_v55  ;;  %v4362_v9 = vld [vmem:[%s6329_s19 + $0x68] sm:$0xf]  ;;  %v5556_v10 = vld [vmem:[%s6329_s19 + $0x74] sm:$0xf0]  ;;  %v5554_v11 = vld [vmem:[%s6329_s19 + $0x6c] sm:$0xf]  ;;  %v4355_v13 = vor.u32 %v5555_v5, %v4354_v4  ;;  %v4359_v14 = vor.u32 %v5553_v6, %v4356_v8 }
 0x17c   : > { %1267 = vmatpush.bf16.msra.mxu3 %v4399_v59  ;;  %v4364_v12 = vld [vmem:[%s6329_s19 + $0x78] sm:$0xf0]  ;;  %v4363_v15 = vor.u32 %v5556_v10, %v4362_v9  ;;  %v4338_v16 = vld [vmem:[%s6329_s19 + $0x40] sm:$0xf]  ;;  %v5551_v17 = vld [vmem:[%s6329_s19 + $0x4c] sm:$0xf0] }
 0x17d   : > { %v5549_v18 = vld [vmem:[%s6329_s19 + $0x44] sm:$0xf]  ;;  %v4367_v19 = vor.u32 %v5554_v11, %v4364_v12  ;;  %v4340_v20 = vld [vmem:[%s6329_s19 + $0x50] sm:$0xf0]  ;;  %v4346_v41 = vld [vmem:[%s6329_s19 + $0x48] sm:$0xf]  ;;  %v4339_v21 = vor.u32 %v5551_v17, %v4338_v16 }
 0x17e   : > { %1121 = vmatpush.bf16.msra.mxu0 %v4371_v1  ;;  %v5552_v42 = vld [vmem:[%s6329_s19 + $0x54] sm:$0xf0]  ;;  %v5550_v48 = vld [vmem:[%s6329_s19 + $0x4c] sm:$0xf]  ;;  %v4348_v49 = vld [vmem:[%s6329_s19 + $0x58] sm:$0xf0]  ;;  %v4343_v22 = vor.u32 %v5549_v18, %v4340_v20 }
 0x17f   : > { %1170 = vmatpush.bf16.msra.mxu1 %v4375_v2  ;;  %1219 = vmatpush.bf16.msra.mxu2 %v4379_v3  ;;  %v4347_v23 = vor.u32 %v5552_v42, %v4346_v41  ;;  %v4322_v24 = vld [vmem:[%s6329_s19 + $0x20] sm:$0xf]  ;;  %v5547_v25 = vld [vmem:[%s6329_s19 + $0x2c] sm:$0xf0]  ;;  %v5545_v26 = vld [vmem:[%s6329_s19 + $0x24] sm:$0xf]  ;;  %v4351_v27 = vor.u32 %v5550_v48, %v4348_v49 }
 0x180   : > { %1268 = vmatpush.bf16.msra.mxu3 %v4383_v7  ;;  %v4324_v28 = vld [vmem:[%s6329_s19 + $0x30] sm:$0xf0]  ;;  %v4330_v29 = vld [vmem:[%s6329_s19 + $0x28] sm:$0xf]  ;;  %v5548_v30 = vld [vmem:[%s6329_s19 + $0x34] sm:$0xf0]  ;;  %v4323_v33 = vor.u32 %v5547_v25, %v4322_v24 }
 0x181   : > { %v5546_v31 = vld [vmem:[%s6329_s19 + $0x2c] sm:$0xf]  ;;  %v4332_v32 = vld [vmem:[%s6329_s19 + $0x38] sm:$0xf0]  ;;  %v4327_v34 = vor.u32 %v5545_v26, %v4324_v28  ;;  %v4331_v35 = vor.u32 %v5548_v30, %v4330_v29  ;;  %v4306_v36 = vld [vmem:[%s6329_s19] sm:$0xf] }
 0x182   : > { %1122 = vmatpush.bf16.msra.mxu0 %v4355_v13  ;;  %v5543_v37 = vld [vmem:[%s6329_s19 + $0xc] sm:$0xf0]  ;;  %v5541_v38 = vld [vmem:[%s6329_s19 + $0x4] sm:$0xf]  ;;  %v4335_v39 = vor.u32 %v5546_v31, %v4332_v32  ;;  %v4308_v40 = vld [vmem:[%s6329_s19 + $0x10] sm:$0xf0] }
 0x183   : > { %1171 = vmatpush.bf16.msra.mxu1 %v4359_v14  ;;  %1220 = vmatpush.bf16.msra.mxu2 %v4363_v15  ;;  %v4314_v43 = vld [vmem:[%s6329_s19 + $0x8] sm:$0xf]  ;;  %v5544_v44 = vld [vmem:[%s6329_s19 + $0x14] sm:$0xf0]  ;;  %v5542_v45 = vld [vmem:[%s6329_s19 + $0xc] sm:$0xf]  ;;  %v4307_v47 = vor.u32 %v5543_v37, %v4306_v36  ;;  %v4311_v50 = vor.u32 %v5541_v38, %v4308_v40 }
 0x184   : > { %1269 = vmatpush.bf16.msra.mxu3 %v4367_v19  ;;  %v4316_v46 = vld [vmem:[%s6329_s19 + $0x18] sm:$0xf0]  ;;  %v4315_v51 = vor.u32 %v5544_v44, %v4314_v43  ;;  %v5533_v53 = vld [vmem:[#allocation5] sm:$0xff]  ;;  %v5535_v55 = vld [vmem:[#allocation5 + $0x30] sm:$0xff] }
 0x185   : > { %v4319_v52 = vor.u32 %v5542_v45, %v4316_v46  ;;  %v5534_v54 = vld [vmem:[#allocation5 + $0x20] sm:$0xff]  ;;  %v5536_v56 = vld [vmem:[#allocation5 + $0x28] sm:$0xff]  ;;  %v5537_v57 = vld [vmem:[#allocation5 + $0x18] sm:$0xff] }
 0x186   : > { %1123 = vmatpush.bf16.msra.mxu0 %v4339_v21  ;;  %v5538_v58 = vld [vmem:[#allocation5 + $0x8] sm:$0xff]  ;;  %v5539_v59 = vld [vmem:[#allocation5 + $0x10] sm:$0xff]  ;;  %v5540_v60 = vld [vmem:[#allocation5 + $0x38] sm:$0xff] }
 0x187   : > { %1172 = vmatpush.bf16.msra.mxu1 %v4343_v22  ;;  %1221 = vmatpush.bf16.msra.mxu2 %v4347_v23  ;;  %v900_v61 = vld [vmem:[%s6346_s27] sm:$0xf] }
 0x188   : > { %1270 = vmatpush.bf16.msra.mxu3 %v4351_v27  ;;  %v6576_v62 = vperm.slane %v900_v61, 0  ;;  %v6578_v63 = vperm.slane %v900_v61, 1  ;;  %v6582_v5 = vperm.slane %v900_v61, 2  ;;  %v6584_v6 = vperm.slane %v900_v61, 3 }
 0x18a   : > { %1124 = vmatpush.bf16.msra.mxu0 %v4323_v33 }
 0x18b   : > { %1173 = vmatpush.bf16.msra.mxu1 %v4327_v34  ;;  %1222 = vmatpush.bf16.msra.mxu2 %v4331_v35 }
 0x18c   : > { %1271 = vmatpush.bf16.msra.mxu3 %v4335_v39 }
 0x18e   : > { %1125 = vmatpush.bf16.msra.mxu0 %v4307_v47 }
 0x18f   : > { %1174 = vmatpush.bf16.msra.mxu1 %v4311_v50  ;;  %1223 = vmatpush.bf16.msra.mxu2 %v4315_v51 }
 0x190   : > { %1272 = vmatpush.bf16.msra.mxu3 %v4319_v52 }
 0x191   : > { %1126 = vmatmul.bf16.vlgmr.msra.gmra.mxu0 %v5533_v53 }
 0x192   : > { %1175 = vmatmul.bf16.vlgmr.msra.gmra.mxu1 %v5533_v53  ;;  %1224 = vmatmul.bf16.vlgmr.msra.gmra.mxu2 %v5533_v53 }
 0x193   : > { %1273 = vmatmul.bf16.vlgmr.msra.gmra.mxu3 %v5533_v53 }
 0x1a1   : > { %1131 = vmatmul.bf16.gmra.mxu0 %v5534_v54 }
 0x1a2   : > { %1180 = vmatmul.bf16.gmra.mxu1 %v5534_v54  ;;  %1229 = vmatmul.bf16.gmra.mxu2 %v5534_v54 }
 0x1a3   : > { %1278 = vmatmul.bf16.gmra.mxu3 %v5534_v54 }
 0x1b1   : > { %1136 = vmatmul.bf16.gmra.mxu0 %v5535_v55 }
 0x1b2   : > { %1185 = vmatmul.bf16.gmra.mxu1 %v5535_v55  ;;  %1234 = vmatmul.bf16.gmra.mxu2 %v5535_v55 }
 0x1b3   : > { %1283 = vmatmul.bf16.gmra.mxu3 %v5535_v55 }
 0x1c1   : > { %1141 = vmatmul.bf16.gmra.mxu0 %v5536_v56 }
 0x1c2   : > { %1190 = vmatmul.bf16.gmra.mxu1 %v5536_v56  ;;  %1239 = vmatmul.bf16.gmra.mxu2 %v5536_v56 }
 0x1c3   : > { %1288 = vmatmul.bf16.gmra.mxu3 %v5536_v56 }
 0x1d1   : > { %1146 = vmatmul.bf16.gmra.mxu0 %v5537_v57 }
 0x1d2   : > { %1195 = vmatmul.bf16.gmra.mxu1 %v5537_v57  ;;  %1244 = vmatmul.bf16.gmra.mxu2 %v5537_v57 }
 0x1d3   : > { %1293 = vmatmul.bf16.gmra.mxu3 %v5537_v57 }
 0x1e1   : > { %1151 = vmatmul.bf16.gmra.mxu0 %v5538_v58 }
 0x1e2   : > { %1200 = vmatmul.bf16.gmra.mxu1 %v5538_v58  ;;  %1249 = vmatmul.bf16.gmra.mxu2 %v5538_v58 }
 0x1e3   : > { %1298 = vmatmul.bf16.gmra.mxu3 %v5538_v58 }
 0x1f1   : > { %1156 = vmatmul.bf16.gmra.mxu0 %v5539_v59 }
 0x1f2   : > { %1205 = vmatmul.bf16.gmra.mxu1 %v5539_v59  ;;  %1254 = vmatmul.bf16.gmra.mxu2 %v5539_v59 }
 0x1f3   : > { %1303 = vmatmul.bf16.gmra.mxu3 %v5539_v59 }
 0x201   : > { %1161 = vmatmul.bf16.gmra.mxu0 %v5540_v60 }
 0x202   : > { %1210 = vmatmul.bf16.gmra.mxu1 %v5540_v60  ;;  %1259 = vmatmul.bf16.gmra.mxu2 %v5540_v60 }
 0x203   : > { %1308 = vmatmul.bf16.gmra.mxu3 %v5540_v60 }
 0x20e   : > { %v1127_v0 = vpop.f32.mrf.mxu0 }
 0x20f   : > { %v1128_v1 = vadd.f32 %v1127_v0, %v6576_v62  ;;  %v1176_v2 = vpop.f32.mrf.mxu1 }
 0x210   : > { %v1177_v3 = vadd.f32 %v1176_v2, %v6578_v63 }
 0x212   : > { %v1314_v4 = vpack.c.bf16 %v1177_v3, %v1128_v1 }
 0x214   : > { %1346 = vst [vmem:[#allocation2 + $0xb0] sm:$0xff] %v1314_v4 }
 0x215   : > { %v1225_v7 = vpop.f32.mrf.mxu2 }
 0x216   : > { %v1226_v8 = vadd.f32 %v1225_v7, %v6582_v5  ;;  %v1274_v9 = vpop.f32.mrf.mxu3  ;;  %v1129_v10 = vpop.f32.mrf.mxu0 }
 0x217   : > { %v1275_v11 = vadd.f32 %v1274_v9, %v6584_v6  ;;  %v1130_v12 = vadd.f32 %v1129_v10, %v6576_v62  ;;  %v1178_v13 = vpop.f32.mrf.mxu1 }
 0x218   : > { %v1179_v14 = vadd.f32 %v1178_v13, %v6578_v63 }
 0x219   : > { %v1315_v15 = vpack.c.bf16 %v1275_v11, %v1226_v8 }
 0x21a   : > { %v1316_v16 = vpack.c.bf16 %v1179_v14, %v1130_v12 }
 0x21b   : > { %1347 = vst [vmem:[#allocation2] sm:$0xff] %v1315_v15 }
 0x21c   : > { %1348 = vst [vmem:[#allocation2 + $0xd8] sm:$0xff] %v1316_v16 }
 0x21d   : > { %v1227_v17 = vpop.f32.mrf.mxu2 }
 0x21e   : > { %v1228_v18 = vadd.f32 %v1227_v17, %v6582_v5  ;;  %v1276_v19 = vpop.f32.mrf.mxu3  ;;  %v1132_v20 = vpop.f32.mrf.mxu0 }
 0x21f   : > { %v1277_v41 = vadd.f32 %v1276_v19, %v6584_v6  ;;  %v1133_v42 = vadd.f32 %v1132_v20, %v6576_v62  ;;  %v1181_v48 = vpop.f32.mrf.mxu1 }
 0x220   : > { %v1182_v49 = vadd.f32 %v1181_v48, %v6578_v63 }
 0x221   : > { %v1317_v21 = vpack.c.bf16 %v1277_v41, %v1228_v18 }
 0x222   : > { %v1318_v22 = vpack.c.bf16 %v1182_v49, %v1133_v42 }
 0x223   : > { %1349 = vst [vmem:[#allocation2 + $0x18] sm:$0xff] %v1317_v21 }
 0x224   : > { %1350 = vst [vmem:[#allocation2 + $0x50] sm:$0xff] %v1318_v22 }
 0x225   : > { %v1230_v23 = vpop.f32.mrf.mxu2 }
 0x226   : > { %v1231_v24 = vadd.f32 %v1230_v23, %v6582_v5  ;;  %v1279_v25 = vpop.f32.mrf.mxu3  ;;  %v1134_v26 = vpop.f32.mrf.mxu0 }
 0x227   : > { %v1280_v27 = vadd.f32 %v1279_v25, %v6584_v6  ;;  %v1135_v28 = vadd.f32 %v1134_v26, %v6576_v62  ;;  %v1183_v29 = vpop.f32.mrf.mxu1 }
 0x228   : > { %v1184_v30 = vadd.f32 %v1183_v29, %v6578_v63 }
 0x229   : > { %v1319_v31 = vpack.c.bf16 %v1280_v27, %v1231_v24 }
 0x22a   : > { %v1320_v32 = vpack.c.bf16 %v1184_v30, %v1135_v28 }
 0x22b   : > { %1351 = vst [vmem:[#allocation2 + $0x68] sm:$0xff] %v1319_v31 }
 0x22c   : > { %1352 = vst [vmem:[#allocation2 + $0x30] sm:$0xff] %v1320_v32 }
 0x22d   : > { %v1232_v33 = vpop.f32.mrf.mxu2 }
 0x22e   : > { %v1233_v34 = vadd.f32 %v1232_v33, %v6582_v5  ;;  %v1281_v35 = vpop.f32.mrf.mxu3  ;;  %v1137_v36 = vpop.f32.mrf.mxu0 }
 0x22f   : > { %v1282_v37 = vadd.f32 %v1281_v35, %v6584_v6  ;;  %v1138_v38 = vadd.f32 %v1137_v36, %v6576_v62  ;;  %v1186_v39 = vpop.f32.mrf.mxu1 }
 0x230   : > { %v1187_v40 = vadd.f32 %v1186_v39, %v6578_v63 }
 0x231   : > { %v1321_v43 = vpack.c.bf16 %v1282_v37, %v1233_v34 }
 0x232   : > { %v1322_v44 = vpack.c.bf16 %v1187_v40, %v1138_v38 }
 0x233   : > { %1353 = vst [vmem:[#allocation2 + $0x48] sm:$0xff] %v1321_v43 }
 0x234   : > { %1354 = vst [vmem:[#allocation2 + $0x80] sm:$0xff] %v1322_v44 }
 0x235   : > { %v1235_v45 = vpop.f32.mrf.mxu2 }
 0x236   : > { %v1236_v46 = vadd.f32 %v1235_v45, %v6582_v5  ;;  %v1284_v47 = vpop.f32.mrf.mxu3  ;;  %v1139_v50 = vpop.f32.mrf.mxu0 }
 0x237   : > { %v1285_v51 = vadd.f32 %v1284_v47, %v6584_v6  ;;  %v1140_v52 = vadd.f32 %v1139_v50, %v6576_v62  ;;  %v1188_v53 = vpop.f32.mrf.mxu1 }
 0x238   : > { %v1189_v54 = vadd.f32 %v1188_v53, %v6578_v63 }
 0x239   : > { %v1323_v55 = vpack.c.bf16 %v1285_v51, %v1236_v46 }
 0x23a   : > { %v1324_v56 = vpack.c.bf16 %v1189_v54, %v1140_v52 }
 0x23b   : > { %1355 = vst [vmem:[#allocation2 + $0x88] sm:$0xff] %v1323_v55 }
 0x23c   : > { %1356 = vst [vmem:[#allocation2 + $0xe8] sm:$0xff] %v1324_v56 }
 0x23d   : > { %v1237_v57 = vpop.f32.mrf.mxu2 }
 0x23e   : > { %v1238_v58 = vadd.f32 %v1237_v57, %v6582_v5  ;;  %v1286_v59 = vpop.f32.mrf.mxu3  ;;  %v1142_v60 = vpop.f32.mrf.mxu0 }
 0x23f   : > { %v1287_v61 = vadd.f32 %v1286_v59, %v6584_v6  ;;  %v1143_v0 = vadd.f32 %v1142_v60, %v6576_v62  ;;  %v1191_v1 = vpop.f32.mrf.mxu1 }
 0x240   : > { %v1192_v2 = vadd.f32 %v1191_v1, %v6578_v63 }
 0x241   : > { %v1325_v3 = vpack.c.bf16 %v1287_v61, %v1238_v58 }
 0x242   : > { %v1326_v4 = vpack.c.bf16 %v1192_v2, %v1143_v0 }
 0x243   : > { %1357 = vst [vmem:[#allocation2 + $0xb8] sm:$0xff] %v1325_v3 }
 0x244   : > { %1358 = vst [vmem:[#allocation2 + $0x60] sm:$0xff] %v1326_v4 }
 0x245   : > { %v1240_v7 = vpop.f32.mrf.mxu2 }
 0x246   : > { %v1241_v8 = vadd.f32 %v1240_v7, %v6582_v5  ;;  %v1289_v9 = vpop.f32.mrf.mxu3  ;;  %v1144_v10 = vpop.f32.mrf.mxu0 }
 0x247   : > { %v1290_v11 = vadd.f32 %v1289_v9, %v6584_v6  ;;  %v1145_v12 = vadd.f32 %v1144_v10, %v6576_v62  ;;  %v1193_v13 = vpop.f32.mrf.mxu1 }
 0x248   : > { %v1194_v14 = vadd.f32 %v1193_v13, %v6578_v63 }
 0x249   : > { %v1327_v15 = vpack.c.bf16 %v1290_v11, %v1241_v8 }
 0x24a   : > { %v1328_v16 = vpack.c.bf16 %v1194_v14, %v1145_v12 }
 0x24b   : > { %1359 = vst [vmem:[#allocation2 + $0xf0] sm:$0xff] %v1327_v15 }
 0x24c   : > { %1360 = vst [vmem:[#allocation2 + $0x8] sm:$0xff] %v1328_v16 }
 0x24d   : > { %v1242_v17 = vpop.f32.mrf.mxu2 }
 0x24e   : > { %v1243_v18 = vadd.f32 %v1242_v17, %v6582_v5  ;;  %v1291_v19 = vpop.f32.mrf.mxu3  ;;  %v1147_v20 = vpop.f32.mrf.mxu0 }
 0x24f   : > { %v1292_v41 = vadd.f32 %v1291_v19, %v6584_v6  ;;  %v1148_v42 = vadd.f32 %v1147_v20, %v6576_v62  ;;  %v1196_v48 = vpop.f32.mrf.mxu1 }
 0x250   : > { %v1197_v49 = vadd.f32 %v1196_v48, %v6578_v63 }
 0x251   : > { %v1329_v21 = vpack.c.bf16 %v1292_v41, %v1243_v18 }
 0x252   : > { %v1330_v22 = vpack.c.bf16 %v1197_v49, %v1148_v42 }
 0x253   : > { %1361 = vst [vmem:[#allocation2 + $0x78] sm:$0xff] %v1329_v21 }
 0x254   : > { %1362 = vst [vmem:[#allocation2 + $0x38] sm:$0xff] %v1330_v22 }
 0x255   : > { %v1245_v23 = vpop.f32.mrf.mxu2 }
 0x256   : > { %v1246_v24 = vadd.f32 %v1245_v23, %v6582_v5  ;;  %v1294_v25 = vpop.f32.mrf.mxu3  ;;  %v1149_v26 = vpop.f32.mrf.mxu0 }
 0x257   : > { %v1295_v27 = vadd.f32 %v1294_v25, %v6584_v6  ;;  %v1150_v28 = vadd.f32 %v1149_v26, %v6576_v62  ;;  %v1198_v29 = vpop.f32.mrf.mxu1 }
 0x258   : > { %v1199_v30 = vadd.f32 %v1198_v29, %v6578_v63 }
 0x259   : > { %v1331_v31 = vpack.c.bf16 %v1295_v27, %v1246_v24 }
 0x25a   : > { %v1332_v32 = vpack.c.bf16 %v1199_v30, %v1150_v28 }
 0x25b   : > { %1363 = vst [vmem:[#allocation2 + $0x58] sm:$0xff] %v1331_v31 }
 0x25c   : > { %1364 = vst [vmem:[#allocation2 + $0x40] sm:$0xff] %v1332_v32 }
 0x25d   : > { %v1247_v33 = vpop.f32.mrf.mxu2 }
 0x25e   : > { %v1248_v34 = vadd.f32 %v1247_v33, %v6582_v5  ;;  %v1296_v35 = vpop.f32.mrf.mxu3  ;;  %v1152_v36 = vpop.f32.mrf.mxu0 }
 0x25f   : > { %v1297_v37 = vadd.f32 %v1296_v35, %v6584_v6  ;;  %v1153_v38 = vadd.f32 %v1152_v36, %v6576_v62  ;;  %v1201_v39 = vpop.f32.mrf.mxu1 }
 0x260   : > { %v1202_v40 = vadd.f32 %v1201_v39, %v6578_v63 }
 0x261   : > { %v1333_v43 = vpack.c.bf16 %v1297_v37, %v1248_v34 }
 0x262   : > { %v1334_v44 = vpack.c.bf16 %v1202_v40, %v1153_v38 }
 0x263   : > { %1365 = vst [vmem:[#allocation2 + $0xc8] sm:$0xff] %v1333_v43 }
 0x264   : > { %1366 = vst [vmem:[#allocation2 + $0xe0] sm:$0xff] %v1334_v44 }
 0x265   : > { %v1250_v45 = vpop.f32.mrf.mxu2 }
 0x266   : > { %v1251_v46 = vadd.f32 %v1250_v45, %v6582_v5  ;;  %v1299_v47 = vpop.f32.mrf.mxu3  ;;  %v1154_v50 = vpop.f32.mrf.mxu0 }
 0x267   : > { %v1300_v51 = vadd.f32 %v1299_v47, %v6584_v6  ;;  %v1155_v52 = vadd.f32 %v1154_v50, %v6576_v62  ;;  %v1203_v53 = vpop.f32.mrf.mxu1 }
 0x268   : > { %v1204_v54 = vadd.f32 %v1203_v53, %v6578_v63 }
 0x269   : > { %v1335_v55 = vpack.c.bf16 %v1300_v51, %v1251_v46 }
 0x26a   : > { %v1336_v56 = vpack.c.bf16 %v1204_v54, %v1155_v52 }
 0x26b   : > { %1367 = vst [vmem:[#allocation2 + $0x90] sm:$0xff] %v1335_v55 }
 0x26c   : > { %1368 = vst [vmem:[#allocation2 + $0x70] sm:$0xff] %v1336_v56 }
 0x26d   : > { %v1252_v57 = vpop.f32.mrf.mxu2 }
 0x26e   : > { %v1253_v58 = vadd.f32 %v1252_v57, %v6582_v5  ;;  %v1301_v59 = vpop.f32.mrf.mxu3  ;;  %v1157_v60 = vpop.f32.mrf.mxu0 }
 0x26f   : > { %v1302_v61 = vadd.f32 %v1301_v59, %v6584_v6  ;;  %v1158_v0 = vadd.f32 %v1157_v60, %v6576_v62  ;;  %v1206_v1 = vpop.f32.mrf.mxu1 }
 0x270   : > { %v1207_v2 = vadd.f32 %v1206_v1, %v6578_v63 }
 0x271   : > { %v1337_v3 = vpack.c.bf16 %v1302_v61, %v1253_v58 }
 0x272   : > { %v1338_v4 = vpack.c.bf16 %v1207_v2, %v1158_v0 }
 0x273   : > { %1369 = vst [vmem:[#allocation2 + $0xc0] sm:$0xff] %v1337_v3 }
 0x274   : > { %1370 = vst [vmem:[#allocation2 + $0xa8] sm:$0xff] %v1338_v4 }
 0x275   : > { %v1255_v7 = vpop.f32.mrf.mxu2 }
 0x276   : > { %v1256_v8 = vadd.f32 %v1255_v7, %v6582_v5  ;;  %v1304_v9 = vpop.f32.mrf.mxu3  ;;  %v1159_v10 = vpop.f32.mrf.mxu0 }
 0x277   : > { %v1305_v11 = vadd.f32 %v1304_v9, %v6584_v6  ;;  %v1160_v12 = vadd.f32 %v1159_v10, %v6576_v62  ;;  %v1208_v13 = vpop.f32.mrf.mxu1 }
 0x278   : > { %v1209_v14 = vadd.f32 %v1208_v13, %v6578_v63 }
 0x279   : > { %v1339_v15 = vpack.c.bf16 %v1305_v11, %v1256_v8 }
 0x27a   : > { %v1340_v16 = vpack.c.bf16 %v1209_v14, %v1160_v12 }
 0x27b   : > { %1371 = vst [vmem:[#allocation2 + $0xd0] sm:$0xff] %v1339_v15 }
 0x27c   : > { %1372 = vst [vmem:[#allocation2 + $0x10] sm:$0xff] %v1340_v16 }
 0x27d   : > { %v1257_v17 = vpop.f32.mrf.mxu2 }
 0x27e   : > { %v1258_v18 = vadd.f32 %v1257_v17, %v6582_v5  ;;  %v1306_v19 = vpop.f32.mrf.mxu3  ;;  %v1162_v20 = vpop.f32.mrf.mxu0 }
 0x27f   : > { %v1307_v41 = vadd.f32 %v1306_v19, %v6584_v6  ;;  %v1163_v42 = vadd.f32 %v1162_v20, %v6576_v62  ;;  %v1211_v48 = vpop.f32.mrf.mxu1 }
 0x280   : > { %v1212_v49 = vadd.f32 %v1211_v48, %v6578_v63 }
 0x281   : > { %v1341_v21 = vpack.c.bf16 %v1307_v41, %v1258_v18 }
 0x282   : > { %v1342_v22 = vpack.c.bf16 %v1212_v49, %v1163_v42 }
 0x283   : > { %1373 = vst [vmem:[#allocation2 + $0x28] sm:$0xff] %v1341_v21 }
 0x284   : > { %1374 = vst [vmem:[#allocation2 + $0xa0] sm:$0xff] %v1342_v22 }
 0x285   : > { %v1260_v23 = vpop.f32.mrf.mxu2 }
 0x286   : > { %v1261_v24 = vadd.f32 %v1260_v23, %v6582_v5  ;;  %v1309_v25 = vpop.f32.mrf.mxu3  ;;  %v1164_v26 = vpop.f32.mrf.mxu0 }
 0x287   : > { %v1310_v27 = vadd.f32 %v1309_v25, %v6584_v6  ;;  %v1165_v28 = vadd.f32 %v1164_v26, %v6576_v62  ;;  %v1213_v29 = vpop.f32.mrf.mxu1 }
 0x288   : > { %v1214_v30 = vadd.f32 %v1213_v29, %v6578_v63 }
 0x289   : > { %v1343_v31 = vpack.c.bf16 %v1310_v27, %v1261_v24 }
 0x28a   : > { %v1344_v32 = vpack.c.bf16 %v1214_v30, %v1165_v28 }
 0x28b   : > { %1375 = vst [vmem:[#allocation2 + $0xf8] sm:$0xff] %v1343_v31 }
 0x28c   : > { %1376 = vst [vmem:[#allocation2 + $0x20] sm:$0xff] %v1344_v32 }
 0x28d   : > { %v1262_v33 = vpop.f32.mrf.mxu2 }
 0x28e   : > { %v1263_v34 = vadd.f32 %v1262_v33, %v6582_v5  ;;  %v1311_v35 = vpop.f32.mrf.mxu3 }
 0x28f   : > { %v1312_v36 = vadd.f32 %v1311_v35, %v6584_v6 }
 0x291   : > { %v1345_v37 = vpack.c.bf16 %v1312_v36, %v1263_v34 }
 0x293   : > { %1377 = vst [vmem:[#allocation2 + $0x98] sm:$0xff] %v1345_v37 }
 0x294 PF: > { %v4546_v62 = vld [vmem:[%s6335_s28 + $0xe0] sm:$0xf]  ;;  %v5603_v63 = vld [vmem:[%s6335_s28 + $0xec] sm:$0xf0]  ;;  %v5601_v5 = vld [vmem:[%s6335_s28 + $0xe4] sm:$0xf] }
 0x295   : > { %v4547_v38 = vor.u32 %v5603_v63, %v4546_v62  ;;  %v4548_v6 = vld [vmem:[%s6335_s28 + $0xf0] sm:$0xf0]  ;;  %v4554_v39 = vld [vmem:[%s6335_s28 + $0xe8] sm:$0xf]  ;;  %v5604_v40 = vld [vmem:[%s6335_s28 + $0xf4] sm:$0xf0] }
 0x296   : > { %v4551_v43 = vor.u32 %v5601_v5, %v4548_v6  ;;  %v4555_v44 = vor.u32 %v5604_v40, %v4554_v39  ;;  %v5602_v45 = vld [vmem:[%s6335_s28 + $0xec] sm:$0xf]  ;;  %v4556_v46 = vld [vmem:[%s6335_s28 + $0xf8] sm:$0xf0]  ;;  %v4530_v47 = vld [vmem:[%s6335_s28 + $0xc0] sm:$0xf] }
 0x297   : > { %1589 = vmatpush.bf16.msra.mxu0 %v4547_v38  ;;  %v4559_v50 = vor.u32 %v5602_v45, %v4556_v46  ;;  %v5599_v51 = vld [vmem:[%s6335_s28 + $0xcc] sm:$0xf0]  ;;  %v5597_v52 = vld [vmem:[%s6335_s28 + $0xc4] sm:$0xf]  ;;  %v4532_v53 = vld [vmem:[%s6335_s28 + $0xd0] sm:$0xf0] }
 0x298   : > { %1603 = vmatpush.bf16.msra.mxu1 %v4551_v43  ;;  %1617 = vmatpush.bf16.msra.mxu2 %v4555_v44  ;;  %v4531_v54 = vor.u32 %v5599_v51, %v4530_v47  ;;  %v4535_v55 = vor.u32 %v5597_v52, %v4532_v53  ;;  %v4538_v56 = vld [vmem:[%s6335_s28 + $0xc8] sm:$0xf]  ;;  %v5600_v57 = vld [vmem:[%s6335_s28 + $0xd4] sm:$0xf0]  ;;  %v5598_v58 = vld [vmem:[%s6335_s28 + $0xcc] sm:$0xf] }
 0x299   : > { %1631 = vmatpush.bf16.msra.mxu3 %v4559_v50  ;;  %v4539_v59 = vor.u32 %v5600_v57, %v4538_v56  ;;  %v4540_v60 = vld [vmem:[%s6335_s28 + $0xd8] sm:$0xf0]  ;;  %v4514_v61 = vld [vmem:[%s6335_s28 + $0xa0] sm:$0xf]  ;;  %v5595_v0 = vld [vmem:[%s6335_s28 + $0xac] sm:$0xf0] }
 0x29a   : > { %v4543_v1 = vor.u32 %v5598_v58, %v4540_v60  ;;  %v5593_v2 = vld [vmem:[%s6335_s28 + $0xa4] sm:$0xf]  ;;  %v4516_v3 = vld [vmem:[%s6335_s28 + $0xb0] sm:$0xf0]  ;;  %v4522_v4 = vld [vmem:[%s6335_s28 + $0xa8] sm:$0xf]  ;;  %v4515_v7 = vor.u32 %v5595_v0, %v4514_v61 }
 0x29b   : > { %1590 = vmatpush.bf16.msra.mxu0 %v4531_v54  ;;  %v5596_v8 = vld [vmem:[%s6335_s28 + $0xb4] sm:$0xf0]  ;;  %v5594_v9 = vld [vmem:[%s6335_s28 + $0xac] sm:$0xf]  ;;  %v4524_v10 = vld [vmem:[%s6335_s28 + $0xb8] sm:$0xf0]  ;;  %v4519_v11 = vor.u32 %v5593_v2, %v4516_v3 }
 0x29c   : > { %1604 = vmatpush.bf16.msra.mxu1 %v4535_v55  ;;  %1618 = vmatpush.bf16.msra.mxu2 %v4539_v59  ;;  %v4523_v12 = vor.u32 %v5596_v8, %v4522_v4  ;;  %v4498_v13 = vld [vmem:[%s6335_s28 + $0x80] sm:$0xf]  ;;  %v5591_v14 = vld [vmem:[%s6335_s28 + $0x8c] sm:$0xf0]  ;;  %v5589_v15 = vld [vmem:[%s6335_s28 + $0x84] sm:$0xf]  ;;  %v4527_v16 = vor.u32 %v5594_v9, %v4524_v10 }
 0x29d   : > { %1632 = vmatpush.bf16.msra.mxu3 %v4543_v1  ;;  %v4500_v17 = vld [vmem:[%s6335_s28 + $0x90] sm:$0xf0]  ;;  %v4506_v18 = vld [vmem:[%s6335_s28 + $0x88] sm:$0xf]  ;;  %v5592_v19 = vld [vmem:[%s6335_s28 + $0x94] sm:$0xf0]  ;;  %v4499_v42 = vor.u32 %v5591_v14, %v4498_v13 }
 0x29e   : > { %v5590_v20 = vld [vmem:[%s6335_s28 + $0x8c] sm:$0xf]  ;;  %v4508_v41 = vld [vmem:[%s6335_s28 + $0x98] sm:$0xf0]  ;;  %v4503_v48 = vor.u32 %v5589_v15, %v4500_v17  ;;  %v4507_v49 = vor.u32 %v5592_v19, %v4506_v18  ;;  %v4482_v21 = vld [vmem:[%s6335_s28 + $0x60] sm:$0xf] }
 0x29f   : > { %1591 = vmatpush.bf16.msra.mxu0 %v4515_v7  ;;  %v5587_v22 = vld [vmem:[%s6335_s28 + $0x6c] sm:$0xf0]  ;;  %v5585_v23 = vld [vmem:[%s6335_s28 + $0x64] sm:$0xf]  ;;  %v4511_v24 = vor.u32 %v5590_v20, %v4508_v41  ;;  %v4484_v25 = vld [vmem:[%s6335_s28 + $0x70] sm:$0xf0] }
 0x2a0   : > { %1605 = vmatpush.bf16.msra.mxu1 %v4519_v11  ;;  %1619 = vmatpush.bf16.msra.mxu2 %v4523_v12  ;;  %v4490_v26 = vld [vmem:[%s6335_s28 + $0x68] sm:$0xf]  ;;  %v5588_v27 = vld [vmem:[%s6335_s28 + $0x74] sm:$0xf0]  ;;  %v5586_v28 = vld [vmem:[%s6335_s28 + $0x6c] sm:$0xf]  ;;  %v4483_v30 = vor.u32 %v5587_v22, %v4482_v21  ;;  %v4487_v31 = vor.u32 %v5585_v23, %v4484_v25 }
 0x2a1   : > { %1633 = vmatpush.bf16.msra.mxu3 %v4527_v16  ;;  %v4492_v29 = vld [vmem:[%s6335_s28 + $0x78] sm:$0xf0]  ;;  %v4491_v32 = vor.u32 %v5588_v27, %v4490_v26  ;;  %v4466_v33 = vld [vmem:[%s6335_s28 + $0x40] sm:$0xf]  ;;  %v5583_v34 = vld [vmem:[%s6335_s28 + $0x4c] sm:$0xf0] }
 0x2a2   : > { %v5581_v35 = vld [vmem:[%s6335_s28 + $0x44] sm:$0xf]  ;;  %v4495_v36 = vor.u32 %v5586_v28, %v4492_v29  ;;  %v4468_v37 = vld [vmem:[%s6335_s28 + $0x50] sm:$0xf0]  ;;  %v4474_v62 = vld [vmem:[%s6335_s28 + $0x48] sm:$0xf]  ;;  %v4467_v6 = vor.u32 %v5583_v34, %v4466_v33 }
 0x2a3   : > { %1592 = vmatpush.bf16.msra.mxu0 %v4499_v42  ;;  %v5584_v63 = vld [vmem:[%s6335_s28 + $0x54] sm:$0xf0]  ;;  %v5582_v5 = vld [vmem:[%s6335_s28 + $0x4c] sm:$0xf]  ;;  %v4476_v38 = vld [vmem:[%s6335_s28 + $0x58] sm:$0xf0]  ;;  %v4471_v39 = vor.u32 %v5581_v35, %v4468_v37 }
 0x2a4   : > { %1606 = vmatpush.bf16.msra.mxu1 %v4503_v48  ;;  %1620 = vmatpush.bf16.msra.mxu2 %v4507_v49  ;;  %v4475_v40 = vor.u32 %v5584_v63, %v4474_v62  ;;  %v4450_v43 = vld [vmem:[%s6335_s28 + $0x20] sm:$0xf]  ;;  %v5579_v44 = vld [vmem:[%s6335_s28 + $0x2c] sm:$0xf0]  ;;  %v5577_v45 = vld [vmem:[%s6335_s28 + $0x24] sm:$0xf]  ;;  %v4479_v46 = vor.u32 %v5582_v5, %v4476_v38 }
 0x2a5   : > { %1634 = vmatpush.bf16.msra.mxu3 %v4511_v24  ;;  %v4452_v47 = vld [vmem:[%s6335_s28 + $0x30] sm:$0xf0]  ;;  %v4458_v50 = vld [vmem:[%s6335_s28 + $0x28] sm:$0xf]  ;;  %v5580_v51 = vld [vmem:[%s6335_s28 + $0x34] sm:$0xf0]  ;;  %v4451_v54 = vor.u32 %v5579_v44, %v4450_v43 }
 0x2a6   : > { %v5578_v52 = vld [vmem:[%s6335_s28 + $0x2c] sm:$0xf]  ;;  %v4460_v53 = vld [vmem:[%s6335_s28 + $0x38] sm:$0xf0]  ;;  %v4455_v55 = vor.u32 %v5577_v45, %v4452_v47  ;;  %v4459_v56 = vor.u32 %v5580_v51, %v4458_v50  ;;  %v4434_v57 = vld [vmem:[%s6335_s28] sm:$0xf] }
 0x2a7   : > { %1593 = vmatpush.bf16.msra.mxu0 %v4483_v30  ;;  %v5575_v58 = vld [vmem:[%s6335_s28 + $0xc] sm:$0xf0]  ;;  %v5573_v59 = vld [vmem:[%s6335_s28 + $0x4] sm:$0xf]  ;;  %v4463_v60 = vor.u32 %v5578_v52, %v4460_v53  ;;  %v4436_v61 = vld [vmem:[%s6335_s28 + $0x10] sm:$0xf0] }
 0x2a8   : > { %1607 = vmatpush.bf16.msra.mxu1 %v4487_v31  ;;  %1621 = vmatpush.bf16.msra.mxu2 %v4491_v32  ;;  %v4442_v0 = vld [vmem:[%s6335_s28 + $0x8] sm:$0xf]  ;;  %v5576_v1 = vld [vmem:[%s6335_s28 + $0x14] sm:$0xf0]  ;;  %v5574_v2 = vld [vmem:[%s6335_s28 + $0xc] sm:$0xf]  ;;  %v4435_v4 = vor.u32 %v5575_v58, %v4434_v57  ;;  %v4439_v7 = vor.u32 %v5573_v59, %v4436_v61 }
 0x2a9   : > { %1635 = vmatpush.bf16.msra.mxu3 %v4495_v36  ;;  %v4444_v3 = vld [vmem:[%s6335_s28 + $0x18] sm:$0xf0]  ;;  %v4443_v8 = vor.u32 %v5576_v1, %v4442_v0  ;;  %v6187_v10 = vmov 0.0|0.0   ;;  %v4674_v11 = vld [vmem:[%s6335_s28 + $0xe0] sm:$0xf]  ;;  %p5456_p2 = scmp.ne.s32.totalorder %s6242_s25, 1 }
 0x2aa   : > { %v4447_v9 = vor.u32 %v5574_v2, %v4444_v3  ;;  %v5635_v12 = vld [vmem:[%s6335_s28 + $0xec] sm:$0xf0]  ;;  %v5633_v14 = vld [vmem:[%s6335_s28 + $0xe4] sm:$0xf]  ;;  %v4676_v15 = vld [vmem:[%s6335_s28 + $0xf0] sm:$0xf0] }
 0x2ab   : > { %1594 = vmatpush.bf16.msra.mxu0 %v4467_v6  ;;  %v4675_v13 = vor.u32 %v5635_v12, %v4674_v11  ;;  %v4682_v16 = vld [vmem:[%s6335_s28 + $0xe8] sm:$0xf]  ;;  %v4679_v17 = vor.u32 %v5633_v14, %v4676_v15  ;;  %v5636_v18 = vld [vmem:[%s6335_s28 + $0xf4] sm:$0xf0]  ;;  %v5634_v19 = vld [vmem:[%s6335_s28 + $0xec] sm:$0xf] }
 0x2ac   : > { %1608 = vmatpush.bf16.msra.mxu1 %v4471_v39  ;;  %1622 = vmatpush.bf16.msra.mxu2 %v4475_v40  ;;  %v4684_v20 = vld [vmem:[%s6335_s28 + $0xf8] sm:$0xf0]  ;;  %v4683_v41 = vor.u32 %v5636_v18, %v4682_v16  ;;  %v4658_v48 = vld [vmem:[%s6335_s28 + $0xc0] sm:$0xf]  ;;  %v5631_v49 = vld [vmem:[%s6335_s28 + $0xcc] sm:$0xf0] }
 0x2ad   : > { %1636 = vmatpush.bf16.msra.mxu3 %v4479_v46  ;;  %v4687_v42 = vor.u32 %v5634_v19, %v4684_v20  ;;  %v5629_v21 = vld [vmem:[%s6335_s28 + $0xc4] sm:$0xf]  ;;  %v4659_v22 = vor.u32 %v5631_v49, %v4658_v48  ;;  %v4660_v23 = vld [vmem:[%s6335_s28 + $0xd0] sm:$0xf0]  ;;  %v4666_v24 = vld [vmem:[%s6335_s28 + $0xc8] sm:$0xf] }
 0x2ae   : > { %v5632_v25 = vld [vmem:[%s6335_s28 + $0xd4] sm:$0xf0]  ;;  %v4663_v26 = vor.u32 %v5629_v21, %v4660_v23  ;;  %v5630_v28 = vld [vmem:[%s6335_s28 + $0xcc] sm:$0xf]  ;;  %v4668_v29 = vld [vmem:[%s6335_s28 + $0xd8] sm:$0xf0] }
 0x2af   : > { %1595 = vmatpush.bf16.msra.mxu0 %v4451_v54  ;;  %v4667_v27 = vor.u32 %v5632_v25, %v4666_v24  ;;  %v4671_v30 = vor.u32 %v5630_v28, %v4668_v29  ;;  %v4642_v31 = vld [vmem:[%s6335_s28 + $0xa0] sm:$0xf]  ;;  %v5627_v32 = vld [vmem:[%s6335_s28 + $0xac] sm:$0xf0]  ;;  %v5625_v33 = vld [vmem:[%s6335_s28 + $0xa4] sm:$0xf] }
 0x2b0   : > { %1609 = vmatpush.bf16.msra.mxu1 %v4455_v55  ;;  %1623 = vmatpush.bf16.msra.mxu2 %v4459_v56  ;;  %v4643_v34 = vor.u32 %v5627_v32, %v4642_v31  ;;  %v4644_v35 = vld [vmem:[%s6335_s28 + $0xb0] sm:$0xf0]  ;;  %v4650_v36 = vld [vmem:[%s6335_s28 + $0xa8] sm:$0xf]  ;;  %v5628_v37 = vld [vmem:[%s6335_s28 + $0xb4] sm:$0xf0] }
 0x2b1   : > { %1637 = vmatpush.bf16.msra.mxu3 %v4463_v60  ;;  %v4647_v62 = vor.u32 %v5625_v33, %v4644_v35  ;;  %v4651_v63 = vor.u32 %v5628_v37, %v4650_v36  ;;  %v5626_v5 = vld [vmem:[%s6335_s28 + $0xac] sm:$0xf]  ;;  %v4652_v38 = vld [vmem:[%s6335_s28 + $0xb8] sm:$0xf0]  ;;  %v4626_v39 = vld [vmem:[%s6335_s28 + $0x80] sm:$0xf] }
 0x2b2   : > { %v4655_v6 = vor.u32 %v5626_v5, %v4652_v38  ;;  %v5623_v40 = vld [vmem:[%s6335_s28 + $0x8c] sm:$0xf0]  ;;  %v5621_v43 = vld [vmem:[%s6335_s28 + $0x84] sm:$0xf]  ;;  %v4628_v45 = vld [vmem:[%s6335_s28 + $0x90] sm:$0xf0] }
 0x2b3   : > { %1596 = vmatpush.bf16.msra.mxu0 %v4435_v4  ;;  %v4627_v44 = vor.u32 %v5623_v40, %v4626_v39  ;;  %v4634_v46 = vld [vmem:[%s6335_s28 + $0x88] sm:$0xf]  ;;  %v5624_v47 = vld [vmem:[%s6335_s28 + $0x94] sm:$0xf0]  ;;  %v4631_v50 = vor.u32 %v5621_v43, %v4628_v45  ;;  %v5622_v52 = vld [vmem:[%s6335_s28 + $0x8c] sm:$0xf] }
 0x2b4   : > { %1610 = vmatpush.bf16.msra.mxu1 %v4439_v7  ;;  %1624 = vmatpush.bf16.msra.mxu2 %v4443_v8  ;;  %v4635_v51 = vor.u32 %v5624_v47, %v4634_v46  ;;  %v4636_v53 = vld [vmem:[%s6335_s28 + $0x98] sm:$0xf0]  ;;  %v4610_v55 = vld [vmem:[%s6335_s28 + $0x60] sm:$0xf]  ;;  %v5619_v56 = vld [vmem:[%s6335_s28 + $0x6c] sm:$0xf0] }
 0x2b5   : > { %1638 = vmatpush.bf16.msra.mxu3 %v4447_v9  ;;  %v4639_v54 = vor.u32 %v5622_v52, %v4636_v53  ;;  %v5617_v57 = vld [vmem:[%s6335_s28 + $0x64] sm:$0xf]  ;;  %v4611_v58 = vor.u32 %v5619_v56, %v4610_v55  ;;  %v4612_v59 = vld [vmem:[%s6335_s28 + $0x70] sm:$0xf0]  ;;  %v4618_v60 = vld [vmem:[%s6335_s28 + $0x68] sm:$0xf] }
 0x2b6   : > { %1597 = vmatmul.bf16.vlgmr.msra.gmra.mxu0 %v6187_v10  ;;  %v5620_v61 = vld [vmem:[%s6335_s28 + $0x74] sm:$0xf0]  ;;  %v1382_v0 = vld [vmem:[#allocation2 + $0xb0] sm:$0xff]  ;;  %v4615_v1 = vor.u32 %v5617_v57, %v4612_v59  ;;  %v5618_v3 = vld [vmem:[%s6335_s28 + $0x6c] sm:$0xf] }
 0x2b7   : > { %1611 = vmatmul.bf16.vlgmr.msra.gmra.mxu1 %v6187_v10  ;;  %1625 = vmatmul.bf16.vlgmr.msra.gmra.mxu2 %v6187_v10  ;;  %v4619_v2 = vor.u32 %v5620_v61, %v4618_v60  ;;  %v4620_v4 = vld [vmem:[%s6335_s28 + $0x78] sm:$0xf0]  ;;  %v4594_v8 = vld [vmem:[%s6335_s28 + $0x40] sm:$0xf]  ;;  %v5615_v9 = vld [vmem:[%s6335_s28 + $0x4c] sm:$0xf0]  ;;  %v1386_v11 = vunpack.c.l.bf16 %v1382_v0  ;;  %v1387_v16 = vunpack.c.h.bf16 %v1382_v0 }
 0x2b8   : > { %1639 = vmatmul.bf16.vlgmr.msra.gmra.mxu3 %v6187_v10  ;;  %1907 = vmatpush.bf16.msrb.mxu0 %v4675_v13  ;;  %v4623_v7 = vor.u32 %v5618_v3, %v4620_v4  ;;  %v5613_v10 = vld [vmem:[%s6335_s28 + $0x44] sm:$0xf]  ;;  %v4595_v12 = vor.u32 %v5615_v9, %v4594_v8  ;;  %v4596_v13 = vld [vmem:[%s6335_s28 + $0x50] sm:$0xf0]  ;;  %v4602_v14 = vld [vmem:[%s6335_s28 + $0x48] sm:$0xf] }
 0x2b9   : > { %1921 = vmatpush.bf16.msrb.mxu1 %v4679_v17  ;;  %1935 = vmatpush.bf16.msrb.mxu2 %v4683_v41  ;;  %v5616_v15 = vld [vmem:[%s6335_s28 + $0x54] sm:$0xf0]  ;;  %v4599_v17 = vor.u32 %v5613_v10, %v4596_v13  ;;  %v5614_v19 = vld [vmem:[%s6335_s28 + $0x4c] sm:$0xf]  ;;  %v4604_v20 = vld [vmem:[%s6335_s28 + $0x58] sm:$0xf0] }
 0x2ba   : > { %1949 = vmatpush.bf16.msrb.mxu3 %v4687_v42  ;;  %v4603_v18 = vor.u32 %v5616_v15, %v4602_v14  ;;  %v6760_v41 = vld [vmem:[#allocation2] sm:$0xff]  ;;  %v4607_v42 = vor.u32 %v5614_v19, %v4604_v20  ;;  %v4578_v49 = vld [vmem:[%s6335_s28 + $0x20] sm:$0xf]  ;;  %v5612_v28 = vld [vmem:[%s6335_s28 + $0x34] sm:$0xf0] }
 0x2bb   : > { %v5611_v21 = vld [vmem:[%s6335_s28 + $0x2c] sm:$0xf0]  ;;  %v5610_v33 = vld [vmem:[%s6335_s28 + $0x2c] sm:$0xf]  ;;  %v5605_v39 = vld [vmem:[%s6335_s28 + $0x4] sm:$0xf]  ;;  %v1389_v55 = vunpack.c.h.bf16 %v6760_v41 }
 0x2bc   : > { %1908 = vmatpush.bf16.msrb.mxu0 %v4659_v22  ;;  %v5609_v22 = vld [vmem:[%s6335_s28 + $0x24] sm:$0xf]  ;;  %v4579_v25 = vor.u32 %v5611_v21, %v4578_v49  ;;  %v5607_v5 = vld [vmem:[%s6335_s28 + $0xc] sm:$0xf0]  ;;  %v4564_v40 = vld [vmem:[%s6335_s28 + $0x10] sm:$0xf0] }
 0x2bd   : > { %1922 = vmatpush.bf16.msrb.mxu1 %v4663_v26  ;;  %1936 = vmatpush.bf16.msrb.mxu2 %v4667_v27  ;;  %v4580_v26 = vld [vmem:[%s6335_s28 + $0x30] sm:$0xf0]  ;;  %v4586_v27 = vld [vmem:[%s6335_s28 + $0x28] sm:$0xf]  ;;  %v4567_v45 = vor.u32 %v5605_v39, %v4564_v40  ;;  %v5608_v46 = vld [vmem:[%s6335_s28 + $0x14] sm:$0xf0] }
 0x2be   : > { %1950 = vmatpush.bf16.msrb.mxu3 %v4671_v30  ;;  %v1384_v30 = vld [vmem:[#allocation2 + $0xd8] sm:$0xff]  ;;  %v4583_v31 = vor.u32 %v5609_v22, %v4580_v26  ;;  %v4587_v32 = vor.u32 %v5612_v28, %v4586_v27  ;;  %v4804_v40 = vld [vmem:[%s6335_s28 + $0xf0] sm:$0xf0] }
 0x2bf   : > { %v1390_v38 = vunpack.c.l.bf16 %v1384_v30  ;;  %v4570_v43 = vld [vmem:[%s6335_s28 + $0x8] sm:$0xf]  ;;  %v5606_v47 = vld [vmem:[%s6335_s28 + $0xc] sm:$0xf] }
 0x2c0   : > { %1909 = vmatpush.bf16.msrb.mxu0 %v4643_v34  ;;  %v4588_v34 = vld [vmem:[%s6335_s28 + $0x38] sm:$0xf0]  ;;  %v4571_v52 = vor.u32 %v5608_v46, %v4570_v43  ;;  %v1385_v60 = vld [vmem:[#allocation2 + $0x18] sm:$0xff] }
 0x2c1   : > { %1923 = vmatpush.bf16.msrb.mxu1 %v4647_v62  ;;  %1937 = vmatpush.bf16.msrb.mxu2 %v4651_v63  ;;  %v4591_v36 = vor.u32 %v5610_v33, %v4588_v34  ;;  %v1388_v62 = vunpack.c.l.bf16 %v6760_v41  ;;  %v4562_v63 = vld [vmem:[%s6335_s28] sm:$0xf]  ;;  %v1392_v8 = vunpack.c.l.bf16 %v1385_v60  ;;  %v1393_v10 = vunpack.c.h.bf16 %v1385_v60  ;;  %v4810_v43 = vld [vmem:[%s6335_s28 + $0xe8] sm:$0xf]  ;;  %v5666_v46 = vld [vmem:[%s6335_s28 + $0xec] sm:$0xf] }
 0x2c2   : > { %1951 = vmatpush.bf16.msrb.mxu3 %v4655_v6  ;;  %v4563_v6 = vor.u32 %v5607_v5, %v4562_v63  ;;  %v4802_v5 = vld [vmem:[%s6335_s28 + $0xe0] sm:$0xf] }
 0x2c4   : > { %1910 = vmatpush.bf16.msrb.mxu0 %v4627_v44  ;;  %v1391_v44 = vunpack.c.h.bf16 %v1384_v30 }
 0x2c5   : > { %1924 = vmatpush.bf16.msrb.mxu1 %v4631_v50  ;;  %1938 = vmatpush.bf16.msrb.mxu2 %v4635_v51  ;;  %v4572_v50 = vld [vmem:[%s6335_s28 + $0x18] sm:$0xf0] }
 0x2c6   : > { %1952 = vmatpush.bf16.msrb.mxu3 %v4639_v54  ;;  %v4575_v53 = vor.u32 %v5606_v47, %v4572_v50  ;;  %v4812_v47 = vld [vmem:[%s6335_s28 + $0xf8] sm:$0xf0] }
 0x2c8   : > { %1911 = vmatpush.bf16.msrb.mxu0 %v4611_v58 }
 0x2c9   : > { %1925 = vmatpush.bf16.msrb.mxu1 %v4615_v1  ;;  %1939 = vmatpush.bf16.msrb.mxu2 %v4619_v2 }
 0x2ca   : > { %1953 = vmatpush.bf16.msrb.mxu3 %v4623_v7 }
 0x2cc   : > { %1912 = vmatpush.bf16.msrb.mxu0 %v4595_v12 }
 0x2cd   : > { %1926 = vmatpush.bf16.msrb.mxu1 %v4599_v17  ;;  %1940 = vmatpush.bf16.msrb.mxu2 %v4603_v18 }
 0x2ce   : > { %1954 = vmatpush.bf16.msrb.mxu3 %v4607_v42 }
 0x2d0   : > { %1913 = vmatpush.bf16.msrb.mxu0 %v4579_v25 }
 0x2d1   : > { %1927 = vmatpush.bf16.msrb.mxu1 %v4583_v31  ;;  %1941 = vmatpush.bf16.msrb.mxu2 %v4587_v32 }
 0x2d2   : > { %1955 = vmatpush.bf16.msrb.mxu3 %v4591_v36 }
 0x2d4   : > { %1914 = vmatpush.bf16.msrb.mxu0 %v4563_v6  ;;  %v5665_v6 = vld [vmem:[%s6335_s28 + $0xe4] sm:$0xf] }
 0x2d5   : > { %1928 = vmatpush.bf16.msrb.mxu1 %v4567_v45  ;;  %1942 = vmatpush.bf16.msrb.mxu2 %v4571_v52  ;;  %v5668_v45 = vld [vmem:[%s6335_s28 + $0xf4] sm:$0xf0]  ;;  %v4786_v52 = vld [vmem:[%s6335_s28 + $0xc0] sm:$0xf] }
 0x2d6   : > { %1956 = vmatpush.bf16.msrb.mxu3 %v4575_v53  ;;  %v4811_v50 = vor.u32 %v5668_v45, %v4810_v43  ;;  %v5663_v53 = vld [vmem:[%s6335_s28 + $0xcc] sm:$0xf0]  ;;  %v5648_v43 = vld [vmem:[%s6335_s28 + $0x54] sm:$0xf0] }
 0x2d9   : > { %2254 = vmatpush.bf16.msra.mxu2 %v4811_v50 }
 0x333   : > { %v1598_v48 = vpop.f32.mrf.mxu0 }
 0x334   : > { %v1645_v23 = vadd.f32 %v1598_v48, %v1386_v11  ;;  %v1612_v24 = vpop.f32.mrf.mxu1 }
 0x335   : > { %v1646_v29 = vadd.f32 %v1612_v24, %v1387_v16 }
 0x336   : > { %v1653_v35 = vmul.f32 0.5, %v1645_v23 }
 0x337   : > { %v1661_v37 = vmul.f32 0.5, %v1646_v29 }
 0x338   : > { %5924 = vtanh.f32 %v1653_v35 }
 0x339   : > { %5926 = vtanh.f32 %v1661_v37 }
 0x33a   : > { %v1626_v51 = vpop.f32.mrf.mxu2 }
 0x33b   : > { %v1647_v54 = vadd.f32 %v1626_v51, %v1388_v62  ;;  %v1640_v56 = vpop.f32.mrf.mxu3  ;;  %v1600_v57 = vpop.f32.mrf.mxu0  ;;  %v4815_v51 = vor.u32 %v5666_v46, %v4812_v47  ;;  %v5646_v46 = vld [vmem:[%s6335_s28 + $0x4c] sm:$0xf]  ;;  %v4732_v47 = vld [vmem:[%s6335_s28 + $0x58] sm:$0xf0] }
 0x33c   : > { %v1649_v58 = vadd.f32 %v1600_v57, %v1390_v38  ;;  %v1614_v59 = vpop.f32.mrf.mxu1  ;;  %v1648_v4 = vadd.f32 %v1640_v56, %v1389_v55  ;;  %v5667_v38 = vld [vmem:[%s6335_s28 + $0xec] sm:$0xf0]  ;;  %v4787_v55 = vor.u32 %v5663_v53, %v4786_v52  ;;  %v4788_v56 = vld [vmem:[%s6335_s28 + $0xd0] sm:$0xf0]  ;;  %v4794_v57 = vld [vmem:[%s6335_s28 + $0xc8] sm:$0xf]  ;;  %v4735_v52 = vor.u32 %v5646_v46, %v4732_v47 }
 0x33d   : > { %v1650_v61 = vadd.f32 %v1614_v59, %v1391_v44  ;;  %5928 = vtanh.f32 %v1647_v54  ;;  %v4803_v39 = vor.u32 %v5667_v38, %v4802_v5  ;;  %v4807_v44 = vor.u32 %v5665_v6, %v4804_v40  ;;  %v5661_v54 = vld [vmem:[%s6335_s28 + $0xc4] sm:$0xf]  ;;  %2268 = vmatpush.bf16.msra.mxu3 %v4815_v51  ;;  %v5647_v5 = vld [vmem:[%s6335_s28 + $0x4c] sm:$0xf0]  ;;  %v4730_v40 = vld [vmem:[%s6335_s28 + $0x48] sm:$0xf] }
 0x33e   : > { %v5925_v0 = vpop.eup %5924  ;;  %v1654_v1 = vmul.f32 0.5, %v1649_v58  ;;  %v1671_v14 = vmul.f32 0.5, %v1648_v4  ;;  %v5664_v58 = vld [vmem:[%s6335_s28 + $0xd4] sm:$0xf0]  ;;  %v4791_v59 = vor.u32 %v5661_v54, %v4788_v56  ;;  %v5657_v4 = vld [vmem:[%s6335_s28 + $0xa4] sm:$0xf]  ;;  %v4731_v45 = vor.u32 %v5648_v43, %v4730_v40 }
 0x33f   : > { %v5927_v2 = vpop.eup %5926  ;;  %v1657_v3 = vmul.f32 0.5, %v5925_v0  ;;  %v1662_v7 = vmul.f32 0.5, %v1650_v61  ;;  %2226 = vmatpush.bf16.msra.mxu0 %v4803_v39  ;;  %2240 = vmatpush.bf16.msra.mxu1 %v4807_v44  ;;  %v4795_v60 = vor.u32 %v5664_v58, %v4794_v57  ;;  %v5662_v61 = vld [vmem:[%s6335_s28 + $0xcc] sm:$0xf]  ;;  %v4796_v0 = vld [vmem:[%s6335_s28 + $0xd8] sm:$0xf0] }
 0x340   : > { %v1665_v9 = vmul.f32 0.5, %v5927_v2  ;;  %5930 = vtanh.f32 %v1654_v1  ;;  %v4799_v1 = vor.u32 %v5662_v61, %v4796_v0  ;;  %v4770_v2 = vld [vmem:[%s6335_s28 + $0xa0] sm:$0xf]  ;;  %v5645_v38 = vld [vmem:[%s6335_s28 + $0x44] sm:$0xf] }
 0x341   : > { %5932 = vtanh.f32 %v1662_v7  ;;  %v1659_v12 = vadd.f32 0.5, %v1657_v3  ;;  %v5659_v3 = vld [vmem:[%s6335_s28 + $0xac] sm:$0xf0]  ;;  %2255 = vmatpush.bf16.msra.mxu2 %v4795_v60  ;;  %v4724_v39 = vld [vmem:[%s6335_s28 + $0x50] sm:$0xf0] }
 0x342   : > { %v1628_v11 = vpop.f32.mrf.mxu2  ;;  %v1667_v13 = vadd.f32 0.5, %v1665_v9  ;;  %2269 = vmatpush.bf16.msra.mxu3 %v4799_v1  ;;  %v4771_v7 = vor.u32 %v5659_v3, %v4770_v2  ;;  %v4778_v9 = vld [vmem:[%s6335_s28 + $0xa8] sm:$0xf]  ;;  %v4727_v44 = vor.u32 %v5645_v38, %v4724_v39  ;;  %v4706_v53 = vld [vmem:[%s6335_s28 + $0x20] sm:$0xf] }
 0x343   : > { %v1651_v15 = vadd.f32 %v1628_v11, %v1392_v8  ;;  %v1642_v16 = vpop.f32.mrf.mxu3  ;;  %v5929_v17 = vpop.eup %5928  ;;  %2227 = vmatpush.bf16.msra.mxu0 %v4787_v55  ;;  %2241 = vmatpush.bf16.msra.mxu1 %v4791_v59  ;;  %v4772_v8 = vld [vmem:[%s6335_s28 + $0xb0] sm:$0xf0]  ;;  %v5643_v54 = vld [vmem:[%s6335_s28 + $0x2c] sm:$0xf0]  ;;  %v5641_v55 = vld [vmem:[%s6335_s28 + $0x24] sm:$0xf] }
 0x344   : > { %v1652_v18 = vadd.f32 %v1642_v16, %v1393_v10  ;;  %v1681_v41 = vmul.f32 0.0, %v1667_v13  ;;  %v1683_v42 = vmul.f32 %v5929_v17, %v1659_v12  ;;  %v5660_v10 = vld [vmem:[%s6335_s28 + $0xb4] sm:$0xf0]  ;;  %v4775_v11 = vor.u32 %v5657_v4, %v4772_v8  ;;  %v5658_v13 = vld [vmem:[%s6335_s28 + $0xac] sm:$0xf] }
 0x345   : > { %5934 = vtanh.f32 %v1651_v15  ;;  %v4779_v12 = vor.u32 %v5660_v10, %v4778_v9  ;;  %v4754_v16 = vld [vmem:[%s6335_s28 + $0x80] sm:$0xf]  ;;  %v5655_v17 = vld [vmem:[%s6335_s28 + $0x8c] sm:$0xf0]  ;;  %v4707_v56 = vor.u32 %v5643_v54, %v4706_v53  ;;  %v4708_v57 = vld [vmem:[%s6335_s28 + $0x30] sm:$0xf0] }
 0x346   : > { %v1672_v19 = vmul.f32 0.5, %v1652_v18  ;;  %v5931_v20 = vpop.eup %5930  ;;  %5936 = vtanh.f32 %v1671_v14  ;;  %v6780_v24 = vadd.f32 %v1683_v42, %v1681_v41  ;;  %v4780_v14 = vld [vmem:[%s6335_s28 + $0xb8] sm:$0xf0]  ;;  %v5653_v18 = vld [vmem:[%s6335_s28 + $0x84] sm:$0xf]  ;;  %v4711_v0 = vor.u32 %v5641_v55, %v4708_v57 }
 0x347   : > { %v5933_v48 = vpop.eup %5932  ;;  %v1658_v49 = vmul.f32 0.5, %v5931_v20  ;;  %2228 = vmatpush.bf16.msra.mxu0 %v4771_v7  ;;  %v4783_v15 = vor.u32 %v5658_v13, %v4780_v14  ;;  %2242 = vmatpush.bf16.msra.mxu1 %v4775_v11  ;;  %v4756_v20 = vld [vmem:[%s6335_s28 + $0x90] sm:$0xf0]  ;;  %v4762_v41 = vld [vmem:[%s6335_s28 + $0x88] sm:$0xf]  ;;  %v1701_v8 = vld [vmem:[#allocation2 + $0x68] sm:$0xff] }
 0x348   : > { %v1666_v21 = vmul.f32 0.5, %v5933_v48  ;;  %5938 = vtanh.f32 %v1672_v19  ;;  %2256 = vmatpush.bf16.msra.mxu2 %v4779_v12  ;;  %v4755_v19 = vor.u32 %v5655_v17, %v4754_v16  ;;  %v5656_v42 = vld [vmem:[%s6335_s28 + $0x94] sm:$0xf0]  ;;  %v4759_v48 = vor.u32 %v5653_v18, %v4756_v20  ;;  %v4714_v58 = vld [vmem:[%s6335_s28 + $0x28] sm:$0xf]  ;;  %v1702_v9 = vld [vmem:[#allocation2 + $0x30] sm:$0xff] }
 0x349   : > { %v1660_v22 = vadd.f32 0.5, %v1658_v49  ;;  %5940 = vtanh.f32 %v6780_v24  ;;  %2270 = vmatpush.bf16.msra.mxu3 %v4783_v15  ;;  %v4763_v49 = vor.u32 %v5656_v42, %v4762_v41  ;;  %v5644_v59 = vld [vmem:[%s6335_s28 + $0x34] sm:$0xf0]  ;;  %v5642_v2 = vld [vmem:[%s6335_s28 + $0x2c] sm:$0xf]  ;;  %v1708_v20 = vunpack.c.l.bf16 %v1702_v9 }
 0x34a   : > { %v1668_v25 = vadd.f32 0.5, %v1666_v21  ;;  %v5654_v21 = vld [vmem:[%s6335_s28 + $0x8c] sm:$0xf]  ;;  %v4715_v1 = vor.u32 %v5644_v59, %v4714_v58  ;;  %v4716_v3 = vld [vmem:[%s6335_s28 + $0x38] sm:$0xf0] }
 0x34b   : > { %v5935_v23 = vpop.eup %5934  ;;  %2229 = vmatpush.bf16.msra.mxu0 %v4755_v19  ;;  %2243 = vmatpush.bf16.msra.mxu1 %v4759_v48  ;;  %v4719_v10 = vor.u32 %v5642_v2, %v4716_v3  ;;  %v4690_v11 = vld [vmem:[%s6335_s28] sm:$0xf]  ;;  %v5639_v12 = vld [vmem:[%s6335_s28 + $0xc] sm:$0xf0]  ;;  %v5637_v13 = vld [vmem:[%s6335_s28 + $0x4] sm:$0xf]  ;;  %v1706_v19 = vunpack.c.l.bf16 %v1701_v8 }
 0x34c   : > { %v1684_v26 = vmul.f32 %v5935_v23, %v1660_v22  ;;  %v5937_v27 = vpop.eup %5936  ;;  %v1682_v28 = vmul.f32 0.0, %v1668_v25  ;;  %v4764_v22 = vld [vmem:[%s6335_s28 + $0x98] sm:$0xf0]  ;;  %v4738_v25 = vld [vmem:[%s6335_s28 + $0x60] sm:$0xf]  ;;  %2257 = vmatpush.bf16.msra.mxu2 %v4763_v49  ;;  %v4691_v16 = vor.u32 %v5639_v12, %v4690_v11 }
 0x34d   : > { %v1675_v31 = vmul.f32 0.5, %v5937_v27  ;;  %v4767_v23 = vor.u32 %v5654_v21, %v4764_v22  ;;  %v5649_v27 = vld [vmem:[%s6335_s28 + $0x64] sm:$0xf]  ;;  %v4692_v17 = vld [vmem:[%s6335_s28 + $0x10] sm:$0xf0]  ;;  %v1709_v21 = vunpack.c.h.bf16 %v1702_v9 }
 0x34e   : > { %v5939_v29 = vpop.eup %5938  ;;  %v6783_v30 = vadd.f32 %v1684_v26, %v1682_v28  ;;  %v5651_v26 = vld [vmem:[%s6335_s28 + $0x6c] sm:$0xf0]  ;;  %v4698_v18 = vld [vmem:[%s6335_s28 + $0x8] sm:$0xf]  ;;  %v4695_v41 = vor.u32 %v5637_v13, %v4692_v17  ;;  %v5640_v42 = vld [vmem:[%s6335_s28 + $0x14] sm:$0xf0] }
 0x34f   : > { %v1676_v32 = vmul.f32 0.5, %v5939_v29  ;;  %v1677_v33 = vadd.f32 0.5, %v1675_v31  ;;  %v5941_v34 = vpop.eup %5940  ;;  %2271 = vmatpush.bf16.msra.mxu3 %v4767_v23  ;;  %v4739_v28 = vor.u32 %v5651_v26, %v4738_v25  ;;  %v4740_v29 = vld [vmem:[%s6335_s28 + $0x70] sm:$0xf0]  ;;  %v4746_v31 = vld [vmem:[%s6335_s28 + $0x68] sm:$0xf]  ;;  %v4699_v22 = vor.u32 %v5640_v42, %v4698_v18 }
 0x350   : > { %5942 = vtanh.f32 %v6783_v30  ;;  %v5638_v48 = vld [vmem:[%s6335_s28 + $0xc] sm:$0xf]  ;;  %v4700_v49 = vld [vmem:[%s6335_s28 + $0x18] sm:$0xf0]  ;;  %v5697_v17 = vld [vmem:[%s6335_s28 + $0xe4] sm:$0xf] }
 0x351   : > { %v1678_v35 = vadd.f32 0.5, %v1676_v32  ;;  %v1689_v37 = vmul.f32 %v5941_v34, %v1677_v33  ;;  %v5652_v32 = vld [vmem:[%s6335_s28 + $0x74] sm:$0xf0]  ;;  %v4743_v33 = vor.u32 %v5649_v27, %v4740_v29  ;;  %2230 = vmatpush.bf16.msra.mxu0 %v4739_v28  ;;  %v4703_v23 = vor.u32 %v5638_v48, %v4700_v49  ;;  %v5698_v48 = vld [vmem:[%s6335_s28 + $0xec] sm:$0xf] }
 0x352   : > { %v4747_v34 = vor.u32 %v5652_v32, %v4746_v31  ;;  %v1707_v28 = vunpack.c.h.bf16 %v1701_v8  ;;  %v5700_v42 = vld [vmem:[%s6335_s28 + $0xf4] sm:$0xf0]  ;;  %v4940_v49 = vld [vmem:[%s6335_s28 + $0xf8] sm:$0xf0] }
 0x353   : > { %2244 = vmatpush.bf16.msra.mxu1 %v4743_v33 }
 0x354   : > { %2258 = vmatpush.bf16.msra.mxu2 %v4747_v34  ;;  %v1703_v34 = vld [vmem:[#allocation2 + $0x48] sm:$0xff] }
 0x355   : > { %v1710_v38 = vunpack.c.l.bf16 %v1703_v34 }
 0x356   : > { %v5943_v36 = vpop.eup %5942 }
 0x357   : > { %v1690_v62 = vmul.f32 %v5943_v36, %v1678_v35  ;;  %v5650_v35 = vld [vmem:[%s6335_s28 + $0x6c] sm:$0xf]  ;;  %v4748_v36 = vld [vmem:[%s6335_s28 + $0x78] sm:$0xf0]  ;;  %2245 = vmatpush.bf16.msra.mxu1 %v4727_v44 }
 0x358   : > { %2259 = vmatpush.bf16.msra.mxu2 %v4731_v45 }
 0x359   : > { %v5840_v63 = vpack.c.bf16 %v1690_v62, %v1689_v37  ;;  %v1700_v37 = vld [vmem:[#allocation2 + $0x50] sm:$0xff]  ;;  %v4751_v62 = vor.u32 %v5650_v35, %v4748_v36 }
 0x35a   : > { %v1704_v50 = vunpack.c.l.bf16 %v1700_v37  ;;  %v1705_v51 = vunpack.c.h.bf16 %v1700_v37 }
 0x35b   : > { %5841 = vst [vmem:[#allocation5] sm:$0xff] %v5840_v63   ;;  %1915 = vmatmul.bf16.vlgmr.msrb.gmra.mxu0 %v5840_v63  ;;  %1929 = vmatmul.bf16.vlgmr.msrb.gmra.mxu1 %v5840_v63 }
 0x35c   : > { %1943 = vmatmul.bf16.vlgmr.msrb.gmra.mxu2 %v5840_v63  ;;  %1957 = vmatmul.bf16.vlgmr.msrb.gmra.mxu3 %v5840_v63  ;;  %v4722_v63 = vld [vmem:[%s6335_s28 + $0x40] sm:$0xf] }
 0x35d   : > { %2272 = vmatpush.bf16.msra.mxu3 %v4751_v62  ;;  %v4723_v6 = vor.u32 %v5647_v5, %v4722_v63  ;;  %2246 = vmatpush.bf16.msra.mxu1 %v4711_v0 }
 0x35e   : > { %2260 = vmatpush.bf16.msra.mxu2 %v4715_v1 }
 0x35f   : > { %2231 = vmatpush.bf16.msra.mxu0 %v4723_v6  ;;  %v1711_v6 = vunpack.c.h.bf16 %v1703_v34  ;;  %v5694_v34 = vld [vmem:[%s6335_s28 + $0xcc] sm:$0xf] }
 0x361   : > { %2273 = vmatpush.bf16.msra.mxu3 %v4735_v52  ;;  %2247 = vmatpush.bf16.msra.mxu1 %v4695_v41 }
 0x362   : > { %2261 = vmatpush.bf16.msra.mxu2 %v4699_v22  ;;  %v4943_v22 = vor.u32 %v5698_v48, %v4940_v49  ;;  %v5678_v48 = vld [vmem:[%s6335_s28 + $0x4c] sm:$0xf]  ;;  %v4860_v49 = vld [vmem:[%s6335_s28 + $0x58] sm:$0xf0] }
 0x363   : > { %2232 = vmatpush.bf16.msra.mxu0 %v4707_v56 }
 0x365   : > { %2274 = vmatpush.bf16.msra.mxu3 %v4719_v10 }
 0x367   : > { %2233 = vmatpush.bf16.msra.mxu0 %v4691_v16  ;;  %v5699_v16 = vld [vmem:[%s6335_s28 + $0xec] sm:$0xf0] }
 0x369   : > { %2275 = vmatpush.bf16.msra.mxu3 %v4703_v23  ;;  %v4914_v23 = vld [vmem:[%s6335_s28 + $0xc0] sm:$0xf] }
 0x36d   : > { %2587 = vmatpush.bf16.msrb.mxu3 %v4943_v22 }
 0x3d8   : > { %v1916_v60 = vpop.f32.mrf.mxu0  ;;  %v1930_v61 = vpop.f32.mrf.mxu1 }
 0x3d9   : > { %v1963_v4 = vadd.f32 %v1916_v60, %v1704_v50  ;;  %v1964_v7 = vadd.f32 %v1930_v61, %v1705_v51 }
 0x3db   : > { %v1971_v14 = vmul.f32 0.5, %v1963_v4  ;;  %v1979_v15 = vmul.f32 0.5, %v1964_v7 }
 0x3dd   : > { %5944 = vtanh.f32 %v1971_v14 }
 0x3de   : > { %5946 = vtanh.f32 %v1979_v15  ;;  %v4930_v15 = vld [vmem:[%s6335_s28 + $0xe0] sm:$0xf] }
 0x3df   : > { %v1944_v25 = vpop.f32.mrf.mxu2  ;;  %v1958_v26 = vpop.f32.mrf.mxu3  ;;  %v4931_v18 = vor.u32 %v5699_v16, %v4930_v15  ;;  %v5679_v15 = vld [vmem:[%s6335_s28 + $0x4c] sm:$0xf0]  ;;  %v5677_v16 = vld [vmem:[%s6335_s28 + $0x44] sm:$0xf] }
 0x3e0   : > { %v1965_v27 = vadd.f32 %v1944_v25, %v1706_v19  ;;  %v1918_v29 = vpop.f32.mrf.mxu0  ;;  %v1932_v31 = vpop.f32.mrf.mxu1  ;;  %v1966_v5 = vadd.f32 %v1958_v26, %v1707_v28  ;;  %v4932_v19 = vld [vmem:[%s6335_s28 + $0xf0] sm:$0xf0]  ;;  %v5695_v25 = vld [vmem:[%s6335_s28 + $0xcc] sm:$0xf0]  ;;  %v5693_v26 = vld [vmem:[%s6335_s28 + $0xc4] sm:$0xf] }
 0x3e1   : > { %v1967_v32 = vadd.f32 %v1918_v29, %v1708_v20  ;;  %v1968_v33 = vadd.f32 %v1932_v31, %v1709_v21  ;;  %v4938_v20 = vld [vmem:[%s6335_s28 + $0xe8] sm:$0xf]  ;;  %v4935_v41 = vor.u32 %v5697_v17, %v4932_v19  ;;  %2545 = vmatpush.bf16.msrb.mxu0 %v4931_v18  ;;  %v4916_v28 = vld [vmem:[%s6335_s28 + $0xd0] sm:$0xf0]  ;;  %v5696_v31 = vld [vmem:[%s6335_s28 + $0xd4] sm:$0xf0] }
 0x3e2   : > { %5948 = vtanh.f32 %v1965_v27  ;;  %v1989_v47 = vmul.f32 0.5, %v1966_v5  ;;  %v4939_v21 = vor.u32 %v5700_v42, %v4938_v20  ;;  %v4915_v27 = vor.u32 %v5695_v25, %v4914_v23  ;;  %v4922_v29 = vld [vmem:[%s6335_s28 + $0xc8] sm:$0xf]  ;;  %v4852_v18 = vld [vmem:[%s6335_s28 + $0x50] sm:$0xf0] }
 0x3e3   : > { %v5945_v35 = vpop.eup %5944  ;;  %v1972_v36 = vmul.f32 0.5, %v1967_v32  ;;  %v1980_v37 = vmul.f32 0.5, %v1968_v33  ;;  %2559 = vmatpush.bf16.msrb.mxu1 %v4935_v41  ;;  %v4919_v32 = vor.u32 %v5693_v26, %v4916_v28  ;;  %v4923_v33 = vor.u32 %v5696_v31, %v4922_v29  ;;  %v4858_v19 = vld [vmem:[%s6335_s28 + $0x48] sm:$0xf]  ;;  %v5680_v20 = vld [vmem:[%s6335_s28 + $0x54] sm:$0xf0] }
 0x3e4   : > { %v5947_v62 = vpop.eup %5946  ;;  %v1975_v63 = vmul.f32 0.5, %v5945_v35  ;;  %2573 = vmatpush.bf16.msrb.mxu2 %v4939_v21  ;;  %v4924_v35 = vld [vmem:[%s6335_s28 + $0xd8] sm:$0xf0]  ;;  %v4855_v41 = vor.u32 %v5677_v16, %v4852_v18  ;;  %v4859_v42 = vor.u32 %v5680_v20, %v4858_v19  ;;  %v4863_v23 = vor.u32 %v5678_v48, %v4860_v49  ;;  %v4834_v25 = vld [vmem:[%s6335_s28 + $0x20] sm:$0xf] }
 0x3e5   : > { %v1983_v39 = vmul.f32 0.5, %v5947_v62  ;;  %5950 = vtanh.f32 %v1972_v36  ;;  %2546 = vmatpush.bf16.msrb.mxu0 %v4915_v27  ;;  %v4927_v36 = vor.u32 %v5694_v34, %v4924_v35  ;;  %v5691_v62 = vld [vmem:[%s6335_s28 + $0xac] sm:$0xf0]  ;;  %v5673_v27 = vld [vmem:[%s6335_s28 + $0x24] sm:$0xf] }
 0x3e6   : > { %5952 = vtanh.f32 %v1980_v37  ;;  %v1977_v40 = vadd.f32 0.5, %v1975_v63  ;;  %v4898_v37 = vld [vmem:[%s6335_s28 + $0xa0] sm:$0xf]  ;;  %v5689_v63 = vld [vmem:[%s6335_s28 + $0xa4] sm:$0xf] }
 0x3e7   : > { %v1985_v43 = vadd.f32 0.5, %v1983_v39  ;;  %v1946_v44 = vpop.f32.mrf.mxu2  ;;  %v1960_v45 = vpop.f32.mrf.mxu3  ;;  %2560 = vmatpush.bf16.msrb.mxu1 %v4919_v32  ;;  %2588 = vmatpush.bf16.msrb.mxu3 %v4927_v36  ;;  %v4899_v5 = vor.u32 %v5691_v62, %v4898_v37  ;;  %v5692_v39 = vld [vmem:[%s6335_s28 + $0xb4] sm:$0xf0]  ;;  %v5675_v26 = vld [vmem:[%s6335_s28 + $0x2c] sm:$0xf0] }
 0x3e8   : > { %v5949_v46 = vpop.eup %5948  ;;  %v1969_v50 = vadd.f32 %v1946_v44, %v1710_v38  ;;  %v1970_v51 = vadd.f32 %v1960_v45, %v1711_v6  ;;  %2574 = vmatpush.bf16.msrb.mxu2 %v4923_v33  ;;  %v4900_v38 = vld [vmem:[%s6335_s28 + $0xb0] sm:$0xf0]  ;;  %v4906_v6 = vld [vmem:[%s6335_s28 + $0xa8] sm:$0xf]  ;;  %v5690_v44 = vld [vmem:[%s6335_s28 + $0xac] sm:$0xf]  ;;  %v4835_v28 = vor.u32 %v5675_v26, %v4834_v25 }
 0x3e9   : > { %v1999_v54 = vmul.f32 %v1985_v43, %v6780_v24  ;;  %v2001_v55 = vmul.f32 %v5949_v46, %v1977_v40  ;;  %v4903_v40 = vor.u32 %v5689_v63, %v4900_v38  ;;  %v4907_v43 = vor.u32 %v5692_v39, %v4906_v6  ;;  %v4908_v45 = vld [vmem:[%s6335_s28 + $0xb8] sm:$0xf0]  ;;  %2547 = vmatpush.bf16.msrb.mxu0 %v4899_v5  ;;  %v4836_v29 = vld [vmem:[%s6335_s28 + $0x30] sm:$0xf0]  ;;  %v4842_v31 = vld [vmem:[%s6335_s28 + $0x28] sm:$0xf] }
 0x3ea   : > { %5954 = vtanh.f32 %v1969_v50  ;;  %v1990_v52 = vmul.f32 0.5, %v1970_v51  ;;  %v4911_v46 = vor.u32 %v5690_v44, %v4908_v45  ;;  %v5687_v50 = vld [vmem:[%s6335_s28 + $0x8c] sm:$0xf0]  ;;  %v5685_v51 = vld [vmem:[%s6335_s28 + $0x84] sm:$0xf]  ;;  %v4839_v35 = vor.u32 %v5673_v27, %v4836_v29  ;;  %v2020_v38 = vld [vmem:[#allocation2 + $0x88] sm:$0xff] }
 0x3eb   : > { %v5951_v53 = vpop.eup %5950  ;;  %5956 = vtanh.f32 %v1989_v47  ;;  %v6851_v60 = vadd.f32 %v2001_v55, %v1999_v54  ;;  %2561 = vmatpush.bf16.msrb.mxu1 %v4903_v40  ;;  %v4882_v47 = vld [vmem:[%s6335_s28 + $0x80] sm:$0xf]  ;;  %v4890_v54 = vld [vmem:[%s6335_s28 + $0x88] sm:$0xf]  ;;  %v5688_v55 = vld [vmem:[%s6335_s28 + $0x94] sm:$0xf0] }
 0x3ec   : > { %v5953_v56 = vpop.eup %5952  ;;  %v1976_v57 = vmul.f32 0.5, %v5951_v53  ;;  %5958 = vtanh.f32 %v1990_v52  ;;  %2575 = vmatpush.bf16.msrb.mxu2 %v4907_v43  ;;  %2589 = vmatpush.bf16.msrb.mxu3 %v4911_v46  ;;  %v4883_v52 = vor.u32 %v5687_v50, %v4882_v47  ;;  %v4884_v53 = vld [vmem:[%s6335_s28 + $0x90] sm:$0xf0]  ;;  %v5676_v32 = vld [vmem:[%s6335_s28 + $0x34] sm:$0xf0] }
 0x3ed   : > { %v1984_v58 = vmul.f32 0.5, %v5953_v56  ;;  %5960 = vtanh.f32 %v6851_v60  ;;  %v4887_v56 = vor.u32 %v5685_v51, %v4884_v53  ;;  %v4843_v36 = vor.u32 %v5676_v32, %v4842_v31  ;;  %v5674_v37 = vld [vmem:[%s6335_s28 + $0x2c] sm:$0xf]  ;;  %v4844_v62 = vld [vmem:[%s6335_s28 + $0x38] sm:$0xf0] }
 0x3ee   : > { %v1978_v59 = vadd.f32 0.5, %v1976_v57  ;;  %v4891_v57 = vor.u32 %v5688_v55, %v4890_v54  ;;  %2548 = vmatpush.bf16.msrb.mxu0 %v4883_v52  ;;  %v2021_v6 = vld [vmem:[#allocation2 + $0xe8] sm:$0xff]  ;;  %v4847_v39 = vor.u32 %v5674_v37, %v4844_v62  ;;  %v4818_v40 = vld [vmem:[%s6335_s28] sm:$0xf]  ;;  %v5671_v43 = vld [vmem:[%s6335_s28 + $0xc] sm:$0xf0]  ;;  %v2025_v52 = vunpack.c.l.bf16 %v2020_v38 }
 0x3ef   : > { %v1986_v61 = vadd.f32 0.5, %v1984_v58  ;;  %v5686_v58 = vld [vmem:[%s6335_s28 + $0x8c] sm:$0xf]  ;;  %2562 = vmatpush.bf16.msrb.mxu1 %v4887_v56  ;;  %v5669_v44 = vld [vmem:[%s6335_s28 + $0x4] sm:$0xf]  ;;  %v4819_v47 = vor.u32 %v5671_v43, %v4818_v40  ;;  %v2027_v53 = vunpack.c.l.bf16 %v2021_v6 }
 0x3f0   : > { %v5955_v0 = vpop.eup %5954  ;;  %2576 = vmatpush.bf16.msrb.mxu2 %v4891_v57  ;;  %v4820_v50 = vld [vmem:[%s6335_s28 + $0x10] sm:$0xf0]  ;;  %v4826_v51 = vld [vmem:[%s6335_s28 + $0x8] sm:$0xf]  ;;  %v5672_v55 = vld [vmem:[%s6335_s28 + $0x14] sm:$0xf0] }
 0x3f1   : > { %v2000_v1 = vmul.f32 %v1986_v61, %v6783_v30  ;;  %v2002_v2 = vmul.f32 %v5955_v0, %v1978_v59  ;;  %v5957_v3 = vpop.eup %5956  ;;  %v4892_v59 = vld [vmem:[%s6335_s28 + $0x98] sm:$0xf0]  ;;  %v4866_v0 = vld [vmem:[%s6335_s28 + $0x60] sm:$0xf]  ;;  %v4823_v54 = vor.u32 %v5669_v44, %v4820_v50  ;;  %v5670_v56 = vld [vmem:[%s6335_s28 + $0xc] sm:$0xf] }
 0x3f2   : > { %v5959_v4 = vpop.eup %5958  ;;  %v1993_v24 = vmul.f32 0.5, %v5957_v3  ;;  %v4895_v61 = vor.u32 %v5686_v58, %v4892_v59  ;;  %v4828_v57 = vld [vmem:[%s6335_s28 + $0x18] sm:$0xf0]  ;;  %v2028_v58 = vunpack.c.h.bf16 %v2021_v6  ;;  %v4827_v59 = vor.u32 %v5672_v55, %v4826_v51  ;;  %v5729_v50 = vld [vmem:[%s6335_s28 + $0xe4] sm:$0xf] }
 0x3f3   : > { %v6855_v7 = vadd.f32 %v2002_v2, %v2000_v1  ;;  %v1994_v8 = vmul.f32 0.5, %v5959_v4  ;;  %v5961_v9 = vpop.eup %5960  ;;  %v5683_v1 = vld [vmem:[%s6335_s28 + $0x6c] sm:$0xf0]  ;;  %v5681_v2 = vld [vmem:[%s6335_s28 + $0x64] sm:$0xf] }
 0x3f4   : > { %v1995_v10 = vadd.f32 0.5, %v1993_v24  ;;  %2590 = vmatpush.bf16.msrb.mxu3 %v4895_v61  ;;  %v4867_v3 = vor.u32 %v5683_v1, %v4866_v0  ;;  %v4868_v4 = vld [vmem:[%s6335_s28 + $0x70] sm:$0xf0]  ;;  %v4874_v24 = vld [vmem:[%s6335_s28 + $0x68] sm:$0xf]  ;;  %v4831_v61 = vor.u32 %v5670_v56, %v4828_v57 }
 0x3f5   : > { %5962 = vtanh.f32 %v6855_v7  ;;  %v1996_v11 = vadd.f32 0.5, %v1994_v8  ;;  %v5684_v8 = vld [vmem:[%s6335_s28 + $0x74] sm:$0xf0]  ;;  %v5730_v56 = vld [vmem:[%s6335_s28 + $0xec] sm:$0xf] }
 0x3f6   : > { %v2007_v12 = vmul.f32 %v5961_v9, %v1995_v10  ;;  %v4871_v9 = vor.u32 %v5681_v2, %v4868_v4  ;;  %v4875_v10 = vor.u32 %v5684_v8, %v4874_v24  ;;  %2549 = vmatpush.bf16.msrb.mxu0 %v4867_v3  ;;  %v2026_v3 = vunpack.c.h.bf16 %v2020_v38  ;;  %v5732_v55 = vld [vmem:[%s6335_s28 + $0xf4] sm:$0xf0]  ;;  %v5068_v57 = vld [vmem:[%s6335_s28 + $0xf8] sm:$0xf0] }
 0x3f8   : > { %2563 = vmatpush.bf16.msrb.mxu1 %v4871_v9  ;;  %2577 = vmatpush.bf16.msrb.mxu2 %v4875_v10  ;;  %v2022_v10 = vld [vmem:[#allocation2 + $0xb8] sm:$0xff] }
 0x3f9   : > { %v2029_v16 = vunpack.c.l.bf16 %v2022_v10 }
 0x3fb   : > { %v5963_v30 = vpop.eup %5962 }
 0x3fc   : > { %v2008_v13 = vmul.f32 %v5963_v30, %v1996_v11  ;;  %v5682_v11 = vld [vmem:[%s6335_s28 + $0x6c] sm:$0xf]  ;;  %v4876_v30 = vld [vmem:[%s6335_s28 + $0x78] sm:$0xf0]  ;;  %2564 = vmatpush.bf16.msrb.mxu1 %v4855_v41  ;;  %2578 = vmatpush.bf16.msrb.mxu2 %v4859_v42 }
 0x3fe   : > { %v5845_v14 = vpack.c.bf16 %v2008_v13, %v2007_v12  ;;  %v2019_v12 = vld [vmem:[#allocation2 + $0x80] sm:$0xff]  ;;  %v4879_v13 = vor.u32 %v5682_v11, %v4876_v30 }
 0x3ff   : > { %v2023_v21 = vunpack.c.l.bf16 %v2019_v12  ;;  %v2024_v22 = vunpack.c.h.bf16 %v2019_v12 }
 0x400   : > { %5846 = vst [vmem:[#allocation5 + $0x20] sm:$0xff] %v5845_v14   ;;  %2234 = vmatmul.bf16.vlgmr.msra.gmra.mxu0 %v5845_v14  ;;  %2248 = vmatmul.bf16.vlgmr.msra.gmra.mxu1 %v5845_v14 }
 0x401   : > { %2262 = vmatmul.bf16.vlgmr.msra.gmra.mxu2 %v5845_v14  ;;  %2276 = vmatmul.bf16.vlgmr.msra.gmra.mxu3 %v5845_v14  ;;  %v4850_v14 = vld [vmem:[%s6335_s28 + $0x40] sm:$0xf] }
 0x402   : > { %2591 = vmatpush.bf16.msrb.mxu3 %v4879_v13  ;;  %v4851_v17 = vor.u32 %v5679_v15, %v4850_v14  ;;  %2565 = vmatpush.bf16.msrb.mxu1 %v4839_v35 }
 0x403   : > { %2579 = vmatpush.bf16.msrb.mxu2 %v4843_v36 }
 0x404   : > { %2550 = vmatpush.bf16.msrb.mxu0 %v4851_v17  ;;  %v2030_v17 = vunpack.c.h.bf16 %v2022_v10  ;;  %v5726_v10 = vld [vmem:[%s6335_s28 + $0xcc] sm:$0xf] }
 0x406   : > { %2592 = vmatpush.bf16.msrb.mxu3 %v4863_v23  ;;  %2566 = vmatpush.bf16.msrb.mxu1 %v4823_v54 }
 0x407   : > { %2580 = vmatpush.bf16.msrb.mxu2 %v4827_v59  ;;  %v5071_v59 = vor.u32 %v5730_v56, %v5068_v57  ;;  %v5710_v56 = vld [vmem:[%s6335_s28 + $0x4c] sm:$0xf]  ;;  %v4988_v57 = vld [vmem:[%s6335_s28 + $0x58] sm:$0xf0] }
 0x408   : > { %2551 = vmatpush.bf16.msrb.mxu0 %v4835_v28 }
 0x40a   : > { %2593 = vmatpush.bf16.msrb.mxu3 %v4847_v39 }
 0x40c   : > { %2552 = vmatpush.bf16.msrb.mxu0 %v4819_v47  ;;  %v5731_v47 = vld [vmem:[%s6335_s28 + $0xec] sm:$0xf0] }
 0x40e   : > { %2594 = vmatpush.bf16.msrb.mxu3 %v4831_v61  ;;  %v5042_v61 = vld [vmem:[%s6335_s28 + $0xc0] sm:$0xf] }
 0x412   : > { %2906 = vmatpush.bf16.msra.mxu3 %v5071_v59 }
 0x47d   : > { %v2235_v33 = vpop.f32.mrf.mxu0  ;;  %v2249_v34 = vpop.f32.mrf.mxu1 }
 0x47e   : > { %v2282_v63 = vadd.f32 %v2235_v33, %v2023_v21  ;;  %v2283_v5 = vadd.f32 %v2249_v34, %v2024_v22 }
 0x480   : > { %v2290_v45 = vmul.f32 0.5, %v2282_v63  ;;  %v2298_v46 = vmul.f32 0.5, %v2283_v5 }
 0x482   : > { %5964 = vtanh.f32 %v2290_v45 }
 0x483   : > { %5966 = vtanh.f32 %v2298_v46  ;;  %v5058_v46 = vld [vmem:[%s6335_s28 + $0xe0] sm:$0xf] }
 0x484   : > { %v2263_v0 = vpop.f32.mrf.mxu2  ;;  %v2277_v1 = vpop.f32.mrf.mxu3  ;;  %v5059_v51 = vor.u32 %v5731_v47, %v5058_v46  ;;  %v5711_v46 = vld [vmem:[%s6335_s28 + $0x4c] sm:$0xf0]  ;;  %v5709_v47 = vld [vmem:[%s6335_s28 + $0x44] sm:$0xf] }
 0x485   : > { %v2284_v2 = vadd.f32 %v2263_v0, %v2025_v52  ;;  %v2237_v4 = vpop.f32.mrf.mxu0  ;;  %v2251_v24 = vpop.f32.mrf.mxu1  ;;  %v2285_v15 = vadd.f32 %v2277_v1, %v2026_v3  ;;  %v5060_v52 = vld [vmem:[%s6335_s28 + $0xf0] sm:$0xf0]  ;;  %v5727_v0 = vld [vmem:[%s6335_s28 + $0xcc] sm:$0xf0]  ;;  %v5725_v1 = vld [vmem:[%s6335_s28 + $0xc4] sm:$0xf] }
 0x486   : > { %v2286_v8 = vadd.f32 %v2237_v4, %v2027_v53  ;;  %v2287_v9 = vadd.f32 %v2251_v24, %v2028_v58  ;;  %v5066_v53 = vld [vmem:[%s6335_s28 + $0xe8] sm:$0xf]  ;;  %v5063_v54 = vor.u32 %v5729_v50, %v5060_v52  ;;  %2864 = vmatpush.bf16.msra.mxu0 %v5059_v51  ;;  %v5044_v3 = vld [vmem:[%s6335_s28 + $0xd0] sm:$0xf0]  ;;  %v5728_v24 = vld [vmem:[%s6335_s28 + $0xd4] sm:$0xf0] }
 0x487   : > { %5968 = vtanh.f32 %v2284_v2  ;;  %v2308_v49 = vmul.f32 0.5, %v2285_v15  ;;  %v5067_v58 = vor.u32 %v5732_v55, %v5066_v53  ;;  %v5043_v2 = vor.u32 %v5727_v0, %v5042_v61  ;;  %v5050_v4 = vld [vmem:[%s6335_s28 + $0xc8] sm:$0xf]  ;;  %v4980_v51 = vld [vmem:[%s6335_s28 + $0x50] sm:$0xf0] }
 0x488   : > { %v5965_v11 = vpop.eup %5964  ;;  %v2291_v30 = vmul.f32 0.5, %v2286_v8  ;;  %v2299_v12 = vmul.f32 0.5, %v2287_v9  ;;  %2878 = vmatpush.bf16.msra.mxu1 %v5063_v54  ;;  %v5047_v8 = vor.u32 %v5725_v1, %v5044_v3  ;;  %v5051_v9 = vor.u32 %v5728_v24, %v5050_v4  ;;  %v4986_v52 = vld [vmem:[%s6335_s28 + $0x48] sm:$0xf]  ;;  %v5712_v53 = vld [vmem:[%s6335_s28 + $0x54] sm:$0xf0] }
 0x489   : > { %v5967_v13 = vpop.eup %5966  ;;  %v2294_v14 = vmul.f32 0.5, %v5965_v11  ;;  %2892 = vmatpush.bf16.msra.mxu2 %v5067_v58  ;;  %v5052_v11 = vld [vmem:[%s6335_s28 + $0xd8] sm:$0xf0]  ;;  %v4983_v54 = vor.u32 %v5709_v47, %v4980_v51  ;;  %v4987_v55 = vor.u32 %v5712_v53, %v4986_v52  ;;  %v4991_v61 = vor.u32 %v5710_v56, %v4988_v57  ;;  %v4962_v0 = vld [vmem:[%s6335_s28 + $0x20] sm:$0xf] }
 0x48a   : > { %v2302_v18 = vmul.f32 0.5, %v5967_v13  ;;  %5970 = vtanh.f32 %v2291_v30  ;;  %2865 = vmatpush.bf16.msra.mxu0 %v5043_v2  ;;  %v5055_v30 = vor.u32 %v5726_v10, %v5052_v11  ;;  %v5723_v13 = vld [vmem:[%s6335_s28 + $0xac] sm:$0xf0]  ;;  %v5705_v2 = vld [vmem:[%s6335_s28 + $0x24] sm:$0xf] }
 0x48b   : > { %5972 = vtanh.f32 %v2299_v12  ;;  %v2296_v19 = vadd.f32 0.5, %v2294_v14  ;;  %v5026_v12 = vld [vmem:[%s6335_s28 + $0xa0] sm:$0xf]  ;;  %v5721_v14 = vld [vmem:[%s6335_s28 + $0xa4] sm:$0xf] }
 0x48c   : > { %v2304_v20 = vadd.f32 0.5, %v2302_v18  ;;  %v2265_v41 = vpop.f32.mrf.mxu2  ;;  %v2279_v42 = vpop.f32.mrf.mxu3  ;;  %2879 = vmatpush.bf16.msra.mxu1 %v5047_v8  ;;  %2907 = vmatpush.bf16.msra.mxu3 %v5055_v30  ;;  %v5027_v15 = vor.u32 %v5723_v13, %v5026_v12  ;;  %v5724_v18 = vld [vmem:[%s6335_s28 + $0xb4] sm:$0xf0]  ;;  %v5707_v1 = vld [vmem:[%s6335_s28 + $0x2c] sm:$0xf0] }
 0x48d   : > { %v5969_v48 = vpop.eup %5968  ;;  %v2288_v21 = vadd.f32 %v2265_v41, %v2029_v16  ;;  %v2289_v22 = vadd.f32 %v2279_v42, %v2030_v17  ;;  %2893 = vmatpush.bf16.msra.mxu2 %v5051_v9  ;;  %v5028_v16 = vld [vmem:[%s6335_s28 + $0xb0] sm:$0xf0]  ;;  %v5034_v17 = vld [vmem:[%s6335_s28 + $0xa8] sm:$0xf]  ;;  %v5722_v41 = vld [vmem:[%s6335_s28 + $0xac] sm:$0xf]  ;;  %v4963_v3 = vor.u32 %v5707_v1, %v4962_v0 }
 0x48e   : > { %v2318_v26 = vmul.f32 %v2304_v20, %v6851_v60  ;;  %v2320_v27 = vmul.f32 %v5969_v48, %v2296_v19  ;;  %v5031_v19 = vor.u32 %v5721_v14, %v5028_v16  ;;  %v5035_v20 = vor.u32 %v5724_v18, %v5034_v17  ;;  %v5036_v42 = vld [vmem:[%s6335_s28 + $0xb8] sm:$0xf0]  ;;  %2866 = vmatpush.bf16.msra.mxu0 %v5027_v15  ;;  %v4964_v4 = vld [vmem:[%s6335_s28 + $0x30] sm:$0xf0]  ;;  %v4970_v24 = vld [vmem:[%s6335_s28 + $0x28] sm:$0xf] }
 0x48f   : > { %5974 = vtanh.f32 %v2288_v21  ;;  %v2309_v23 = vmul.f32 0.5, %v2289_v22  ;;  %v5039_v48 = vor.u32 %v5722_v41, %v5036_v42  ;;  %v5719_v21 = vld [vmem:[%s6335_s28 + $0x8c] sm:$0xf0]  ;;  %v5717_v22 = vld [vmem:[%s6335_s28 + $0x84] sm:$0xf]  ;;  %v4967_v11 = vor.u32 %v5705_v2, %v4964_v4  ;;  %v2340_v17 = vld [vmem:[#allocation2 + $0x8] sm:$0xff] }
 0x490   : > { %v5971_v25 = vpop.eup %5970  ;;  %5976 = vtanh.f32 %v2308_v49  ;;  %v6923_v33 = vadd.f32 %v2320_v27, %v2318_v26  ;;  %2880 = vmatpush.bf16.msra.mxu1 %v5031_v19  ;;  %v5010_v49 = vld [vmem:[%s6335_s28 + $0x80] sm:$0xf]  ;;  %v5018_v26 = vld [vmem:[%s6335_s28 + $0x88] sm:$0xf]  ;;  %v5720_v27 = vld [vmem:[%s6335_s28 + $0x94] sm:$0xf0] }
 0x491   : > { %v5973_v28 = vpop.eup %5972  ;;  %v2295_v29 = vmul.f32 0.5, %v5971_v25  ;;  %5978 = vtanh.f32 %v2309_v23  ;;  %2894 = vmatpush.bf16.msra.mxu2 %v5035_v20  ;;  %2908 = vmatpush.bf16.msra.mxu3 %v5039_v48  ;;  %v5011_v23 = vor.u32 %v5719_v21, %v5010_v49  ;;  %v5012_v25 = vld [vmem:[%s6335_s28 + $0x90] sm:$0xf0]  ;;  %v5708_v8 = vld [vmem:[%s6335_s28 + $0x34] sm:$0xf0]  ;;  %v2339_v16 = vld [vmem:[#allocation2 + $0xf0] sm:$0xff] }
 0x492   : > { %v2303_v31 = vmul.f32 0.5, %v5973_v28  ;;  %5980 = vtanh.f32 %v6923_v33  ;;  %v5015_v28 = vor.u32 %v5717_v22, %v5012_v25  ;;  %v4971_v30 = vor.u32 %v5708_v8, %v4970_v24  ;;  %v5706_v12 = vld [vmem:[%s6335_s28 + $0x2c] sm:$0xf]  ;;  %v4972_v13 = vld [vmem:[%s6335_s28 + $0x38] sm:$0xf0] }
 0x493   : > { %v2297_v32 = vadd.f32 0.5, %v2295_v29  ;;  %v5019_v29 = vor.u32 %v5720_v27, %v5018_v26  ;;  %2867 = vmatpush.bf16.msra.mxu0 %v5011_v23  ;;  %v4975_v18 = vor.u32 %v5706_v12, %v4972_v13  ;;  %v4946_v19 = vld [vmem:[%s6335_s28] sm:$0xf]  ;;  %v5703_v20 = vld [vmem:[%s6335_s28 + $0xc] sm:$0xf0]  ;;  %v2344_v23 = vunpack.c.l.bf16 %v2339_v16 }
 0x494   : > { %v2305_v34 = vadd.f32 0.5, %v2303_v31  ;;  %v5718_v31 = vld [vmem:[%s6335_s28 + $0x8c] sm:$0xf]  ;;  %2881 = vmatpush.bf16.msra.mxu1 %v5015_v28  ;;  %v5701_v41 = vld [vmem:[%s6335_s28 + $0x4] sm:$0xf]  ;;  %v4947_v49 = vor.u32 %v5703_v20, %v4946_v19  ;;  %v2346_v25 = vunpack.c.l.bf16 %v2340_v17 }
 0x495   : > { %v5975_v35 = vpop.eup %5974  ;;  %2895 = vmatpush.bf16.msra.mxu2 %v5019_v29  ;;  %v4948_v21 = vld [vmem:[%s6335_s28 + $0x10] sm:$0xf0]  ;;  %v4954_v22 = vld [vmem:[%s6335_s28 + $0x8] sm:$0xf]  ;;  %v5704_v27 = vld [vmem:[%s6335_s28 + $0x14] sm:$0xf0] }
 0x496   : > { %v2319_v36 = vmul.f32 %v2305_v34, %v6855_v7  ;;  %v2321_v37 = vmul.f32 %v5975_v35, %v2297_v32  ;;  %v5977_v62 = vpop.eup %5976  ;;  %v5020_v32 = vld [vmem:[%s6335_s28 + $0x98] sm:$0xf0]  ;;  %v4994_v35 = vld [vmem:[%s6335_s28 + $0x60] sm:$0xf]  ;;  %v4951_v26 = vor.u32 %v5701_v41, %v4948_v21  ;;  %v5702_v28 = vld [vmem:[%s6335_s28 + $0xc] sm:$0xf] }
 0x497   : > { %v5979_v63 = vpop.eup %5978  ;;  %v2312_v60 = vmul.f32 0.5, %v5977_v62  ;;  %v5023_v34 = vor.u32 %v5718_v31, %v5020_v32  ;;  %v4956_v29 = vld [vmem:[%s6335_s28 + $0x18] sm:$0xf0]  ;;  %v2347_v31 = vunpack.c.h.bf16 %v2340_v17  ;;  %v4955_v32 = vor.u32 %v5704_v27, %v4954_v22  ;;  %v5761_v21 = vld [vmem:[%s6335_s28 + $0xe4] sm:$0xf] }
 0x498   : > { %v6927_v5 = vadd.f32 %v2321_v37, %v2319_v36  ;;  %v2313_v38 = vmul.f32 0.5, %v5979_v63  ;;  %v5981_v6 = vpop.eup %5980  ;;  %v5715_v36 = vld [vmem:[%s6335_s28 + $0x6c] sm:$0xf0]  ;;  %v5713_v37 = vld [vmem:[%s6335_s28 + $0x64] sm:$0xf] }
 0x499   : > { %v2314_v39 = vadd.f32 0.5, %v2312_v60  ;;  %2909 = vmatpush.bf16.msra.mxu3 %v5023_v34  ;;  %v4995_v62 = vor.u32 %v5715_v36, %v4994_v35  ;;  %v4996_v63 = vld [vmem:[%s6335_s28 + $0x70] sm:$0xf0]  ;;  %v5002_v60 = vld [vmem:[%s6335_s28 + $0x68] sm:$0xf]  ;;  %v4959_v34 = vor.u32 %v5702_v28, %v4956_v29 }
 0x49a   : > { %5982 = vtanh.f32 %v6927_v5  ;;  %v2315_v40 = vadd.f32 0.5, %v2313_v38  ;;  %v5716_v38 = vld [vmem:[%s6335_s28 + $0x74] sm:$0xf0]  ;;  %v5762_v28 = vld [vmem:[%s6335_s28 + $0xec] sm:$0xf] }
 0x49b   : > { %v2326_v43 = vmul.f32 %v5981_v6, %v2314_v39  ;;  %v4999_v6 = vor.u32 %v5713_v37, %v4996_v63  ;;  %v5003_v39 = vor.u32 %v5716_v38, %v5002_v60  ;;  %2868 = vmatpush.bf16.msra.mxu0 %v4995_v62  ;;  %v2345_v62 = vunpack.c.h.bf16 %v2339_v16  ;;  %v5764_v27 = vld [vmem:[%s6335_s28 + $0xf4] sm:$0xf0]  ;;  %v5196_v29 = vld [vmem:[%s6335_s28 + $0xf8] sm:$0xf0] }
 0x49d   : > { %2882 = vmatpush.bf16.msra.mxu1 %v4999_v6  ;;  %2896 = vmatpush.bf16.msra.mxu2 %v5003_v39  ;;  %v2341_v39 = vld [vmem:[#allocation2 + $0x78] sm:$0xff] }
 0x49e   : > { %v2348_v47 = vunpack.c.l.bf16 %v2341_v39 }
 0x4a0   : > { %v5983_v7 = vpop.eup %5982 }
 0x4a1   : > { %v2327_v44 = vmul.f32 %v5983_v7, %v2315_v40  ;;  %v5714_v40 = vld [vmem:[%s6335_s28 + $0x6c] sm:$0xf]  ;;  %v5004_v7 = vld [vmem:[%s6335_s28 + $0x78] sm:$0xf0]  ;;  %2883 = vmatpush.bf16.msra.mxu1 %v4983_v54  ;;  %2897 = vmatpush.bf16.msra.mxu2 %v4987_v55 }
 0x4a3   : > { %v5850_v45 = vpack.c.bf16 %v2327_v44, %v2326_v43  ;;  %v2338_v43 = vld [vmem:[#allocation2 + $0x60] sm:$0xff]  ;;  %v5007_v44 = vor.u32 %v5714_v40, %v5004_v7 }
 0x4a4   : > { %v2342_v58 = vunpack.c.l.bf16 %v2338_v43  ;;  %v2343_v59 = vunpack.c.h.bf16 %v2338_v43 }
 0x4a5   : > { %5851 = vst [vmem:[#allocation5 + $0x30] sm:$0xff] %v5850_v45   ;;  %2553 = vmatmul.bf16.vlgmr.msrb.gmra.mxu0 %v5850_v45  ;;  %2567 = vmatmul.bf16.vlgmr.msrb.gmra.mxu1 %v5850_v45 }
 0x4a6   : > { %2581 = vmatmul.bf16.vlgmr.msrb.gmra.mxu2 %v5850_v45  ;;  %2595 = vmatmul.bf16.vlgmr.msrb.gmra.mxu3 %v5850_v45  ;;  %v4978_v45 = vld [vmem:[%s6335_s28 + $0x40] sm:$0xf] }
 0x4a7   : > { %2910 = vmatpush.bf16.msra.mxu3 %v5007_v44  ;;  %v4979_v50 = vor.u32 %v5711_v46, %v4978_v45  ;;  %2884 = vmatpush.bf16.msra.mxu1 %v4967_v11 }
 0x4a8   : > { %2898 = vmatpush.bf16.msra.mxu2 %v4971_v30 }
 0x4a9   : > { %2869 = vmatpush.bf16.msra.mxu0 %v4979_v50  ;;  %v2349_v50 = vunpack.c.h.bf16 %v2341_v39  ;;  %v5758_v39 = vld [vmem:[%s6335_s28 + $0xcc] sm:$0xf] }
 0x4ab   : > { %2911 = vmatpush.bf16.msra.mxu3 %v4991_v61  ;;  %2885 = vmatpush.bf16.msra.mxu1 %v4951_v26 }
 0x4ac   : > { %2899 = vmatpush.bf16.msra.mxu2 %v4955_v32  ;;  %v5199_v32 = vor.u32 %v5762_v28, %v5196_v29  ;;  %v5742_v28 = vld [vmem:[%s6335_s28 + $0x4c] sm:$0xf]  ;;  %v5116_v29 = vld [vmem:[%s6335_s28 + $0x58] sm:$0xf0] }
 0x4ad   : > { %2870 = vmatpush.bf16.msra.mxu0 %v4963_v3 }
 0x4af   : > { %2912 = vmatpush.bf16.msra.mxu3 %v4975_v18 }
 0x4b1   : > { %2871 = vmatpush.bf16.msra.mxu0 %v4947_v49  ;;  %v5763_v49 = vld [vmem:[%s6335_s28 + $0xec] sm:$0xf0] }
 0x4b3   : > { %2913 = vmatpush.bf16.msra.mxu3 %v4959_v34  ;;  %v5170_v34 = vld [vmem:[%s6335_s28 + $0xc0] sm:$0xf] }
 0x4b7   : > { %3225 = vmatpush.bf16.msrb.mxu3 %v5199_v32 }
 0x522   : > { %v2554_v9 = vpop.f32.mrf.mxu0  ;;  %v2568_v10 = vpop.f32.mrf.mxu1 }
 0x523   : > { %v2601_v14 = vadd.f32 %v2554_v9, %v2342_v58  ;;  %v2602_v15 = vadd.f32 %v2568_v10, %v2343_v59 }
 0x525   : > { %v2609_v42 = vmul.f32 0.5, %v2601_v14  ;;  %v2617_v48 = vmul.f32 0.5, %v2602_v15 }
 0x527   : > { %5984 = vtanh.f32 %v2609_v42 }
 0x528   : > { %5986 = vtanh.f32 %v2617_v48  ;;  %v5186_v48 = vld [vmem:[%s6335_s28 + $0xe0] sm:$0xf] }
 0x529   : > { %v2582_v35 = vpop.f32.mrf.mxu2  ;;  %v2596_v36 = vpop.f32.mrf.mxu3  ;;  %v5187_v22 = vor.u32 %v5763_v49, %v5186_v48  ;;  %v5743_v48 = vld [vmem:[%s6335_s28 + $0x4c] sm:$0xf0]  ;;  %v5741_v49 = vld [vmem:[%s6335_s28 + $0x44] sm:$0xf] }
 0x52a   : > { %v2603_v37 = vadd.f32 %v2582_v35, %v2344_v23  ;;  %v2556_v63 = vpop.f32.mrf.mxu0  ;;  %v2570_v60 = vpop.f32.mrf.mxu1  ;;  %v2604_v46 = vadd.f32 %v2596_v36, %v2345_v62  ;;  %v5188_v23 = vld [vmem:[%s6335_s28 + $0xf0] sm:$0xf0]  ;;  %v5759_v35 = vld [vmem:[%s6335_s28 + $0xcc] sm:$0xf0]  ;;  %v5757_v36 = vld [vmem:[%s6335_s28 + $0xc4] sm:$0xf] }
 0x52b   : > { %v2605_v38 = vadd.f32 %v2556_v63, %v2346_v25  ;;  %v2606_v6 = vadd.f32 %v2570_v60, %v2347_v31  ;;  %v5194_v25 = vld [vmem:[%s6335_s28 + $0xe8] sm:$0xf]  ;;  %v5191_v26 = vor.u32 %v5761_v21, %v5188_v23  ;;  %3183 = vmatpush.bf16.msrb.mxu0 %v5187_v22  ;;  %v5172_v62 = vld [vmem:[%s6335_s28 + $0xd0] sm:$0xf0]  ;;  %v5760_v60 = vld [vmem:[%s6335_s28 + $0xd4] sm:$0xf0] }
 0x52c   : > { %5988 = vtanh.f32 %v2603_v37  ;;  %v2627_v57 = vmul.f32 0.5, %v2604_v46  ;;  %v5195_v31 = vor.u32 %v5764_v27, %v5194_v25  ;;  %v5171_v37 = vor.u32 %v5759_v35, %v5170_v34  ;;  %v5178_v63 = vld [vmem:[%s6335_s28 + $0xc8] sm:$0xf]  ;;  %v5108_v22 = vld [vmem:[%s6335_s28 + $0x50] sm:$0xf0] }
 0x52d   : > { %v5985_v40 = vpop.eup %5984  ;;  %v2610_v7 = vmul.f32 0.5, %v2605_v38  ;;  %v2618_v43 = vmul.f32 0.5, %v2606_v6  ;;  %3197 = vmatpush.bf16.msrb.mxu1 %v5191_v26  ;;  %v5175_v38 = vor.u32 %v5757_v36, %v5172_v62  ;;  %v5179_v6 = vor.u32 %v5760_v60, %v5178_v63  ;;  %v5114_v23 = vld [vmem:[%s6335_s28 + $0x48] sm:$0xf]  ;;  %v5744_v25 = vld [vmem:[%s6335_s28 + $0x54] sm:$0xf0] }
 0x52e   : > { %v5987_v44 = vpop.eup %5986  ;;  %v2613_v45 = vmul.f32 0.5, %v5985_v40  ;;  %3211 = vmatpush.bf16.msrb.mxu2 %v5195_v31  ;;  %v5180_v40 = vld [vmem:[%s6335_s28 + $0xd8] sm:$0xf0]  ;;  %v5111_v26 = vor.u32 %v5741_v49, %v5108_v22  ;;  %v5115_v27 = vor.u32 %v5744_v25, %v5114_v23  ;;  %v5119_v34 = vor.u32 %v5742_v28, %v5116_v29  ;;  %v5090_v35 = vld [vmem:[%s6335_s28 + $0x20] sm:$0xf] }
 0x52f   : > { %v2621_v51 = vmul.f32 0.5, %v5987_v44  ;;  %5990 = vtanh.f32 %v2610_v7  ;;  %3184 = vmatpush.bf16.msrb.mxu0 %v5171_v37  ;;  %v5183_v7 = vor.u32 %v5758_v39, %v5180_v40  ;;  %v5755_v44 = vld [vmem:[%s6335_s28 + $0xac] sm:$0xf0]  ;;  %v5737_v37 = vld [vmem:[%s6335_s28 + $0x24] sm:$0xf] }
 0x530   : > { %5992 = vtanh.f32 %v2618_v43  ;;  %v2615_v52 = vadd.f32 0.5, %v2613_v45  ;;  %v5154_v43 = vld [vmem:[%s6335_s28 + $0xa0] sm:$0xf]  ;;  %v5753_v45 = vld [vmem:[%s6335_s28 + $0xa4] sm:$0xf] }
 0x531   : > { %v2623_v53 = vadd.f32 0.5, %v2621_v51  ;;  %v2584_v54 = vpop.f32.mrf.mxu2  ;;  %v2598_v55 = vpop.f32.mrf.mxu3  ;;  %3198 = vmatpush.bf16.msrb.mxu1 %v5175_v38  ;;  %3226 = vmatpush.bf16.msrb.mxu3 %v5183_v7  ;;  %v5155_v46 = vor.u32 %v5755_v44, %v5154_v43  ;;  %v5756_v51 = vld [vmem:[%s6335_s28 + $0xb4] sm:$0xf0]  ;;  %v5739_v36 = vld [vmem:[%s6335_s28 + $0x2c] sm:$0xf0] }
 0x532   : > { %v5989_v56 = vpop.eup %5988  ;;  %v2607_v58 = vadd.f32 %v2584_v54, %v2348_v47  ;;  %v2608_v59 = vadd.f32 %v2598_v55, %v2349_v50  ;;  %3212 = vmatpush.bf16.msrb.mxu2 %v5179_v6  ;;  %v5156_v47 = vld [vmem:[%s6335_s28 + $0xb0] sm:$0xf0]  ;;  %v5162_v50 = vld [vmem:[%s6335_s28 + $0xa8] sm:$0xf]  ;;  %v5754_v54 = vld [vmem:[%s6335_s28 + $0xac] sm:$0xf]  ;;  %v5091_v62 = vor.u32 %v5739_v36, %v5090_v35 }
 0x533   : > { %v2637_v1 = vmul.f32 %v2623_v53, %v6923_v33  ;;  %v2639_v2 = vmul.f32 %v5989_v56, %v2615_v52  ;;  %v5159_v52 = vor.u32 %v5753_v45, %v5156_v47  ;;  %v5163_v53 = vor.u32 %v5756_v51, %v5162_v50  ;;  %v5164_v55 = vld [vmem:[%s6335_s28 + $0xb8] sm:$0xf0]  ;;  %3185 = vmatpush.bf16.msrb.mxu0 %v5155_v46  ;;  %v5092_v63 = vld [vmem:[%s6335_s28 + $0x30] sm:$0xf0]  ;;  %v5098_v60 = vld [vmem:[%s6335_s28 + $0x28] sm:$0xf] }
 0x534   : > { %5994 = vtanh.f32 %v2607_v58  ;;  %v2628_v61 = vmul.f32 0.5, %v2608_v59  ;;  %v5167_v56 = vor.u32 %v5754_v54, %v5164_v55  ;;  %v5751_v58 = vld [vmem:[%s6335_s28 + $0x8c] sm:$0xf0]  ;;  %v5749_v59 = vld [vmem:[%s6335_s28 + $0x84] sm:$0xf]  ;;  %v5095_v40 = vor.u32 %v5737_v37, %v5092_v63  ;;  %v2658_v47 = vld [vmem:[#allocation2 + $0x58] sm:$0xff] }
 0x535   : > { %v5991_v0 = vpop.eup %5990  ;;  %5996 = vtanh.f32 %v2627_v57  ;;  %v6995_v9 = vadd.f32 %v2639_v2, %v2637_v1  ;;  %3199 = vmatpush.bf16.msrb.mxu1 %v5159_v52  ;;  %v5138_v57 = vld [vmem:[%s6335_s28 + $0x80] sm:$0xf]  ;;  %v5146_v1 = vld [vmem:[%s6335_s28 + $0x88] sm:$0xf]  ;;  %v5752_v2 = vld [vmem:[%s6335_s28 + $0x94] sm:$0xf0] }
 0x536   : > { %v5993_v3 = vpop.eup %5992  ;;  %v2614_v4 = vmul.f32 0.5, %v5991_v0  ;;  %5998 = vtanh.f32 %v2628_v61  ;;  %3213 = vmatpush.bf16.msrb.mxu2 %v5163_v53  ;;  %3227 = vmatpush.bf16.msrb.mxu3 %v5167_v56  ;;  %v5139_v61 = vor.u32 %v5751_v58, %v5138_v57  ;;  %v5140_v0 = vld [vmem:[%s6335_s28 + $0x90] sm:$0xf0]  ;;  %v5740_v38 = vld [vmem:[%s6335_s28 + $0x34] sm:$0xf0] }
 0x537   : > { %v2622_v24 = vmul.f32 0.5, %v5993_v3  ;;  %6000 = vtanh.f32 %v6995_v9  ;;  %v5143_v3 = vor.u32 %v5749_v59, %v5140_v0  ;;  %v5099_v7 = vor.u32 %v5740_v38, %v5098_v60  ;;  %v5738_v43 = vld [vmem:[%s6335_s28 + $0x2c] sm:$0xf]  ;;  %v5100_v44 = vld [vmem:[%s6335_s28 + $0x38] sm:$0xf0]  ;;  %v2659_v50 = vld [vmem:[#allocation2 + $0x40] sm:$0xff] }
 0x538   : > { %v2616_v8 = vadd.f32 0.5, %v2614_v4  ;;  %v5147_v4 = vor.u32 %v5752_v2, %v5146_v1  ;;  %3186 = vmatpush.bf16.msrb.mxu0 %v5139_v61  ;;  %v5103_v51 = vor.u32 %v5738_v43, %v5100_v44  ;;  %v5074_v52 = vld [vmem:[%s6335_s28] sm:$0xf]  ;;  %v5735_v53 = vld [vmem:[%s6335_s28 + $0xc] sm:$0xf0]  ;;  %v2663_v61 = vunpack.c.l.bf16 %v2658_v47 }
 0x539   : > { %v2624_v10 = vadd.f32 0.5, %v2622_v24  ;;  %v5750_v24 = vld [vmem:[%s6335_s28 + $0x8c] sm:$0xf]  ;;  %3200 = vmatpush.bf16.msrb.mxu1 %v5143_v3  ;;  %v5733_v54 = vld [vmem:[%s6335_s28 + $0x4] sm:$0xf]  ;;  %v5075_v57 = vor.u32 %v5735_v53, %v5074_v52  ;;  %v2665_v0 = vunpack.c.l.bf16 %v2659_v50 }
 0x53a   : > { %v5995_v11 = vpop.eup %5994  ;;  %3214 = vmatpush.bf16.msrb.mxu2 %v5147_v4  ;;  %v5076_v58 = vld [vmem:[%s6335_s28 + $0x10] sm:$0xf0]  ;;  %v5082_v59 = vld [vmem:[%s6335_s28 + $0x8] sm:$0xf]  ;;  %v5736_v2 = vld [vmem:[%s6335_s28 + $0x14] sm:$0xf0] }
 0x53b   : > { %v2638_v30 = vmul.f32 %v2624_v10, %v6927_v5  ;;  %v2640_v12 = vmul.f32 %v5995_v11, %v2616_v8  ;;  %v5997_v13 = vpop.eup %5996  ;;  %v5148_v8 = vld [vmem:[%s6335_s28 + $0x98] sm:$0xf0]  ;;  %v5122_v11 = vld [vmem:[%s6335_s28 + $0x60] sm:$0xf]  ;;  %v5079_v1 = vor.u32 %v5733_v54, %v5076_v58  ;;  %v5734_v3 = vld [vmem:[%s6335_s28 + $0xc] sm:$0xf] }
 0x53c   : > { %v5999_v14 = vpop.eup %5998  ;;  %v2631_v33 = vmul.f32 0.5, %v5997_v13  ;;  %v5151_v10 = vor.u32 %v5750_v24, %v5148_v8  ;;  %v5084_v4 = vld [vmem:[%s6335_s28 + $0x18] sm:$0xf0]  ;;  %v2666_v24 = vunpack.c.h.bf16 %v2659_v50  ;;  %v5083_v8 = vor.u32 %v5736_v2, %v5082_v59  ;;  %v5793_v58 = vld [vmem:[%s6335_s28 + $0xe4] sm:$0xf] }
 0x53d   : > { %v6999_v15 = vadd.f32 %v2640_v12, %v2638_v30  ;;  %v2632_v16 = vmul.f32 0.5, %v5999_v14  ;;  %v6001_v17 = vpop.eup %6000  ;;  %v5747_v30 = vld [vmem:[%s6335_s28 + $0x6c] sm:$0xf0]  ;;  %v5745_v12 = vld [vmem:[%s6335_s28 + $0x64] sm:$0xf] }
 0x53e   : > { %v2633_v18 = vadd.f32 0.5, %v2631_v33  ;;  %3228 = vmatpush.bf16.msrb.mxu3 %v5151_v10  ;;  %v5123_v13 = vor.u32 %v5747_v30, %v5122_v11  ;;  %v5124_v14 = vld [vmem:[%s6335_s28 + $0x70] sm:$0xf0]  ;;  %v5130_v33 = vld [vmem:[%s6335_s28 + $0x68] sm:$0xf]  ;;  %v5087_v10 = vor.u32 %v5734_v3, %v5084_v4 }
 0x53f   : > { %6002 = vtanh.f32 %v6999_v15  ;;  %v2634_v19 = vadd.f32 0.5, %v2632_v16  ;;  %v5748_v16 = vld [vmem:[%s6335_s28 + $0x74] sm:$0xf0]  ;;  %v5794_v3 = vld [vmem:[%s6335_s28 + $0xec] sm:$0xf] }
 0x540   : > { %v2645_v20 = vmul.f32 %v6001_v17, %v2633_v18  ;;  %v5127_v17 = vor.u32 %v5745_v12, %v5124_v14  ;;  %v5131_v18 = vor.u32 %v5748_v16, %v5130_v33  ;;  %3187 = vmatpush.bf16.msrb.mxu0 %v5123_v13  ;;  %v2664_v13 = vunpack.c.h.bf16 %v2658_v47  ;;  %v5796_v2 = vld [vmem:[%s6335_s28 + $0xf4] sm:$0xf0]  ;;  %v5324_v4 = vld [vmem:[%s6335_s28 + $0xf8] sm:$0xf0] }
 0x542   : > { %3201 = vmatpush.bf16.msrb.mxu1 %v5127_v17  ;;  %3215 = vmatpush.bf16.msrb.mxu2 %v5131_v18  ;;  %v2660_v18 = vld [vmem:[#allocation2 + $0xc8] sm:$0xff] }
 0x543   : > { %v2667_v49 = vunpack.c.l.bf16 %v2660_v18 }
 0x545   : > { %v6003_v5 = vpop.eup %6002 }
 0x546   : > { %v2646_v41 = vmul.f32 %v6003_v5, %v2634_v19  ;;  %v5746_v19 = vld [vmem:[%s6335_s28 + $0x6c] sm:$0xf]  ;;  %v5132_v5 = vld [vmem:[%s6335_s28 + $0x78] sm:$0xf0]  ;;  %3202 = vmatpush.bf16.msrb.mxu1 %v5111_v26  ;;  %3216 = vmatpush.bf16.msrb.mxu2 %v5115_v27 }
 0x548   : > { %v5855_v42 = vpack.c.bf16 %v2646_v41, %v2645_v20  ;;  %v2657_v20 = vld [vmem:[#allocation2 + $0x38] sm:$0xff]  ;;  %v5135_v41 = vor.u32 %v5746_v19, %v5132_v5 }
 0x549   : > { %v2661_v31 = vunpack.c.l.bf16 %v2657_v20  ;;  %v2662_v32 = vunpack.c.h.bf16 %v2657_v20 }
 0x54a   : > { %5856 = vst [vmem:[#allocation5 + $0x28] sm:$0xff] %v5855_v42   ;;  %2872 = vmatmul.bf16.vlgmr.msra.gmra.mxu0 %v5855_v42  ;;  %2886 = vmatmul.bf16.vlgmr.msra.gmra.mxu1 %v5855_v42 }
 0x54b   : > { %2900 = vmatmul.bf16.vlgmr.msra.gmra.mxu2 %v5855_v42  ;;  %2914 = vmatmul.bf16.vlgmr.msra.gmra.mxu3 %v5855_v42  ;;  %v5106_v42 = vld [vmem:[%s6335_s28 + $0x40] sm:$0xf] }
 0x54c   : > { %3229 = vmatpush.bf16.msrb.mxu3 %v5135_v41  ;;  %v5107_v21 = vor.u32 %v5743_v48, %v5106_v42  ;;  %3203 = vmatpush.bf16.msrb.mxu1 %v5095_v40 }
 0x54d   : > { %3217 = vmatpush.bf16.msrb.mxu2 %v5099_v7 }
 0x54e   : > { %3188 = vmatpush.bf16.msrb.mxu0 %v5107_v21  ;;  %v2668_v21 = vunpack.c.h.bf16 %v2660_v18  ;;  %v5790_v18 = vld [vmem:[%s6335_s28 + $0xcc] sm:$0xf] }
 0x550   : > { %3230 = vmatpush.bf16.msrb.mxu3 %v5119_v34  ;;  %3204 = vmatpush.bf16.msrb.mxu1 %v5079_v1 }
 0x551   : > { %3218 = vmatpush.bf16.msrb.mxu2 %v5083_v8  ;;  %v5327_v8 = vor.u32 %v5794_v3, %v5324_v4  ;;  %v5774_v3 = vld [vmem:[%s6335_s28 + $0x4c] sm:$0xf]  ;;  %v5244_v4 = vld [vmem:[%s6335_s28 + $0x58] sm:$0xf0] }
 0x552   : > { %3189 = vmatpush.bf16.msrb.mxu0 %v5091_v62 }
 0x554   : > { %3231 = vmatpush.bf16.msrb.mxu3 %v5103_v51 }
 0x556   : > { %3190 = vmatpush.bf16.msrb.mxu0 %v5075_v57  ;;  %v5795_v57 = vld [vmem:[%s6335_s28 + $0xec] sm:$0xf0] }
 0x558   : > { %3232 = vmatpush.bf16.msrb.mxu3 %v5087_v10  ;;  %v5298_v10 = vld [vmem:[%s6335_s28 + $0xc0] sm:$0xf] }
 0x55c   : > { %3544 = vmatpush.bf16.msra.mxu3 %v5327_v8 }
 0x5c7   : > { %v2873_v6 = vpop.f32.mrf.mxu0  ;;  %v2887_v39 = vpop.f32.mrf.mxu1 }
 0x5c8   : > { %v2920_v45 = vadd.f32 %v2873_v6, %v2661_v31  ;;  %v2921_v46 = vadd.f32 %v2887_v39, %v2662_v32 }
 0x5ca   : > { %v2928_v55 = vmul.f32 0.5, %v2920_v45  ;;  %v2936_v56 = vmul.f32 0.5, %v2921_v46 }
 0x5cc   : > { %6004 = vtanh.f32 %v2928_v55 }
 0x5cd   : > { %6006 = vtanh.f32 %v2936_v56  ;;  %v5314_v56 = vld [vmem:[%s6335_s28 + $0xe0] sm:$0xf] }
 0x5ce   : > { %v2901_v11 = vpop.f32.mrf.mxu2  ;;  %v2915_v30 = vpop.f32.mrf.mxu3  ;;  %v5315_v59 = vor.u32 %v5795_v57, %v5314_v56  ;;  %v5775_v56 = vld [vmem:[%s6335_s28 + $0x4c] sm:$0xf0]  ;;  %v5773_v57 = vld [vmem:[%s6335_s28 + $0x44] sm:$0xf] }
 0x5cf   : > { %v2922_v12 = vadd.f32 %v2901_v11, %v2663_v61  ;;  %v2875_v14 = vpop.f32.mrf.mxu0  ;;  %v2889_v33 = vpop.f32.mrf.mxu1  ;;  %v2923_v48 = vadd.f32 %v2915_v30, %v2664_v13  ;;  %v5316_v61 = vld [vmem:[%s6335_s28 + $0xf0] sm:$0xf0]  ;;  %v5791_v11 = vld [vmem:[%s6335_s28 + $0xcc] sm:$0xf0]  ;;  %v5789_v30 = vld [vmem:[%s6335_s28 + $0xc4] sm:$0xf] }
 0x5d0   : > { %v2924_v16 = vadd.f32 %v2875_v14, %v2665_v0  ;;  %v2925_v17 = vadd.f32 %v2889_v33, %v2666_v24  ;;  %v5322_v0 = vld [vmem:[%s6335_s28 + $0xe8] sm:$0xf]  ;;  %v5319_v1 = vor.u32 %v5793_v58, %v5316_v61  ;;  %3502 = vmatpush.bf16.msra.mxu0 %v5315_v59  ;;  %v5300_v13 = vld [vmem:[%s6335_s28 + $0xd0] sm:$0xf0]  ;;  %v5792_v33 = vld [vmem:[%s6335_s28 + $0xd4] sm:$0xf0] }
 0x5d1   : > { %6008 = vtanh.f32 %v2922_v12  ;;  %v2946_v29 = vmul.f32 0.5, %v2923_v48  ;;  %v5323_v24 = vor.u32 %v5796_v2, %v5322_v0  ;;  %v5299_v12 = vor.u32 %v5791_v11, %v5298_v10  ;;  %v5306_v14 = vld [vmem:[%s6335_s28 + $0xc8] sm:$0xf]  ;;  %v5236_v59 = vld [vmem:[%s6335_s28 + $0x50] sm:$0xf0] }
 0x5d2   : > { %v6005_v19 = vpop.eup %6004  ;;  %v2929_v5 = vmul.f32 0.5, %v2924_v16  ;;  %v2937_v20 = vmul.f32 0.5, %v2925_v17  ;;  %3516 = vmatpush.bf16.msra.mxu1 %v5319_v1  ;;  %v5303_v16 = vor.u32 %v5789_v30, %v5300_v13  ;;  %v5307_v17 = vor.u32 %v5792_v33, %v5306_v14  ;;  %v5242_v61 = vld [vmem:[%s6335_s28 + $0x48] sm:$0xf]  ;;  %v5776_v0 = vld [vmem:[%s6335_s28 + $0x54] sm:$0xf0] }
 0x5d3   : > { %v6007_v41 = vpop.eup %6006  ;;  %v2932_v42 = vmul.f32 0.5, %v6005_v19  ;;  %3530 = vmatpush.bf16.msra.mxu2 %v5323_v24  ;;  %v5308_v19 = vld [vmem:[%s6335_s28 + $0xd8] sm:$0xf0]  ;;  %v5239_v1 = vor.u32 %v5773_v57, %v5236_v59  ;;  %v5243_v2 = vor.u32 %v5776_v0, %v5242_v61  ;;  %v5247_v10 = vor.u32 %v5774_v3, %v5244_v4  ;;  %v5218_v11 = vld [vmem:[%s6335_s28 + $0x20] sm:$0xf] }
 0x5d4   : > { %v2940_v22 = vmul.f32 0.5, %v6007_v41  ;;  %6010 = vtanh.f32 %v2929_v5  ;;  %3503 = vmatpush.bf16.msra.mxu0 %v5299_v12  ;;  %v5311_v5 = vor.u32 %v5790_v18, %v5308_v19  ;;  %v5787_v41 = vld [vmem:[%s6335_s28 + $0xac] sm:$0xf0]  ;;  %v5769_v12 = vld [vmem:[%s6335_s28 + $0x24] sm:$0xf] }
 0x5d5   : > { %6012 = vtanh.f32 %v2937_v20  ;;  %v2934_v23 = vadd.f32 0.5, %v2932_v42  ;;  %v5282_v20 = vld [vmem:[%s6335_s28 + $0xa0] sm:$0xf]  ;;  %v5785_v42 = vld [vmem:[%s6335_s28 + $0xa4] sm:$0xf] }
 0x5d6   : > { %v2942_v25 = vadd.f32 0.5, %v2940_v22  ;;  %v2903_v26 = vpop.f32.mrf.mxu2  ;;  %v2917_v27 = vpop.f32.mrf.mxu3  ;;  %3517 = vmatpush.bf16.msra.mxu1 %v5303_v16  ;;  %3545 = vmatpush.bf16.msra.mxu3 %v5311_v5  ;;  %v5283_v48 = vor.u32 %v5787_v41, %v5282_v20  ;;  %v5788_v22 = vld [vmem:[%s6335_s28 + $0xb4] sm:$0xf0]  ;;  %v5771_v30 = vld [vmem:[%s6335_s28 + $0x2c] sm:$0xf0] }
 0x5d7   : > { %v6009_v28 = vpop.eup %6008  ;;  %v2926_v31 = vadd.f32 %v2903_v26, %v2667_v49  ;;  %v2927_v32 = vadd.f32 %v2917_v27, %v2668_v21  ;;  %3531 = vmatpush.bf16.msra.mxu2 %v5307_v17  ;;  %v5284_v49 = vld [vmem:[%s6335_s28 + $0xb0] sm:$0xf0]  ;;  %v5290_v21 = vld [vmem:[%s6335_s28 + $0xa8] sm:$0xf]  ;;  %v5786_v26 = vld [vmem:[%s6335_s28 + $0xac] sm:$0xf]  ;;  %v5219_v13 = vor.u32 %v5771_v30, %v5218_v11 }
 0x5d8   : > { %v2956_v36 = vmul.f32 %v2942_v25, %v6995_v9  ;;  %v2958_v37 = vmul.f32 %v6009_v28, %v2934_v23  ;;  %v5287_v23 = vor.u32 %v5785_v42, %v5284_v49  ;;  %v5291_v25 = vor.u32 %v5788_v22, %v5290_v21  ;;  %v5292_v27 = vld [vmem:[%s6335_s28 + $0xb8] sm:$0xf0]  ;;  %3504 = vmatpush.bf16.msra.mxu0 %v5283_v48  ;;  %v5220_v14 = vld [vmem:[%s6335_s28 + $0x30] sm:$0xf0]  ;;  %v5226_v33 = vld [vmem:[%s6335_s28 + $0x28] sm:$0xf] }
 0x5d9   : > { %6014 = vtanh.f32 %v2926_v31  ;;  %v2947_v34 = vmul.f32 0.5, %v2927_v32  ;;  %v5295_v28 = vor.u32 %v5786_v26, %v5292_v27  ;;  %v5783_v31 = vld [vmem:[%s6335_s28 + $0x8c] sm:$0xf0]  ;;  %v5781_v32 = vld [vmem:[%s6335_s28 + $0x84] sm:$0xf]  ;;  %v5223_v19 = vor.u32 %v5769_v12, %v5220_v14 }
 0x5da   : > { %v6011_v35 = vpop.eup %6010  ;;  %6016 = vtanh.f32 %v2946_v29  ;;  %v7067_v6 = vadd.f32 %v2958_v37, %v2956_v36  ;;  %3518 = vmatpush.bf16.msra.mxu1 %v5287_v23  ;;  %v5266_v29 = vld [vmem:[%s6335_s28 + $0x80] sm:$0xf]  ;;  %v5274_v36 = vld [vmem:[%s6335_s28 + $0x88] sm:$0xf]  ;;  %v5784_v37 = vld [vmem:[%s6335_s28 + $0x94] sm:$0xf0] }
 0x5db   : > { %v6013_v62 = vpop.eup %6012  ;;  %v2933_v63 = vmul.f32 0.5, %v6011_v35  ;;  %6018 = vtanh.f32 %v2947_v34  ;;  %3532 = vmatpush.bf16.msra.mxu2 %v5291_v25  ;;  %3546 = vmatpush.bf16.msra.mxu3 %v5295_v28  ;;  %v5267_v34 = vor.u32 %v5783_v31, %v5266_v29  ;;  %v5268_v35 = vld [vmem:[%s6335_s28 + $0x90] sm:$0xf0]  ;;  %v5772_v16 = vld [vmem:[%s6335_s28 + $0x34] sm:$0xf0]  ;;  %v2977_v49 = vld [vmem:[#allocation2 + $0x90] sm:$0xff] }
 0x5dc   : > { %v2941_v60 = vmul.f32 0.5, %v6013_v62  ;;  %6020 = vtanh.f32 %v7067_v6  ;;  %v5271_v62 = vor.u32 %v5781_v32, %v5268_v35  ;;  %v5227_v5 = vor.u32 %v5772_v16, %v5226_v33  ;;  %v5770_v20 = vld [vmem:[%s6335_s28 + $0x2c] sm:$0xf]  ;;  %v5228_v41 = vld [vmem:[%s6335_s28 + $0x38] sm:$0xf0]  ;;  %v2978_v21 = vld [vmem:[#allocation2 + $0x70] sm:$0xff] }
 0x5dd   : > { %v2935_v38 = vadd.f32 0.5, %v2933_v63  ;;  %v5275_v63 = vor.u32 %v5784_v37, %v5274_v36  ;;  %3505 = vmatpush.bf16.msra.mxu0 %v5267_v34  ;;  %v5231_v22 = vor.u32 %v5770_v20, %v5228_v41  ;;  %v5202_v23 = vld [vmem:[%s6335_s28] sm:$0xf]  ;;  %v5767_v25 = vld [vmem:[%s6335_s28 + $0xc] sm:$0xf0]  ;;  %v2982_v34 = vunpack.c.l.bf16 %v2977_v49 }
 0x5de   : > { %v2943_v39 = vadd.f32 0.5, %v2941_v60  ;;  %v5782_v60 = vld [vmem:[%s6335_s28 + $0x8c] sm:$0xf]  ;;  %3519 = vmatpush.bf16.msra.mxu1 %v5271_v62  ;;  %v5765_v26 = vld [vmem:[%s6335_s28 + $0x4] sm:$0xf]  ;;  %v5203_v29 = vor.u32 %v5767_v25, %v5202_v23  ;;  %v2984_v35 = vunpack.c.l.bf16 %v2978_v21 }
 0x5df   : > { %v6015_v40 = vpop.eup %6014  ;;  %3533 = vmatpush.bf16.msra.mxu2 %v5275_v63  ;;  %v5204_v31 = vld [vmem:[%s6335_s28 + $0x10] sm:$0xf0]  ;;  %v5210_v32 = vld [vmem:[%s6335_s28 + $0x8] sm:$0xf]  ;;  %v5768_v37 = vld [vmem:[%s6335_s28 + $0x14] sm:$0xf0] }
 0x5e0   : > { %v2957_v7 = vmul.f32 %v2943_v39, %v6999_v15  ;;  %v2959_v43 = vmul.f32 %v6015_v40, %v2935_v38  ;;  %v6017_v44 = vpop.eup %6016  ;;  %v5276_v38 = vld [vmem:[%s6335_s28 + $0x98] sm:$0xf0]  ;;  %v5250_v40 = vld [vmem:[%s6335_s28 + $0x60] sm:$0xf]  ;;  %v5207_v36 = vor.u32 %v5765_v26, %v5204_v31  ;;  %v5766_v62 = vld [vmem:[%s6335_s28 + $0xc] sm:$0xf] }
 0x5e1   : > { %v6019_v45 = vpop.eup %6018  ;;  %v2950_v9 = vmul.f32 0.5, %v6017_v44  ;;  %v5279_v39 = vor.u32 %v5782_v60, %v5276_v38  ;;  %v5212_v63 = vld [vmem:[%s6335_s28 + $0x18] sm:$0xf0]  ;;  %v2985_v60 = vunpack.c.h.bf16 %v2978_v21  ;;  %v5211_v38 = vor.u32 %v5768_v37, %v5210_v32  ;;  %v5825_v31 = vld [vmem:[%s6335_s28 + $0xe4] sm:$0xf] }
 0x5e2   : > { %v7071_v46 = vadd.f32 %v2959_v43, %v2957_v7  ;;  %v2951_v47 = vmul.f32 0.5, %v6019_v45  ;;  %v6021_v50 = vpop.eup %6020  ;;  %v5779_v7 = vld [vmem:[%s6335_s28 + $0x6c] sm:$0xf0]  ;;  %v5777_v43 = vld [vmem:[%s6335_s28 + $0x64] sm:$0xf] }
 0x5e3   : > { %v2952_v51 = vadd.f32 0.5, %v2950_v9  ;;  %3547 = vmatpush.bf16.msra.mxu3 %v5279_v39  ;;  %v5251_v44 = vor.u32 %v5779_v7, %v5250_v40  ;;  %v5252_v45 = vld [vmem:[%s6335_s28 + $0x70] sm:$0xf0]  ;;  %v5258_v9 = vld [vmem:[%s6335_s28 + $0x68] sm:$0xf]  ;;  %v5215_v39 = vor.u32 %v5766_v62, %v5212_v63 }
 0x5e4   : > { %6022 = vtanh.f32 %v7071_v46  ;;  %v2953_v52 = vadd.f32 0.5, %v2951_v47  ;;  %v5780_v47 = vld [vmem:[%s6335_s28 + $0x74] sm:$0xf0]  ;;  %v5826_v62 = vld [vmem:[%s6335_s28 + $0xec] sm:$0xf] }
 0x5e5   : > { %v2964_v53 = vmul.f32 %v6021_v50, %v2952_v51  ;;  %v5255_v50 = vor.u32 %v5777_v43, %v5252_v45  ;;  %v5259_v51 = vor.u32 %v5780_v47, %v5258_v9  ;;  %3506 = vmatpush.bf16.msra.mxu0 %v5251_v44  ;;  %v2983_v44 = vunpack.c.h.bf16 %v2977_v49  ;;  %v5828_v37 = vld [vmem:[%s6335_s28 + $0xf4] sm:$0xf0]  ;;  %v5452_v63 = vld [vmem:[%s6335_s28 + $0xf8] sm:$0xf0] }
 0x5e7   : > { %3520 = vmatpush.bf16.msra.mxu1 %v5255_v50  ;;  %3534 = vmatpush.bf16.msra.mxu2 %v5259_v51  ;;  %v2979_v51 = vld [vmem:[#allocation2 + $0xc0] sm:$0xff] }
 0x5e8   : > { %v2986_v57 = vunpack.c.l.bf16 %v2979_v51 }
 0x5ea   : > { %v6023_v15 = vpop.eup %6022 }
 0x5eb   : > { %v2965_v54 = vmul.f32 %v6023_v15, %v2953_v52  ;;  %v5778_v52 = vld [vmem:[%s6335_s28 + $0x6c] sm:$0xf]  ;;  %v5260_v15 = vld [vmem:[%s6335_s28 + $0x78] sm:$0xf0]  ;;  %3521 = vmatpush.bf16.msra.mxu1 %v5239_v1  ;;  %3535 = vmatpush.bf16.msra.mxu2 %v5243_v2 }
 0x5ed   : > { %v5860_v55 = vpack.c.bf16 %v2965_v54, %v2964_v53  ;;  %v2976_v53 = vld [vmem:[#allocation2 + $0xe0] sm:$0xff]  ;;  %v5263_v54 = vor.u32 %v5778_v52, %v5260_v15 }
 0x5ee   : > { %v2980_v24 = vunpack.c.l.bf16 %v2976_v53  ;;  %v2981_v8 = vunpack.c.h.bf16 %v2976_v53 }
 0x5ef   : > { %5861 = vst [vmem:[#allocation5 + $0x18] sm:$0xff] %v5860_v55   ;;  %3191 = vmatmul.bf16.vlgmr.msrb.gmra.mxu0 %v5860_v55  ;;  %3205 = vmatmul.bf16.vlgmr.msrb.gmra.mxu1 %v5860_v55 }
 0x5f0   : > { %3219 = vmatmul.bf16.vlgmr.msrb.gmra.mxu2 %v5860_v55  ;;  %3233 = vmatmul.bf16.vlgmr.msrb.gmra.mxu3 %v5860_v55  ;;  %v5234_v55 = vld [vmem:[%s6335_s28 + $0x40] sm:$0xf] }
 0x5f1   : > { %3548 = vmatpush.bf16.msra.mxu3 %v5263_v54  ;;  %v5235_v58 = vor.u32 %v5775_v56, %v5234_v55  ;;  %3522 = vmatpush.bf16.msra.mxu1 %v5223_v19 }
 0x5f2   : > { %3536 = vmatpush.bf16.msra.mxu2 %v5227_v5 }
 0x5f3   : > { %3507 = vmatpush.bf16.msra.mxu0 %v5235_v58  ;;  %v2987_v58 = vunpack.c.h.bf16 %v2979_v51  ;;  %v5822_v51 = vld [vmem:[%s6335_s28 + $0xcc] sm:$0xf] }
 0x5f5   : > { %3549 = vmatpush.bf16.msra.mxu3 %v5247_v10  ;;  %3523 = vmatpush.bf16.msra.mxu1 %v5207_v36 }
 0x5f6   : > { %3537 = vmatpush.bf16.msra.mxu2 %v5211_v38  ;;  %v5455_v38 = vor.u32 %v5826_v62, %v5452_v63  ;;  %v5806_v62 = vld [vmem:[%s6335_s28 + $0x4c] sm:$0xf]  ;;  %v5372_v63 = vld [vmem:[%s6335_s28 + $0x58] sm:$0xf0] }
 0x5f7   : > { %3508 = vmatpush.bf16.msra.mxu0 %v5219_v13 }
 0x5f9   : > { %3550 = vmatpush.bf16.msra.mxu3 %v5231_v22 }
 0x5fb   : > { %3509 = vmatpush.bf16.msra.mxu0 %v5203_v29  ;;  %v5827_v29 = vld [vmem:[%s6335_s28 + $0xec] sm:$0xf0] }
 0x5fd   : > { %3551 = vmatpush.bf16.msra.mxu3 %v5215_v39  ;;  %v5426_v39 = vld [vmem:[%s6335_s28 + $0xc0] sm:$0xf] }
 0x601   : > { %3863 = vmatpush.bf16.msrb.mxu3 %v5455_v38 }
 0x66c   : > { %v3192_v17 = vpop.f32.mrf.mxu0  ;;  %v3206_v18 = vpop.f32.mrf.mxu1 }
 0x66d   : > { %v3239_v42 = vadd.f32 %v3192_v17, %v2980_v24  ;;  %v3240_v48 = vadd.f32 %v3206_v18, %v2981_v8 }
 0x66f   : > { %v3247_v27 = vmul.f32 0.5, %v3239_v42  ;;  %v3255_v28 = vmul.f32 0.5, %v3240_v48 }
 0x671   : > { %6024 = vtanh.f32 %v3247_v27 }
 0x672   : > { %6026 = vtanh.f32 %v3255_v28  ;;  %v5442_v28 = vld [vmem:[%s6335_s28 + $0xe0] sm:$0xf] }
 0x673   : > { %v3220_v40 = vpop.f32.mrf.mxu2  ;;  %v3234_v7 = vpop.f32.mrf.mxu3  ;;  %v5443_v32 = vor.u32 %v5827_v29, %v5442_v28  ;;  %v5807_v28 = vld [vmem:[%s6335_s28 + $0x4c] sm:$0xf0]  ;;  %v5805_v29 = vld [vmem:[%s6335_s28 + $0x44] sm:$0xf] }
 0x674   : > { %v3241_v43 = vadd.f32 %v3220_v40, %v2982_v34  ;;  %v3194_v45 = vpop.f32.mrf.mxu0  ;;  %v3208_v9 = vpop.f32.mrf.mxu1  ;;  %v3242_v56 = vadd.f32 %v3234_v7, %v2983_v44  ;;  %v5444_v34 = vld [vmem:[%s6335_s28 + $0xf0] sm:$0xf0]  ;;  %v5823_v40 = vld [vmem:[%s6335_s28 + $0xcc] sm:$0xf0]  ;;  %v5821_v7 = vld [vmem:[%s6335_s28 + $0xc4] sm:$0xf] }
 0x675   : > { %v3243_v47 = vadd.f32 %v3194_v45, %v2984_v35  ;;  %v3244_v50 = vadd.f32 %v3208_v9, %v2985_v60  ;;  %v5450_v35 = vld [vmem:[%s6335_s28 + $0xe8] sm:$0xf]  ;;  %v5447_v36 = vor.u32 %v5825_v31, %v5444_v34  ;;  %3821 = vmatpush.bf16.msrb.mxu0 %v5443_v32  ;;  %v5428_v44 = vld [vmem:[%s6335_s28 + $0xd0] sm:$0xf0]  ;;  %v5824_v9 = vld [vmem:[%s6335_s28 + $0xd4] sm:$0xf0] }
 0x676   : > { %6028 = vtanh.f32 %v3241_v43  ;;  %v3265_v4 = vmul.f32 0.5, %v3242_v56  ;;  %v5451_v60 = vor.u32 %v5828_v37, %v5450_v35  ;;  %v5427_v43 = vor.u32 %v5823_v40, %v5426_v39  ;;  %v5434_v45 = vld [vmem:[%s6335_s28 + $0xc8] sm:$0xf]  ;;  %v5364_v32 = vld [vmem:[%s6335_s28 + $0x50] sm:$0xf0] }
 0x677   : > { %v6025_v52 = vpop.eup %6024  ;;  %v3248_v15 = vmul.f32 0.5, %v3243_v47  ;;  %v3256_v53 = vmul.f32 0.5, %v3244_v50  ;;  %3835 = vmatpush.bf16.msrb.mxu1 %v5447_v36  ;;  %v5431_v47 = vor.u32 %v5821_v7, %v5428_v44  ;;  %v5435_v50 = vor.u32 %v5824_v9, %v5434_v45  ;;  %v5370_v34 = vld [vmem:[%s6335_s28 + $0x48] sm:$0xf]  ;;  %v5808_v35 = vld [vmem:[%s6335_s28 + $0x54] sm:$0xf0] }
 0x678   : > { %v6027_v54 = vpop.eup %6026  ;;  %v3251_v55 = vmul.f32 0.5, %v6025_v52  ;;  %3849 = vmatpush.bf16.msrb.mxu2 %v5451_v60  ;;  %v5436_v52 = vld [vmem:[%s6335_s28 + $0xd8] sm:$0xf0]  ;;  %v5367_v36 = vor.u32 %v5805_v29, %v5364_v32  ;;  %v5371_v37 = vor.u32 %v5808_v35, %v5370_v34  ;;  %v5375_v39 = vor.u32 %v5806_v62, %v5372_v63  ;;  %v5346_v40 = vld [vmem:[%s6335_s28 + $0x20] sm:$0xf] }
 0x679   : > { %v3259_v59 = vmul.f32 0.5, %v6027_v54  ;;  %6030 = vtanh.f32 %v3248_v15  ;;  %3822 = vmatpush.bf16.msrb.mxu0 %v5427_v43  ;;  %v5439_v15 = vor.u32 %v5822_v51, %v5436_v52  ;;  %v5819_v54 = vld [vmem:[%s6335_s28 + $0xac] sm:$0xf0]  ;;  %v5801_v43 = vld [vmem:[%s6335_s28 + $0x24] sm:$0xf] }
 0x67a   : > { %6032 = vtanh.f32 %v3256_v53  ;;  %v3253_v61 = vadd.f32 0.5, %v3251_v55  ;;  %v5410_v53 = vld [vmem:[%s6335_s28 + $0xa0] sm:$0xf]  ;;  %v5817_v55 = vld [vmem:[%s6335_s28 + $0xa4] sm:$0xf] }
 0x67b   : > { %v3261_v0 = vadd.f32 0.5, %v3259_v59  ;;  %v3222_v1 = vpop.f32.mrf.mxu2  ;;  %v3236_v2 = vpop.f32.mrf.mxu3  ;;  %3836 = vmatpush.bf16.msrb.mxu1 %v5431_v47  ;;  %3864 = vmatpush.bf16.msrb.mxu3 %v5439_v15  ;;  %v5411_v56 = vor.u32 %v5819_v54, %v5410_v53  ;;  %v5820_v59 = vld [vmem:[%s6335_s28 + $0xb4] sm:$0xf0]  ;;  %v5803_v7 = vld [vmem:[%s6335_s28 + $0x2c] sm:$0xf0] }
 0x67c   : > { %v6029_v3 = vpop.eup %6028  ;;  %v3245_v24 = vadd.f32 %v3222_v1, %v2986_v57  ;;  %v3246_v8 = vadd.f32 %v3236_v2, %v2987_v58  ;;  %3850 = vmatpush.bf16.msrb.mxu2 %v5435_v50  ;;  %v5412_v57 = vld [vmem:[%s6335_s28 + $0xb0] sm:$0xf0]  ;;  %v5418_v58 = vld [vmem:[%s6335_s28 + $0xa8] sm:$0xf]  ;;  %v5818_v1 = vld [vmem:[%s6335_s28 + $0xac] sm:$0xf]  ;;  %v5347_v44 = vor.u32 %v5803_v7, %v5346_v40 }
 0x67d   : > { %v3275_v30 = vmul.f32 %v3261_v0, %v7067_v6  ;;  %v3277_v12 = vmul.f32 %v6029_v3, %v3253_v61  ;;  %v5415_v61 = vor.u32 %v5817_v55, %v5412_v57  ;;  %v5419_v0 = vor.u32 %v5820_v59, %v5418_v58  ;;  %v5420_v2 = vld [vmem:[%s6335_s28 + $0xb8] sm:$0xf0]  ;;  %3823 = vmatpush.bf16.msrb.mxu0 %v5411_v56  ;;  %v5348_v45 = vld [vmem:[%s6335_s28 + $0x30] sm:$0xf0]  ;;  %v5354_v9 = vld [vmem:[%s6335_s28 + $0x28] sm:$0xf] }
 0x67e   : > { %6034 = vtanh.f32 %v3245_v24  ;;  %v3266_v10 = vmul.f32 0.5, %v3246_v8  ;;  %v5423_v3 = vor.u32 %v5818_v1, %v5420_v2  ;;  %v5815_v24 = vld [vmem:[%s6335_s28 + $0x8c] sm:$0xf0]  ;;  %v5813_v8 = vld [vmem:[%s6335_s28 + $0x84] sm:$0xf]  ;;  %v5351_v52 = vor.u32 %v5801_v43, %v5348_v45 }
 0x67f   : > { %v6031_v11 = vpop.eup %6030  ;;  %6036 = vtanh.f32 %v3265_v4  ;;  %v7139_v17 = vadd.f32 %v3277_v12, %v3275_v30  ;;  %3837 = vmatpush.bf16.msrb.mxu1 %v5415_v61  ;;  %v5394_v4 = vld [vmem:[%s6335_s28 + $0x80] sm:$0xf]  ;;  %v5402_v30 = vld [vmem:[%s6335_s28 + $0x88] sm:$0xf]  ;;  %v5816_v12 = vld [vmem:[%s6335_s28 + $0x94] sm:$0xf0] }
 0x680   : > { %v6033_v13 = vpop.eup %6032  ;;  %v3252_v14 = vmul.f32 0.5, %v6031_v11  ;;  %6038 = vtanh.f32 %v3266_v10  ;;  %3851 = vmatpush.bf16.msrb.mxu2 %v5419_v0  ;;  %3865 = vmatpush.bf16.msrb.mxu3 %v5423_v3  ;;  %v5395_v10 = vor.u32 %v5815_v24, %v5394_v4  ;;  %v5396_v11 = vld [vmem:[%s6335_s28 + $0x90] sm:$0xf0]  ;;  %v5804_v47 = vld [vmem:[%s6335_s28 + $0x34] sm:$0xf0]  ;;  %v3296_v57 = vld [vmem:[#allocation2 + $0xd0] sm:$0xff] }
 0x681   : > { %v3260_v33 = vmul.f32 0.5, %v6033_v13  ;;  %6040 = vtanh.f32 %v7139_v17  ;;  %v5399_v13 = vor.u32 %v5813_v8, %v5396_v11  ;;  %v5355_v15 = vor.u32 %v5804_v47, %v5354_v9  ;;  %v5802_v53 = vld [vmem:[%s6335_s28 + $0x2c] sm:$0xf]  ;;  %v5356_v54 = vld [vmem:[%s6335_s28 + $0x38] sm:$0xf0]  ;;  %v3297_v58 = vld [vmem:[#allocation2 + $0x10] sm:$0xff] }
 0x682   : > { %v3254_v16 = vadd.f32 0.5, %v3252_v14  ;;  %v5403_v14 = vor.u32 %v5816_v12, %v5402_v30  ;;  %3824 = vmatpush.bf16.msrb.mxu0 %v5395_v10  ;;  %v5359_v59 = vor.u32 %v5802_v53, %v5356_v54  ;;  %v5330_v61 = vld [vmem:[%s6335_s28] sm:$0xf]  ;;  %v5799_v0 = vld [vmem:[%s6335_s28 + $0xc] sm:$0xf0]  ;;  %v3301_v10 = vunpack.c.l.bf16 %v3296_v57 }
 0x683   : > { %v3262_v18 = vadd.f32 0.5, %v3260_v33  ;;  %v5814_v33 = vld [vmem:[%s6335_s28 + $0x8c] sm:$0xf]  ;;  %3838 = vmatpush.bf16.msrb.mxu1 %v5399_v13  ;;  %v5797_v1 = vld [vmem:[%s6335_s28 + $0x4] sm:$0xf]  ;;  %v5331_v4 = vor.u32 %v5799_v0, %v5330_v61  ;;  %v3303_v11 = vunpack.c.l.bf16 %v3297_v58 }
 0x684   : > { %v6035_v19 = vpop.eup %6034  ;;  %3852 = vmatpush.bf16.msrb.mxu2 %v5403_v14  ;;  %v5332_v24 = vld [vmem:[%s6335_s28 + $0x10] sm:$0xf0]  ;;  %v5338_v8 = vld [vmem:[%s6335_s28 + $0x8] sm:$0xf]  ;;  %v5800_v12 = vld [vmem:[%s6335_s28 + $0x14] sm:$0xf0] }
 0x685   : > { %v3276_v5 = vmul.f32 %v3262_v18, %v7071_v46  ;;  %v3278_v20 = vmul.f32 %v6035_v19, %v3254_v16  ;;  %v6037_v41 = vpop.eup %6036  ;;  %v5404_v16 = vld [vmem:[%s6335_s28 + $0x98] sm:$0xf0]  ;;  %v5378_v19 = vld [vmem:[%s6335_s28 + $0x60] sm:$0xf]  ;;  %v5335_v30 = vor.u32 %v5797_v1, %v5332_v24  ;;  %v5798_v13 = vld [vmem:[%s6335_s28 + $0xc] sm:$0xf] }
 0x686   : > { %v6039_v42 = vpop.eup %6038  ;;  %v3269_v6 = vmul.f32 0.5, %v6037_v41  ;;  %v5407_v18 = vor.u32 %v5814_v33, %v5404_v16  ;;  %v5340_v14 = vld [vmem:[%s6335_s28 + $0x18] sm:$0xf0]  ;;  %v3304_v33 = vunpack.c.h.bf16 %v3297_v58  ;;  %v5339_v16 = vor.u32 %v5800_v12, %v5338_v8  ;;  %v3615_v12 = vld [vmem:[#allocation2 + $0xf8] sm:$0xff] }
 0x687   : > { %v7143_v48 = vadd.f32 %v3278_v20, %v3276_v5  ;;  %v3270_v49 = vmul.f32 0.5, %v6039_v42  ;;  %v6041_v21 = vpop.eup %6040  ;;  %v5811_v5 = vld [vmem:[%s6335_s28 + $0x6c] sm:$0xf0]  ;;  %v5809_v20 = vld [vmem:[%s6335_s28 + $0x64] sm:$0xf] }
 0x688   : > { %v3271_v22 = vadd.f32 0.5, %v3269_v6  ;;  %3866 = vmatpush.bf16.msrb.mxu3 %v5407_v18  ;;  %v5379_v41 = vor.u32 %v5811_v5, %v5378_v19  ;;  %v5380_v42 = vld [vmem:[%s6335_s28 + $0x70] sm:$0xf0]  ;;  %v5386_v6 = vld [vmem:[%s6335_s28 + $0x68] sm:$0xf]  ;;  %v5343_v18 = vor.u32 %v5798_v13, %v5340_v14 }
 0x689   : > { %6042 = vtanh.f32 %v7143_v48  ;;  %v3272_v23 = vadd.f32 0.5, %v3270_v49  ;;  %v5812_v49 = vld [vmem:[%s6335_s28 + $0x74] sm:$0xf0]  ;;  %v3616_v13 = vld [vmem:[#allocation2 + $0x20] sm:$0xff] }
 0x68a   : > { %v3283_v25 = vmul.f32 %v6041_v21, %v3271_v22  ;;  %v5383_v21 = vor.u32 %v5809_v20, %v5380_v42  ;;  %v5387_v22 = vor.u32 %v5812_v49, %v5386_v6  ;;  %3825 = vmatpush.bf16.msrb.mxu0 %v5379_v41  ;;  %v3302_v41 = vunpack.c.h.bf16 %v3296_v57 }
 0x68c   : > { %3839 = vmatpush.bf16.msrb.mxu1 %v5383_v21  ;;  %3853 = vmatpush.bf16.msrb.mxu2 %v5387_v22  ;;  %v3298_v22 = vld [vmem:[#allocation2 + $0x28] sm:$0xff] }
 0x68d   : > { %v3305_v29 = vunpack.c.l.bf16 %v3298_v22 }
 0x68f   : > { %v6043_v46 = vpop.eup %6042 }
 0x690   : > { %v3284_v26 = vmul.f32 %v6043_v46, %v3272_v23  ;;  %v5810_v23 = vld [vmem:[%s6335_s28 + $0x6c] sm:$0xf]  ;;  %v5388_v46 = vld [vmem:[%s6335_s28 + $0x78] sm:$0xf0]  ;;  %3840 = vmatpush.bf16.msrb.mxu1 %v5367_v36  ;;  %3854 = vmatpush.bf16.msrb.mxu2 %v5371_v37 }
 0x692   : > { %v5865_v27 = vpack.c.bf16 %v3284_v26, %v3283_v25  ;;  %v3295_v25 = vld [vmem:[#allocation2 + $0xa8] sm:$0xff]  ;;  %v5391_v26 = vor.u32 %v5810_v23, %v5388_v46 }
 0x693   : > { %v3299_v60 = vunpack.c.l.bf16 %v3295_v25  ;;  %v3300_v38 = vunpack.c.h.bf16 %v3295_v25 }
 0x694   : > { %5866 = vst [vmem:[#allocation5 + $0x8] sm:$0xff] %v5865_v27   ;;  %3510 = vmatmul.bf16.vlgmr.msra.gmra.mxu0 %v5865_v27  ;;  %3524 = vmatmul.bf16.vlgmr.msra.gmra.mxu1 %v5865_v27 }
 0x695   : > { %3538 = vmatmul.bf16.vlgmr.msra.gmra.mxu2 %v5865_v27  ;;  %3552 = vmatmul.bf16.vlgmr.msra.gmra.mxu3 %v5865_v27  ;;  %v5362_v27 = vld [vmem:[%s6335_s28 + $0x40] sm:$0xf] }
 0x696   : > { %3867 = vmatpush.bf16.msrb.mxu3 %v5391_v26  ;;  %v5363_v31 = vor.u32 %v5807_v28, %v5362_v27  ;;  %3841 = vmatpush.bf16.msrb.mxu1 %v5351_v52 }
 0x697   : > { %3855 = vmatpush.bf16.msrb.mxu2 %v5355_v15 }
 0x698   : > { %3826 = vmatpush.bf16.msrb.mxu0 %v5363_v31  ;;  %v3306_v31 = vunpack.c.h.bf16 %v3298_v22 }
 0x69a   : > { %3868 = vmatpush.bf16.msrb.mxu3 %v5375_v39  ;;  %3842 = vmatpush.bf16.msrb.mxu1 %v5335_v30 }
 0x69b   : > { %3856 = vmatpush.bf16.msrb.mxu2 %v5339_v16  ;;  %v3620_v16 = vunpack.c.l.bf16 %v3615_v12 }
 0x69c   : > { %3827 = vmatpush.bf16.msrb.mxu0 %v5347_v44 }
 0x69e   : > { %3869 = vmatpush.bf16.msrb.mxu3 %v5359_v59 }
 0x6a0   : > { %3828 = vmatpush.bf16.msrb.mxu0 %v5331_v4 }
 0x6a2   : > { %3870 = vmatpush.bf16.msrb.mxu3 %v5343_v18  ;;  %v3621_v18 = vunpack.c.h.bf16 %v3615_v12 }
 0x711   : > { %v3511_v50 = vpop.f32.mrf.mxu0  ;;  %v3525_v51 = vpop.f32.mrf.mxu1 }
 0x712   : > { %v3558_v55 = vadd.f32 %v3511_v50, %v3299_v60  ;;  %v3559_v56 = vadd.f32 %v3525_v51, %v3300_v38 }
 0x714   : > { %v3566_v2 = vmul.f32 0.5, %v3558_v55  ;;  %v3574_v3 = vmul.f32 0.5, %v3559_v56 }
 0x716   : > { %6044 = vtanh.f32 %v3566_v2 }
 0x717   : > { %6046 = vtanh.f32 %v3574_v3 }
 0x718   : > { %v3539_v19 = vpop.f32.mrf.mxu2  ;;  %v3553_v5 = vpop.f32.mrf.mxu3 }
 0x719   : > { %v3560_v20 = vadd.f32 %v3539_v19, %v3301_v10  ;;  %v3513_v42 = vpop.f32.mrf.mxu0  ;;  %v3527_v6 = vpop.f32.mrf.mxu1  ;;  %v3561_v28 = vadd.f32 %v3553_v5, %v3302_v41  ;;  %v3622_v19 = vunpack.c.l.bf16 %v3616_v13  ;;  %v3623_v5 = vunpack.c.h.bf16 %v3616_v13 }
 0x71a   : > { %v3562_v49 = vadd.f32 %v3513_v42, %v3303_v11  ;;  %v3563_v21 = vadd.f32 %v3527_v6, %v3304_v33 }
 0x71b   : > { %6048 = vtanh.f32 %v3560_v20  ;;  %v3584_v63 = vmul.f32 0.5, %v3561_v28 }
 0x71c   : > { %v6045_v23 = vpop.eup %6044  ;;  %v3567_v46 = vmul.f32 0.5, %v3562_v49  ;;  %v3575_v25 = vmul.f32 0.5, %v3563_v21 }
 0x71d   : > { %v6047_v26 = vpop.eup %6046  ;;  %v3570_v27 = vmul.f32 0.5, %v6045_v23 }
 0x71e   : > { %v3578_v32 = vmul.f32 0.5, %v6047_v26  ;;  %6050 = vtanh.f32 %v3567_v46  ;;  %v3617_v46 = vld [vmem:[#allocation2 + $0x98] sm:$0xff] }
 0x71f   : > { %6052 = vtanh.f32 %v3575_v25  ;;  %v3572_v34 = vadd.f32 0.5, %v3570_v27 }
 0x720   : > { %v3580_v35 = vadd.f32 0.5, %v3578_v32  ;;  %v3541_v36 = vpop.f32.mrf.mxu2  ;;  %v3555_v37 = vpop.f32.mrf.mxu3  ;;  %v3624_v32 = vunpack.c.l.bf16 %v3617_v46 }
 0x721   : > { %v6049_v62 = vpop.eup %6048  ;;  %v3564_v60 = vadd.f32 %v3541_v36, %v3305_v29  ;;  %v3565_v38 = vadd.f32 %v3555_v37, %v3306_v31 }
 0x722   : > { %v3594_v7 = vmul.f32 %v3580_v35, %v7139_v17  ;;  %v3596_v43 = vmul.f32 %v6049_v62, %v3572_v34  ;;  %v3625_v34 = vunpack.c.h.bf16 %v3617_v46 }
 0x723   : > { %6054 = vtanh.f32 %v3564_v60  ;;  %v3585_v39 = vmul.f32 0.5, %v3565_v38 }
 0x724   : > { %v6051_v40 = vpop.eup %6050  ;;  %6056 = vtanh.f32 %v3584_v63  ;;  %v7211_v50 = vadd.f32 %v3596_v43, %v3594_v7 }
 0x725   : > { %v6053_v44 = vpop.eup %6052  ;;  %v3571_v45 = vmul.f32 0.5, %v6051_v40  ;;  %6058 = vtanh.f32 %v3585_v39 }
 0x726   : > { %v3579_v9 = vmul.f32 0.5, %v6053_v44  ;;  %6060 = vtanh.f32 %v7211_v50 }
 0x727   : > { %v3573_v47 = vadd.f32 0.5, %v3571_v45 }
 0x728   : > { %v3581_v51 = vadd.f32 0.5, %v3579_v9 }
 0x729   : > { %v6055_v52 = vpop.eup %6054 }
 0x72a   : > { %v3595_v15 = vmul.f32 %v3581_v51, %v7143_v48  ;;  %v3597_v53 = vmul.f32 %v6055_v52, %v3573_v47  ;;  %v6057_v54 = vpop.eup %6056  ;;  %v3614_v48 = vld [vmem:[#allocation2 + $0xa0] sm:$0xff] }
 0x72b   : > { %v6059_v55 = vpop.eup %6058  ;;  %v3588_v17 = vmul.f32 0.5, %v6057_v54  ;;  %v3618_v4 = vunpack.c.l.bf16 %v3614_v48  ;;  %v3619_v24 = vunpack.c.h.bf16 %v3614_v48 }
 0x72c   : > { %v7215_v56 = vadd.f32 %v3597_v53, %v3595_v15  ;;  %v3589_v57 = vmul.f32 0.5, %v6059_v55  ;;  %v6061_v58 = vpop.eup %6060 }
 0x72d   : > { %v3590_v59 = vadd.f32 0.5, %v3588_v17 }
 0x72e   : > { %6062 = vtanh.f32 %v7215_v56  ;;  %v3591_v61 = vadd.f32 0.5, %v3589_v57 }
 0x72f   : > { %v3602_v1 = vmul.f32 %v6061_v58, %v3590_v59 }
 0x734   : > { %v6063_v0 = vpop.eup %6062 }
 0x735   : > { %v3603_v2 = vmul.f32 %v6063_v0, %v3591_v61 }
 0x737   : > { %v5870_v3 = vpack.c.bf16 %v3603_v2, %v3602_v1 }
 0x739   : > { %5871 = vst [vmem:[#allocation5 + $0x10] sm:$0xff] %v5870_v3   ;;  %3829 = vmatmul.bf16.vlgmr.msrb.gmra.mxu0 %v5870_v3  ;;  %3843 = vmatmul.bf16.vlgmr.msrb.gmra.mxu1 %v5870_v3 }
 0x73a   : > { %3857 = vmatmul.bf16.vlgmr.msrb.gmra.mxu2 %v5870_v3  ;;  %3871 = vmatmul.bf16.vlgmr.msrb.gmra.mxu3 %v5870_v3 }
 0x7b6   : > { %v3830_v8 = vpop.f32.mrf.mxu0  ;;  %v3844_v10 = vpop.f32.mrf.mxu1 }
 0x7b7   : > { %v3877_v11 = vadd.f32 %v3830_v8, %v3618_v4  ;;  %v3878_v30 = vadd.f32 %v3844_v10, %v3619_v24 }
 0x7b9   : > { %v3885_v14 = vmul.f32 0.5, %v3877_v11  ;;  %v3893_v33 = vmul.f32 0.5, %v3878_v30 }
 0x7bb   : > { %6064 = vtanh.f32 %v3885_v14 }
 0x7bc   : > { %6066 = vtanh.f32 %v3893_v33 }
 0x7bd   : > { %v3858_v20 = vpop.f32.mrf.mxu2  ;;  %v3872_v41 = vpop.f32.mrf.mxu3 }
 0x7be   : > { %v3879_v42 = vadd.f32 %v3858_v20, %v3620_v16  ;;  %v3880_v6 = vadd.f32 %v3872_v41, %v3621_v18  ;;  %v3832_v49 = vpop.f32.mrf.mxu0  ;;  %v3846_v21 = vpop.f32.mrf.mxu1 }
 0x7bf   : > { %v3881_v22 = vadd.f32 %v3832_v49, %v3622_v19  ;;  %v3882_v23 = vadd.f32 %v3846_v21, %v3623_v5 }
 0x7c0   : > { %6068 = vtanh.f32 %v3879_v42  ;;  %v3903_v25 = vmul.f32 0.5, %v3880_v6 }
 0x7c1   : > { %v6065_v26 = vpop.eup %6064  ;;  %v3886_v27 = vmul.f32 0.5, %v3881_v22  ;;  %v3894_v28 = vmul.f32 0.5, %v3882_v23 }
 0x7c2   : > { %v6067_v29 = vpop.eup %6066  ;;  %v3889_v31 = vmul.f32 0.5, %v6065_v26  ;;  %6070 = vtanh.f32 %v3903_v25 }
 0x7c3   : > { %v3897_v35 = vmul.f32 0.5, %v6067_v29  ;;  %6072 = vtanh.f32 %v3886_v27 }
 0x7c4   : > { %v3891_v36 = vadd.f32 0.5, %v3889_v31  ;;  %6074 = vtanh.f32 %v3894_v28 }
 0x7c5   : > { %v3899_v37 = vadd.f32 0.5, %v3897_v35  ;;  %v3860_v62 = vpop.f32.mrf.mxu2  ;;  %v3874_v63 = vpop.f32.mrf.mxu3 }
 0x7c6   : > { %v6069_v60 = vpop.eup %6068  ;;  %v3883_v38 = vadd.f32 %v3860_v62, %v3624_v32  ;;  %v3884_v39 = vadd.f32 %v3874_v63, %v3625_v34 }
 0x7c7   : > { %v3913_v40 = vmul.f32 %v3899_v37, %v7211_v50  ;;  %v3915_v7 = vmul.f32 %v6069_v60, %v3891_v36 }
 0x7c8   : > { %v6071_v43 = vpop.eup %6070  ;;  %6076 = vtanh.f32 %v3883_v38  ;;  %v3904_v44 = vmul.f32 0.5, %v3884_v39 }
 0x7c9   : > { %v6073_v45 = vpop.eup %6072  ;;  %v3917_v9 = vadd.f32 %v3915_v7, %v3913_v40  ;;  %v3907_v15 = vmul.f32 0.5, %v6071_v43 }
 0x7ca   : > { %v6075_v47 = vpop.eup %6074  ;;  %v3890_v51 = vmul.f32 0.5, %v6073_v45  ;;  %6078 = vtanh.f32 %v3904_v44 }
 0x7cb   : > { %6080 = vtanh.f32 %v3917_v9  ;;  %v3898_v52 = vmul.f32 0.5, %v6075_v47  ;;  %v3909_v50 = vadd.f32 0.5, %v3907_v15 }
 0x7cc   : > { %v3892_v53 = vadd.f32 0.5, %v3890_v51 }
 0x7cd   : > { %v3900_v54 = vadd.f32 0.5, %v3898_v52 }
 0x7ce   : > { %v6077_v55 = vpop.eup %6076 }
 0x7cf   : > { %v3914_v17 = vmul.f32 %v3900_v54, %v7215_v56  ;;  %v3916_v57 = vmul.f32 %v6077_v55, %v3892_v53 }
 0x7d0   : > { %v6079_v58 = vpop.eup %6078 }
 0x7d1   : > { %v6081_v59 = vpop.eup %6080  ;;  %v3918_v61 = vadd.f32 %v3916_v57, %v3914_v17  ;;  %v3908_v1 = vmul.f32 0.5, %v6079_v58 }
 0x7d2   : > { %v3921_v0 = vmul.f32 %v6081_v59, %v3909_v50 }
 0x7d3   : > { %6082 = vtanh.f32 %v3918_v61  ;;  %v3910_v2 = vadd.f32 0.5, %v3908_v1 }
 0x7d4   : > { %3925 = vst [vmem:[#allocation3] sm:$0xff] %v3921_v0 }
 0x7d9   : > { %v6083_v3 = vpop.eup %6082 }
 0x7da   : > { %v3922_v48 = vmul.f32 %v6083_v3, %v3910_v2  ;;  %3935 = sbr.rel (%p5456_p2) target bundleno = 2184 (0x888), region = 64 }
 0x7dc   : > { %3926 = vst [vmem:[#allocation3 + $0x8] sm:$0xff] %v3922_v48  ;;  %v5875_v4 = vpack.c.bf16 %v3922_v48, %v3921_v0 }
 0x7de   : > { %5876 = vst [vmem:[#allocation5 + $0x38] sm:$0xff] %v5875_v4  }
 0x7df   : > { %v5836_v56 = vld [vmem:[%s7271_s4 + $0x38] sm:$0xff]  ;;  %v5835_v24 = vld [vmem:[%s7271_s4 + $0x30] sm:$0xff]  ;;  %v5834_v8 = vld [vmem:[%s7271_s4 + $0x28] sm:$0xff] }
 0x7e0   : > { %4007 = vmatpush.bf16.msra.mxu0 %v5836_v56  ;;  %v5833_v10 = vld [vmem:[%s7271_s4 + $0x20] sm:$0xff]  ;;  %v5832_v11 = vld [vmem:[%s7271_s4 + $0x18] sm:$0xff]  ;;  %v5831_v30 = vld [vmem:[%s7271_s4 + $0x10] sm:$0xff] }
 0x7e1   : > { %v5830_v12 = vld [vmem:[%s7271_s4 + $0x8] sm:$0xff]  ;;  %v5829_v13 = vld [vmem:[%s7271_s4] sm:$0xff] }
 0x7e2   : > { %v3936_v14 = vld [vmem:[#allocation3] sm:$0xff] }
 0x7e3   : > { %v3937_v33 = vld [vmem:[#allocation3 + $0x8] sm:$0xff]  ;;  %v6084_v18 = vld [vmem:[%s7272_s5] ss:$0 sm:$0xff] }
 0x7e4   : > { %4008 = vmatpush.bf16.msra.mxu0 %v5835_v24  ;;  %v3938_v16 = vpack.c.bf16 %v3937_v33, %v3936_v14 }
 0x7e8   : > { %4009 = vmatpush.bf16.msra.mxu0 %v5834_v8 }
 0x7ec   : > { %4010 = vmatpush.bf16.msra.mxu0 %v5833_v10 }
 0x7f0   : > { %4011 = vmatpush.bf16.msra.mxu0 %v5832_v11 }
 0x7f4   : > { %4012 = vmatpush.bf16.msra.mxu0 %v5831_v30 }
 0x7f8   : > { %4013 = vmatpush.bf16.msra.mxu0 %v5830_v12 }
 0x7fc   : > { %4014 = vmatpush.bf16.msra.mxu0 %v5829_v13 }
 0x7ff   : > { %4015 = vmatmul.bf16.vlgmr.msra.gmra.mxu0 %v3938_v16 }
 0x87c   : > { %v4016_v19 = vpop.f32.mrf.mxu0 }
 0x87d   : > { %v4017_v5 = vadd.f32 %v6084_v18, %v4016_v19 }
 0x87f   : > { %4021 = vst [vmem:[%s7273_s6] sm:$0xff] %v4017_v5 }
 0x884   : > { %v4018_v20 = vpop.f32.mrf.mxu0 }
 0x885   : > { %v4019_v41 = vadd.f32 %v6084_v18, %v4018_v20 }
 0x887   : > { %4022 = vst [vmem:[%s7273_s6 + $0x8] sm:$0xff] %v4019_v41 }
 0x888 PF: > { %p19_p3 = scmp.ge.s32.totalorder %s6245_s26, 4   ;;  %s7280_s21 = smov %s6175_s22 }
 0x889   : > { %s7281_s22 = smov %s6179_s23  ;;  %s7282_s23 = smov %s6255_s29 }
 0x88a   : > { %s7283_s24 = smov %s6245_s26  ;;  %21 = sbr.rel (!%p19_p3) target bundleno = 7 (0x7), region = 122 }
 0x88f   :  { %4034 = vsyncpa [#allocation7], 1 }
 0x890   :  { %4036 = vsyncpa [#allocation7 + $0x1], 1 }
 0x891   :  { %4037 = vsyncpa [#allocation9], 1 }
 0x892   :  { %4039 = vsyncpa [#allocation9 + $0x1], 1 }

</bundles_post_ra>
